<compile_context>
chip_gen: v7x
topology: tpu7x:2x2x1
jax: 0.10.0
libtpu: 0.0.40
codegen_flags: <defaults>
</compile_context>

<pallas_src>
import functools

import jax
import jax.numpy as jnp
from jax.experimental import pallas as pl
from jax.experimental.pallas import tpu as pltpu

# "highest" keeps the pure-JAX reference at full f32 matmul accuracy so the
# kernel-vs-reference check below is tight; Mosaic handles it fine in-kernel.
jax.config.update("jax_default_matmul_precision", "highest")

# ----------------------------- model config (small, consistent with module) --
MAX_WORDS = 8        # T  (seq length, module's global MAX_WORDS)
BATCH     = 2        # B
VOCAB     = 100      # vocab_size
EMB       = 32       # embedding_size
HIDDEN    = 32       # hidden_size  -> 2H = 64, 4H = 128, 8H = 256
D_A       = 32       # d_a
N_CLASS   = 16       # n_class (num labels)


# ----------------------------- fused forward kernel --------------------------
def _xmltc_kernel(tok_ref, emb_ref, wih_ref, bih_ref, whh_ref, lemb_ref,
                  wq_ref, bq_ref, wk_ref, bk_ref, w1_ref, b1_ref,
                  w2_ref, b2_ref, wwt_ref, bwt_ref, wf_ref, bf_ref,
                  wo_ref, bo_ref, out_ref, *, batch, seq, hidden, n_class):
    f32 = jnp.float32
    B, T, H, L = batch, seq, hidden, n_class
    H2, H4, H8 = 2 * H, 4 * H, 8 * H

    # ---- embedding gather: SMEM token scalars -> dynamic rows of VMEM table ----
    rows = []
    for t in range(T):                                   # time-major row order t*B + b
        for b in range(B):
            tok = tok_ref[b, t]
            rows.append(emb_ref[pl.ds(tok, 1), :])       # (1, E)
    x_all = jnp.concatenate(rows, axis=0)                # (T*B, E)

    # ---- input projection, both directions, all timesteps, one matmul ----
    xp = jnp.dot(x_all, wih_ref[...], preferred_element_type=f32) + bih_ref[...]  # (T*B, 8H)

    whh = whh_ref[...]                                   # (2H, 8H) block-diagonal

    # ---- batched bidirectional recurrence, fully unrolled (T static) ----
    # h_cat = [h_fwd | h_bwd] (B, 2H); one (B,2H)@(2H,8H) MXU push per step.
    h_cat = jnp.zeros((B, H2), f32)
    c_cat = jnp.zeros((B, H2), f32)
    hs = []
    for t in range(T):
        tr = T - 1 - t
        gin = jnp.concatenate([xp[t * B:(t + 1) * B, 0:H4],
                               xp[tr * B:(tr + 1) * B, H4:H8]], axis=1)      # (B, 8H)
        gates = gin + jnp.dot(h_cat, whh, preferred_element_type=f32)        # (B, 8H)
        # whole-vreg nonlinearities, then lane-select gates (gate order i,f,g,o)
        sg = jax.nn.sigmoid(gates)
        tg = jnp.tanh(gates)
        i_cat = jnp.concatenate([sg[:, 0 * H:1 * H], sg[:, 4 * H:5 * H]], axis=1)
        f_cat = jnp.concatenate([sg[:, 1 * H:2 * H], sg[:, 5 * H:6 * H]], axis=1)
        g_cat = jnp.concatenate([tg[:, 2 * H:3 * H], tg[:, 6 * H:7 * H]], axis=1)
        o_cat = jnp.concatenate([sg[:, 3 * H:4 * H], sg[:, 7 * H:8 * H]], axis=1)
        c_cat = f_cat * c_cat + i_cat * g_cat
        h_cat = o_cat * jnp.tanh(c_cat)
        hs.append(h_cat)

    # ---- assemble LSTM output in vregs (never written to HBM) ----
    # output position t: forward = hs[t][:, :H], backward = hs[T-1-t][:, H:2H]
    v_list = []
    for b in range(B):
        rows_b = [jnp.concatenate([hs[t][b:b + 1, 0:H],
                                   hs[T - 1 - t][b:b + 1, H:H2]], axis=1)
                  for t in range(T)]
        v_list.append(jnp.concatenate(rows_b, axis=0))   # (T, 2H)
    v_all = jnp.concatenate(v_list, axis=0)              # (B*T, 2H)

    # ---- batch-invariant label query projection, computed exactly once ----
    lq = jnp.dot(lemb_ref[...], wq_ref[...], preferred_element_type=f32) + bq_ref[...]  # (L, H)

    # ---- key / self-attention projections batched over both batch rows ----
    k_all = jnp.dot(v_all, wk_ref[...], preferred_element_type=f32) + bk_ref[...]       # (B*T, H)
    a_all = jnp.tanh(jnp.dot(v_all, w1_ref[...], preferred_element_type=f32) + b1_ref[...])
    sl_all = jnp.dot(a_all, w2_ref[...], preferred_element_type=f32) + b2_ref[...]      # (B*T, L)

    wwt, bwt = wwt_ref[...], bwt_ref[...]

    fused_list = []
    for b in range(B):                                   # B=2, static unroll
        v_b = v_list[b]                                  # (T, 2H)
        k_b = k_all[b * T:(b + 1) * T, :]                # (T, H)

        # label-guided attention
        sim = jax.lax.dot_general(lq, k_b, (((1,), (1,)), ((), ())),
                                  preferred_element_type=f32)       # (L, T)
        sim = jax.nn.softmax(sim, axis=-1)               # softmax over T (torch dim=2)
        out1 = jnp.dot(sim, v_b, preferred_element_type=f32)        # (L, 2H)

        # structured self-attention
        attn = jax.nn.softmax(sl_all[b * T:(b + 1) * T, :], axis=0)  # over T (torch dim=1)
        out2 = jax.lax.dot_general(attn, v_b, (((0,), (0,)), ((), ())),
                                   preferred_element_type=f32)      # (L, 2H)

        # gated fusion: N=1 matmuls replaced by VPU lane reductions
        f1 = jax.nn.sigmoid(jnp.sum(out1 * wwt[0:1, :], axis=-1, keepdims=True)
                            + bwt[:, 0:1])
        f2 = jax.nn.sigmoid(jnp.sum(out2 * wwt[1:2, :], axis=-1, keepdims=True)
                            + bwt[:, 1:2])
        g1 = f1 / (f1 + f2)
        fused_list.append(g1 * out1 + (1.0 - g1) * out2)  # (L, 2H)

    # ---- final projections, batched over B ----
    fused_all = jnp.concatenate(fused_list, axis=0)       # (B*L, 2H)
    hf_all = jax.nn.relu(jnp.dot(fused_all, wf_ref[...],
                                 preferred_element_type=f32) + bf_ref[...])  # (B*L, H)
    scores = jax.lax.dot_general(wo_ref[...], hf_all, (((1,), (1,)), ((), ())),
                                 preferred_element_type=f32) + bo_ref[...]   # (1, B*L)
    logits = jnp.concatenate([scores[:, b * L:(b + 1) * L] for b in range(B)],
                             axis=0)                      # (B, L)

    # TODO(synk): torch does log_softmax over dim=0 in float64; TPU has no native
    # f64, so this tiny (B, L) reduction is done in f32 in-kernel.
    m = jnp.max(logits, axis=0, keepdims=True)
    z = logits - m
    lse = jnp.log(jnp.sum(jnp.exp(z), axis=0, keepdims=True))
    out_ref[...] = (z - lse).astype(out_ref.dtype)


def xmltc_forward(packed, tokens):
    B, T = tokens.shape
    L, H = packed["label_embedding"].shape
    vmem = pl.BlockSpec(memory_space=pltpu.MemorySpace.VMEM)
    smem = pl.BlockSpec(memory_space=pltpu.MemorySpace.SMEM)
    return pl.pallas_call(
        functools.partial(_xmltc_kernel, batch=B, seq=T, hidden=H, n_class=L),
        out_shape=jax.ShapeDtypeStruct((B, L), jnp.float32),
        in_specs=[smem] + [vmem] * 19,
        out_specs=vmem,
    )(tokens,
      packed["embedding"], packed["w_ih_cat"], packed["b_cat"], packed["w_hh_bd"],
      packed["label_embedding"], packed["w_query"], packed["b_query"],
      packed["w_key"], packed["b_key"], packed["w_first"], packed["b_first"],
      packed["w_second"], packed["b_second"], packed["wwt"], packed["bwt"],
      packed["w_final"], packed["b_final"], packed["w_out_row"], packed["b_out"])


forward = jax.jit(xmltc_forward)


# ----------------------------- parameters (deterministic, synthetic) ---------
def init_params(key):
    ks = iter(jax.random.split(key, 32))
    H, E, DA, L, H2 = HIDDEN, EMB, D_A, N_CLASS, 2 * HIDDEN

    def dense(fan_in, fan_out):
        w = jax.random.normal(next(ks), (fan_in, fan_out), jnp.float32)
        return w / jnp.sqrt(jnp.float32(fan_in))

    def bias(n):
        return 0.01 * jax.random.normal(next(ks), (n,), jnp.float32)

    return {
        "embedding": jax.random.normal(next(ks), (VOCAB, E), jnp.float32) * 0.1,
        "w_ih_f": dense(E, 4 * H), "w_hh_f": dense(H, 4 * H),
        "b_ih_f": bias(4 * H), "b_hh_f": bias(4 * H),
        "w_ih_b": dense(E, 4 * H), "w_hh_b": dense(H, 4 * H),
        "b_ih_b": bias(4 * H), "b_hh_b": bias(4 * H),
        "w_key": dense(H2, H), "b_key": bias(H),
        "w_query": dense(H, H), "b_query": bias(H),
        "w_first": dense(H2, DA), "b_first": bias(DA),
        "w_second": dense(DA, L), "b_second": bias(L),
        "w_wt1": dense(H2, 1), "b_wt1": bias(1),
        "w_wt2": dense(H2, 1), "b_wt2": bias(1),
        "w_final": dense(H2, H), "b_final": bias(H),
        "w_out": dense(H, 1), "b_out": bias(1),
        "label_embedding": jax.random.normal(next(ks), (L, H), jnp.float32)
                           * jnp.sqrt(2.0 / (L + H)),
    }


def pack_params(p):
    """One-time weight packing (hoisted out of the latency-critical forward)."""
    H = HIDDEN
    w_ih_cat = jnp.concatenate([p["w_ih_f"], p["w_ih_b"]], axis=1)            # (E, 8H)
    b_cat = jnp.concatenate([p["b_ih_f"] + p["b_hh_f"],
                             p["b_ih_b"] + p["b_hh_b"]]).reshape(1, -1)       # (1, 8H)
    w_hh_bd = jnp.zeros((2 * H, 8 * H), jnp.float32)                          # block-diag
    w_hh_bd = w_hh_bd.at[0:H, 0:4 * H].set(p["w_hh_f"])
    w_hh_bd = w_hh_bd.at[H:2 * H, 4 * H:8 * H].set(p["w_hh_b"])
    wwt = jnp.concatenate([p["w_wt1"], p["w_wt2"]], axis=1).T                 # (2, 2H)
    bwt = jnp.concatenate([p["b_wt1"], p["b_wt2"]]).reshape(1, 2)
    return {
        "embedding": p["embedding"],
        "w_ih_cat": w_ih_cat, "b_cat": b_cat, "w_hh_bd": w_hh_bd,
        "label_embedding": p["label_embedding"],
        "w_query": p["w_query"], "b_query": p["b_query"].reshape(1, -1),
        "w_key": p["w_key"], "b_key": p["b_key"].reshape(1, -1),
        "w_first": p["w_first"], "b_first": p["b_first"].reshape(1, -1),
        "w_second": p["w_second"], "b_second": p["b_second"].reshape(1, -1),
        "wwt": wwt, "bwt": bwt,
        "w_final": p["w_final"], "b_final": p["b_final"].reshape(1, -1),
        "w_out_row": p["w_out"].T, "b_out": p["b_out"].reshape(1, 1),
    }


# ----------------------------- pure-JAX reference (for validation) ----------
def forward_reference(raw, tokens):
    H = HIDDEN
    emb = raw["embedding"][tokens]                                  # (B, T, E)

    def lstm_dir(x_seq, w_ih, w_hh, b):                             # x_seq in processing order
        Bb = x_seq.shape[0]
        h = jnp.zeros((Bb, H), jnp.float32)
        c = jnp.zeros((Bb, H), jnp.float32)
        outs = []
        for t in range(x_seq.shape[1]):
            gates = x_seq[:, t, :] @ w_ih + h @ w_hh + b
            i = jax.nn.sigmoid(gates[:, 0:H])
            f = jax.nn.sigmoid(gates[:, H:2 * H])
            g = jnp.tanh(gates[:, 2 * H:3 * H])
            o = jax.nn.sigmoid(gates[:, 3 * H:4 * H])
            c = f * c + i * g
            h = o * jnp.tanh(c)
            outs.append(h)
        return jnp.stack(outs, axis=1)                              # (B, T, H)

    out_f = lstm_dir(emb, raw["w_ih_f"], raw["w_hh_f"], raw["b_ih_f"] + raw["b_hh_f"])
    out_b = lstm_dir(emb[:, ::-1, :], raw["w_ih_b"], raw["w_hh_b"],
                     raw["b_ih_b"] + raw["b_hh_b"])[:, ::-1, :]
    output = jnp.concatenate([out_f, out_b], axis=-1)               # (B, T, 2H)

    attn_key = output @ raw["w_key"] + raw["b_key"]                 # (B, T, H)
    lq = raw["label_embedding"] @ raw["w_query"] + raw["b_query"]   # (L, H)
    sim = jax.nn.softmax(jnp.einsum("lh,bth->blt", lq, attn_key), axis=2)
    out1 = jnp.einsum("blt,btk->blk", sim, output)                  # (B, L, 2H)

    a = jnp.tanh(output @ raw["w_first"] + raw["b_first"])
    sl = a @ raw["w_second"] + raw["b_second"]                      # (B, T, L)
    attn = jax.nn.softmax(sl, axis=1)
    out2 = jnp.einsum("btl,btk->blk", attn, output)                 # (B, L, 2H)

    f1 = jax.nn.sigmoid(out1 @ raw["w_wt1"] + raw["b_wt1"])
    f2 = jax.nn.sigmoid(out2 @ raw["w_wt2"] + raw["b_wt2"])
    g1 = f1 / (f1 + f2)
    fused = g1 * out1 + (1.0 - g1) * out2
    hf = jax.nn.relu(fused @ raw["w_final"] + raw["b_final"])       # (B, L, H)
    logits = (hf @ raw["w_out"] + raw["b_out"])[..., 0]             # (B, L)
    return jax.nn.log_softmax(logits, axis=0)


# ----------------------------- main -------------------------------------------
if __name__ == "__main__":
    key = jax.random.PRNGKey(0)
    k_param, k_tok = jax.random.split(key)
    raw = init_params(k_param)
    packed = pack_params(raw)
    tokens = jax.random.randint(k_tok, (BATCH, MAX_WORDS), 0, VOCAB, dtype=jnp.int32)

    out = forward(packed, tokens)
    out = jax.block_until_ready(out)
    assert out.shape == (BATCH, N_CLASS), out.shape
    assert bool(jnp.all(jnp.isfinite(out)))

    ref = forward_reference(raw, tokens)
    err = float(jnp.max(jnp.abs(out - ref)))
    assert err < 2e-3, f"max |kernel - reference| = {err}"

    print("KERNEL_OK")
</pallas_src>

<mosaic_0001>
module attributes {stable_mosaic.version = 11 : i64} {
  func.func @_xmltc_kernel(%arg0: memref<2x8xi32, #tpu.memory_space<smem>>, %arg1: memref<100x32xf32, #tpu.memory_space<vmem>>, %arg2: memref<32x256xf32, #tpu.memory_space<vmem>>, %arg3: memref<1x256xf32, #tpu.memory_space<vmem>>, %arg4: memref<64x256xf32, #tpu.memory_space<vmem>>, %arg5: memref<16x32xf32, #tpu.memory_space<vmem>>, %arg6: memref<32x32xf32, #tpu.memory_space<vmem>>, %arg7: memref<1x32xf32, #tpu.memory_space<vmem>>, %arg8: memref<64x32xf32, #tpu.memory_space<vmem>>, %arg9: memref<1x32xf32, #tpu.memory_space<vmem>>, %arg10: memref<64x32xf32, #tpu.memory_space<vmem>>, %arg11: memref<1x32xf32, #tpu.memory_space<vmem>>, %arg12: memref<32x16xf32, #tpu.memory_space<vmem>>, %arg13: memref<1x16xf32, #tpu.memory_space<vmem>>, %arg14: memref<2x64xf32, #tpu.memory_space<vmem>>, %arg15: memref<1x2xf32, #tpu.memory_space<vmem>>, %arg16: memref<64x32xf32, #tpu.memory_space<vmem>>, %arg17: memref<1x32xf32, #tpu.memory_space<vmem>>, %arg18: memref<1x32xf32, #tpu.memory_space<vmem>>, %arg19: memref<1x1xf32, #tpu.memory_space<vmem>>, %arg20: memref<2x16xf32, #tpu.memory_space<vmem>>) attributes {dimension_semantics = [], scalar_prefetch = 0 : i64, scratch_operands = 0 : i64, tpu.core_type = #tpu.core_type<tc>} {
    %c0 = arith.constant 0 : index
    %c0_0 = arith.constant 0 : index
    %0 = memref.load %arg0[%c0, %c0_0] : memref<2x8xi32, #tpu.memory_space<smem>>
    %1 = arith.index_cast %0 : i32 to index
    %c0_1 = arith.constant 0 : index
    %2 = vector.load %arg1[%1, %c0_1] : memref<100x32xf32, #tpu.memory_space<vmem>>, vector<1x32xf32>
    %c1 = arith.constant 1 : index
    %c0_2 = arith.constant 0 : index
    %3 = memref.load %arg0[%c1, %c0_2] : memref<2x8xi32, #tpu.memory_space<smem>>
    %4 = arith.index_cast %3 : i32 to index
    %c0_3 = arith.constant 0 : index
    %5 = vector.load %arg1[%4, %c0_3] : memref<100x32xf32, #tpu.memory_space<vmem>>, vector<1x32xf32>
    %c0_4 = arith.constant 0 : index
    %c1_5 = arith.constant 1 : index
    %6 = memref.load %arg0[%c0_4, %c1_5] : memref<2x8xi32, #tpu.memory_space<smem>>
    %7 = arith.index_cast %6 : i32 to index
    %c0_6 = arith.constant 0 : index
    %8 = vector.load %arg1[%7, %c0_6] : memref<100x32xf32, #tpu.memory_space<vmem>>, vector<1x32xf32>
    %c1_7 = arith.constant 1 : index
    %c1_8 = arith.constant 1 : index
    %9 = memref.load %arg0[%c1_7, %c1_8] : memref<2x8xi32, #tpu.memory_space<smem>>
    %10 = arith.index_cast %9 : i32 to index
    %c0_9 = arith.constant 0 : index
    %11 = vector.load %arg1[%10, %c0_9] : memref<100x32xf32, #tpu.memory_space<vmem>>, vector<1x32xf32>
    %c0_10 = arith.constant 0 : index
    %c2 = arith.constant 2 : index
    %12 = memref.load %arg0[%c0_10, %c2] : memref<2x8xi32, #tpu.memory_space<smem>>
    %13 = arith.index_cast %12 : i32 to index
    %c0_11 = arith.constant 0 : index
    %14 = vector.load %arg1[%13, %c0_11] : memref<100x32xf32, #tpu.memory_space<vmem>>, vector<1x32xf32>
    %c1_12 = arith.constant 1 : index
    %c2_13 = arith.constant 2 : index
    %15 = memref.load %arg0[%c1_12, %c2_13] : memref<2x8xi32, #tpu.memory_space<smem>>
    %16 = arith.index_cast %15 : i32 to index
    %c0_14 = arith.constant 0 : index
    %17 = vector.load %arg1[%16, %c0_14] : memref<100x32xf32, #tpu.memory_space<vmem>>, vector<1x32xf32>
    %c0_15 = arith.constant 0 : index
    %c3 = arith.constant 3 : index
    %18 = memref.load %arg0[%c0_15, %c3] : memref<2x8xi32, #tpu.memory_space<smem>>
    %19 = arith.index_cast %18 : i32 to index
    %c0_16 = arith.constant 0 : index
    %20 = vector.load %arg1[%19, %c0_16] : memref<100x32xf32, #tpu.memory_space<vmem>>, vector<1x32xf32>
    %c1_17 = arith.constant 1 : index
    %c3_18 = arith.constant 3 : index
    %21 = memref.load %arg0[%c1_17, %c3_18] : memref<2x8xi32, #tpu.memory_space<smem>>
    %22 = arith.index_cast %21 : i32 to index
    %c0_19 = arith.constant 0 : index
    %23 = vector.load %arg1[%22, %c0_19] : memref<100x32xf32, #tpu.memory_space<vmem>>, vector<1x32xf32>
    %c0_20 = arith.constant 0 : index
    %c4 = arith.constant 4 : index
    %24 = memref.load %arg0[%c0_20, %c4] : memref<2x8xi32, #tpu.memory_space<smem>>
    %25 = arith.index_cast %24 : i32 to index
    %c0_21 = arith.constant 0 : index
    %26 = vector.load %arg1[%25, %c0_21] : memref<100x32xf32, #tpu.memory_space<vmem>>, vector<1x32xf32>
    %c1_22 = arith.constant 1 : index
    %c4_23 = arith.constant 4 : index
    %27 = memref.load %arg0[%c1_22, %c4_23] : memref<2x8xi32, #tpu.memory_space<smem>>
    %28 = arith.index_cast %27 : i32 to index
    %c0_24 = arith.constant 0 : index
    %29 = vector.load %arg1[%28, %c0_24] : memref<100x32xf32, #tpu.memory_space<vmem>>, vector<1x32xf32>
    %c0_25 = arith.constant 0 : index
    %c5 = arith.constant 5 : index
    %30 = memref.load %arg0[%c0_25, %c5] : memref<2x8xi32, #tpu.memory_space<smem>>
    %31 = arith.index_cast %30 : i32 to index
    %c0_26 = arith.constant 0 : index
    %32 = vector.load %arg1[%31, %c0_26] : memref<100x32xf32, #tpu.memory_space<vmem>>, vector<1x32xf32>
    %c1_27 = arith.constant 1 : index
    %c5_28 = arith.constant 5 : index
    %33 = memref.load %arg0[%c1_27, %c5_28] : memref<2x8xi32, #tpu.memory_space<smem>>
    %34 = arith.index_cast %33 : i32 to index
    %c0_29 = arith.constant 0 : index
    %35 = vector.load %arg1[%34, %c0_29] : memref<100x32xf32, #tpu.memory_space<vmem>>, vector<1x32xf32>
    %c0_30 = arith.constant 0 : index
    %c6 = arith.constant 6 : index
    %36 = memref.load %arg0[%c0_30, %c6] : memref<2x8xi32, #tpu.memory_space<smem>>
    %37 = arith.index_cast %36 : i32 to index
    %c0_31 = arith.constant 0 : index
    %38 = vector.load %arg1[%37, %c0_31] : memref<100x32xf32, #tpu.memory_space<vmem>>, vector<1x32xf32>
    %c1_32 = arith.constant 1 : index
    %c6_33 = arith.constant 6 : index
    %39 = memref.load %arg0[%c1_32, %c6_33] : memref<2x8xi32, #tpu.memory_space<smem>>
    %40 = arith.index_cast %39 : i32 to index
    %c0_34 = arith.constant 0 : index
    %41 = vector.load %arg1[%40, %c0_34] : memref<100x32xf32, #tpu.memory_space<vmem>>, vector<1x32xf32>
    %c0_35 = arith.constant 0 : index
    %c7 = arith.constant 7 : index
    %42 = memref.load %arg0[%c0_35, %c7] : memref<2x8xi32, #tpu.memory_space<smem>>
    %43 = arith.index_cast %42 : i32 to index
    %c0_36 = arith.constant 0 : index
    %44 = vector.load %arg1[%43, %c0_36] : memref<100x32xf32, #tpu.memory_space<vmem>>, vector<1x32xf32>
    %c1_37 = arith.constant 1 : index
    %c7_38 = arith.constant 7 : index
    %45 = memref.load %arg0[%c1_37, %c7_38] : memref<2x8xi32, #tpu.memory_space<smem>>
    %46 = arith.index_cast %45 : i32 to index
    %c0_39 = arith.constant 0 : index
    %47 = vector.load %arg1[%46, %c0_39] : memref<100x32xf32, #tpu.memory_space<vmem>>, vector<1x32xf32>
    %48 = tpu.concatenate %2, %5, %8, %11, %14, %17, %20, %23, %26, %29, %32, %35, %38, %41, %44, %47 in 0 : vector<1x32xf32>, vector<1x32xf32>, vector<1x32xf32>, vector<1x32xf32>, vector<1x32xf32>, vector<1x32xf32>, vector<1x32xf32>, vector<1x32xf32>, vector<1x32xf32>, vector<1x32xf32>, vector<1x32xf32>, vector<1x32xf32>, vector<1x32xf32>, vector<1x32xf32>, vector<1x32xf32>, vector<1x32xf32> -> vector<16x32xf32>
    %c0_40 = arith.constant 0 : index
    %c0_41 = arith.constant 0 : index
    %49 = vector.load %arg2[%c0_40, %c0_41] : memref<32x256xf32, #tpu.memory_space<vmem>>, vector<32x256xf32>
    %cst = arith.constant dense<0.000000e+00> : vector<16x256xf32>
    %50 = tpu.matmul %48, %49, %cst {dimension_numbers = #tpu.dot_dimension_numbers<[1], [0], [0], [1], [0, 0, 1, 1], [], []>, precision = #tpu.contract_precision<fp32>} : vector<16x32xf32>, vector<32x256xf32>, vector<16x256xf32> -> vector<16x256xf32>
    %c0_42 = arith.constant 0 : index
    %c0_43 = arith.constant 0 : index
    %51 = vector.load %arg3[%c0_42, %c0_43] : memref<1x256xf32, #tpu.memory_space<vmem>>, vector<1x256xf32>
    %52 = vector.broadcast %51 : vector<1x256xf32> to vector<16x256xf32>
    %53 = arith.addf %50, %52 : vector<16x256xf32>
    %c0_44 = arith.constant 0 : index
    %c0_45 = arith.constant 0 : index
    %54 = vector.load %arg4[%c0_44, %c0_45] : memref<64x256xf32, #tpu.memory_space<vmem>>, vector<64x256xf32>
    %cst_46 = arith.constant 0.000000e+00 : f32
    %55 = vector.broadcast %cst_46 : f32 to vector<2x64xf32>
    %cst_47 = arith.constant 0.000000e+00 : f32
    %56 = vector.broadcast %cst_47 : f32 to vector<2x64xf32>
    %57 = vector.extract_strided_slice %53 {offsets = [0, 0], sizes = [2, 128], strides = [1, 1]} : vector<16x256xf32> to vector<2x128xf32>
    %58 = vector.extract_strided_slice %53 {offsets = [14, 128], sizes = [2, 128], strides = [1, 1]} : vector<16x256xf32> to vector<2x128xf32>
    %59 = tpu.concatenate %57, %58 in 1 : vector<2x128xf32>, vector<2x128xf32> -> vector<2x256xf32>
    %cst_48 = arith.constant dense<0.000000e+00> : vector<2x256xf32>
    %60 = tpu.matmul %55, %54, %cst_48 {dimension_numbers = #tpu.dot_dimension_numbers<[1], [0], [0], [1], [0, 0, 1, 1], [], []>, precision = #tpu.contract_precision<fp32>} : vector<2x64xf32>, vector<64x256xf32>, vector<2x256xf32> -> vector<2x256xf32>
    %61 = arith.addf %59, %60 : vector<2x256xf32>
    %62 = arith.negf %61 : vector<2x256xf32>
    %63 = math.exp %62 : vector<2x256xf32>
    %cst_49 = arith.constant 1.000000e+00 : f32
    %64 = vector.broadcast %cst_49 : f32 to vector<2x256xf32>
    %65 = arith.addf %64, %63 : vector<2x256xf32>
    %66 = arith.divf %64, %65 : vector<2x256xf32>
    %67 = math.tanh %61 : vector<2x256xf32>
    %68 = vector.extract_strided_slice %66 {offsets = [0, 0], sizes = [2, 32], strides = [1, 1]} : vector<2x256xf32> to vector<2x32xf32>
    %69 = vector.extract_strided_slice %66 {offsets = [0, 128], sizes = [2, 32], strides = [1, 1]} : vector<2x256xf32> to vector<2x32xf32>
    %70 = tpu.concatenate %68, %69 in 1 : vector<2x32xf32>, vector<2x32xf32> -> vector<2x64xf32>
    %71 = vector.extract_strided_slice %66 {offsets = [0, 32], sizes = [2, 32], strides = [1, 1]} : vector<2x256xf32> to vector<2x32xf32>
    %72 = vector.extract_strided_slice %66 {offsets = [0, 160], sizes = [2, 32], strides = [1, 1]} : vector<2x256xf32> to vector<2x32xf32>
    %73 = tpu.concatenate %71, %72 in 1 : vector<2x32xf32>, vector<2x32xf32> -> vector<2x64xf32>
    %74 = vector.extract_strided_slice %67 {offsets = [0, 64], sizes = [2, 32], strides = [1, 1]} : vector<2x256xf32> to vector<2x32xf32>
    %75 = vector.extract_strided_slice %67 {offsets = [0, 192], sizes = [2, 32], strides = [1, 1]} : vector<2x256xf32> to vector<2x32xf32>
    %76 = tpu.concatenate %74, %75 in 1 : vector<2x32xf32>, vector<2x32xf32> -> vector<2x64xf32>
    %77 = vector.extract_strided_slice %66 {offsets = [0, 96], sizes = [2, 32], strides = [1, 1]} : vector<2x256xf32> to vector<2x32xf32>
    %78 = vector.extract_strided_slice %66 {offsets = [0, 224], sizes = [2, 32], strides = [1, 1]} : vector<2x256xf32> to vector<2x32xf32>
    %79 = tpu.concatenate %77, %78 in 1 : vector<2x32xf32>, vector<2x32xf32> -> vector<2x64xf32>
    %80 = arith.mulf %73, %56 : vector<2x64xf32>
    %81 = arith.mulf %70, %76 : vector<2x64xf32>
    %82 = arith.addf %80, %81 : vector<2x64xf32>
    %83 = math.tanh %82 : vector<2x64xf32>
    %84 = arith.mulf %79, %83 : vector<2x64xf32>
    %85 = vector.extract_strided_slice %53 {offsets = [2, 0], sizes = [2, 128], strides = [1, 1]} : vector<16x256xf32> to vector<2x128xf32>
    %86 = vector.extract_strided_slice %53 {offsets = [12, 128], sizes = [2, 128], strides = [1, 1]} : vector<16x256xf32> to vector<2x128xf32>
    %87 = tpu.concatenate %85, %86 in 1 : vector<2x128xf32>, vector<2x128xf32> -> vector<2x256xf32>
    %cst_50 = arith.constant dense<0.000000e+00> : vector<2x256xf32>
    %88 = tpu.matmul %84, %54, %cst_50 {dimension_numbers = #tpu.dot_dimension_numbers<[1], [0], [0], [1], [0, 0, 1, 1], [], []>, precision = #tpu.contract_precision<fp32>} : vector<2x64xf32>, vector<64x256xf32>, vector<2x256xf32> -> vector<2x256xf32>
    %89 = arith.addf %87, %88 : vector<2x256xf32>
    %90 = arith.negf %89 : vector<2x256xf32>
    %91 = math.exp %90 : vector<2x256xf32>
    %cst_51 = arith.constant 1.000000e+00 : f32
    %92 = vector.broadcast %cst_51 : f32 to vector<2x256xf32>
    %93 = arith.addf %92, %91 : vector<2x256xf32>
    %94 = arith.divf %92, %93 : vector<2x256xf32>
    %95 = math.tanh %89 : vector<2x256xf32>
    %96 = vector.extract_strided_slice %94 {offsets = [0, 0], sizes = [2, 32], strides = [1, 1]} : vector<2x256xf32> to vector<2x32xf32>
    %97 = vector.extract_strided_slice %94 {offsets = [0, 128], sizes = [2, 32], strides = [1, 1]} : vector<2x256xf32> to vector<2x32xf32>
    %98 = tpu.concatenate %96, %97 in 1 : vector<2x32xf32>, vector<2x32xf32> -> vector<2x64xf32>
    %99 = vector.extract_strided_slice %94 {offsets = [0, 32], sizes = [2, 32], strides = [1, 1]} : vector<2x256xf32> to vector<2x32xf32>
    %100 = vector.extract_strided_slice %94 {offsets = [0, 160], sizes = [2, 32], strides = [1, 1]} : vector<2x256xf32> to vector<2x32xf32>
    %101 = tpu.concatenate %99, %100 in 1 : vector<2x32xf32>, vector<2x32xf32> -> vector<2x64xf32>
    %102 = vector.extract_strided_slice %95 {offsets = [0, 64], sizes = [2, 32], strides = [1, 1]} : vector<2x256xf32> to vector<2x32xf32>
    %103 = vector.extract_strided_slice %95 {offsets = [0, 192], sizes = [2, 32], strides = [1, 1]} : vector<2x256xf32> to vector<2x32xf32>
    %104 = tpu.concatenate %102, %103 in 1 : vector<2x32xf32>, vector<2x32xf32> -> vector<2x64xf32>
    %105 = vector.extract_strided_slice %94 {offsets = [0, 96], sizes = [2, 32], strides = [1, 1]} : vector<2x256xf32> to vector<2x32xf32>
    %106 = vector.extract_strided_slice %94 {offsets = [0, 224], sizes = [2, 32], strides = [1, 1]} : vector<2x256xf32> to vector<2x32xf32>
    %107 = tpu.concatenate %105, %106 in 1 : vector<2x32xf32>, vector<2x32xf32> -> vector<2x64xf32>
    %108 = arith.mulf %101, %82 : vector<2x64xf32>
    %109 = arith.mulf %98, %104 : vector<2x64xf32>
    %110 = arith.addf %108, %109 : vector<2x64xf32>
    %111 = math.tanh %110 : vector<2x64xf32>
    %112 = arith.mulf %107, %111 : vector<2x64xf32>
    %113 = vector.extract_strided_slice %53 {offsets = [4, 0], sizes = [2, 128], strides = [1, 1]} : vector<16x256xf32> to vector<2x128xf32>
    %114 = vector.extract_strided_slice %53 {offsets = [10, 128], sizes = [2, 128], strides = [1, 1]} : vector<16x256xf32> to vector<2x128xf32>
    %115 = tpu.concatenate %113, %114 in 1 : vector<2x128xf32>, vector<2x128xf32> -> vector<2x256xf32>
    %cst_52 = arith.constant dense<0.000000e+00> : vector<2x256xf32>
    %116 = tpu.matmul %112, %54, %cst_52 {dimension_numbers = #tpu.dot_dimension_numbers<[1], [0], [0], [1], [0, 0, 1, 1], [], []>, precision = #tpu.contract_precision<fp32>} : vector<2x64xf32>, vector<64x256xf32>, vector<2x256xf32> -> vector<2x256xf32>
    %117 = arith.addf %115, %116 : vector<2x256xf32>
    %118 = arith.negf %117 : vector<2x256xf32>
    %119 = math.exp %118 : vector<2x256xf32>
    %cst_53 = arith.constant 1.000000e+00 : f32
    %120 = vector.broadcast %cst_53 : f32 to vector<2x256xf32>
    %121 = arith.addf %120, %119 : vector<2x256xf32>
    %122 = arith.divf %120, %121 : vector<2x256xf32>
    %123 = math.tanh %117 : vector<2x256xf32>
    %124 = vector.extract_strided_slice %122 {offsets = [0, 0], sizes = [2, 32], strides = [1, 1]} : vector<2x256xf32> to vector<2x32xf32>
    %125 = vector.extract_strided_slice %122 {offsets = [0, 128], sizes = [2, 32], strides = [1, 1]} : vector<2x256xf32> to vector<2x32xf32>
    %126 = tpu.concatenate %124, %125 in 1 : vector<2x32xf32>, vector<2x32xf32> -> vector<2x64xf32>
    %127 = vector.extract_strided_slice %122 {offsets = [0, 32], sizes = [2, 32], strides = [1, 1]} : vector<2x256xf32> to vector<2x32xf32>
    %128 = vector.extract_strided_slice %122 {offsets = [0, 160], sizes = [2, 32], strides = [1, 1]} : vector<2x256xf32> to vector<2x32xf32>
    %129 = tpu.concatenate %127, %128 in 1 : vector<2x32xf32>, vector<2x32xf32> -> vector<2x64xf32>
    %130 = vector.extract_strided_slice %123 {offsets = [0, 64], sizes = [2, 32], strides = [1, 1]} : vector<2x256xf32> to vector<2x32xf32>
    %131 = vector.extract_strided_slice %123 {offsets = [0, 192], sizes = [2, 32], strides = [1, 1]} : vector<2x256xf32> to vector<2x32xf32>
    %132 = tpu.concatenate %130, %131 in 1 : vector<2x32xf32>, vector<2x32xf32> -> vector<2x64xf32>
    %133 = vector.extract_strided_slice %122 {offsets = [0, 96], sizes = [2, 32], strides = [1, 1]} : vector<2x256xf32> to vector<2x32xf32>
    %134 = vector.extract_strided_slice %122 {offsets = [0, 224], sizes = [2, 32], strides = [1, 1]} : vector<2x256xf32> to vector<2x32xf32>
    %135 = tpu.concatenate %133, %134 in 1 : vector<2x32xf32>, vector<2x32xf32> -> vector<2x64xf32>
    %136 = arith.mulf %129, %110 : vector<2x64xf32>
    %137 = arith.mulf %126, %132 : vector<2x64xf32>
    %138 = arith.addf %136, %137 : vector<2x64xf32>
    %139 = math.tanh %138 : vector<2x64xf32>
    %140 = arith.mulf %135, %139 : vector<2x64xf32>
    %141 = vector.extract_strided_slice %53 {offsets = [6, 0], sizes = [2, 128], strides = [1, 1]} : vector<16x256xf32> to vector<2x128xf32>
    %142 = vector.extract_strided_slice %53 {offsets = [8, 128], sizes = [2, 128], strides = [1, 1]} : vector<16x256xf32> to vector<2x128xf32>
    %143 = tpu.concatenate %141, %142 in 1 : vector<2x128xf32>, vector<2x128xf32> -> vector<2x256xf32>
    %cst_54 = arith.constant dense<0.000000e+00> : vector<2x256xf32>
    %144 = tpu.matmul %140, %54, %cst_54 {dimension_numbers = #tpu.dot_dimension_numbers<[1], [0], [0], [1], [0, 0, 1, 1], [], []>, precision = #tpu.contract_precision<fp32>} : vector<2x64xf32>, vector<64x256xf32>, vector<2x256xf32> -> vector<2x256xf32>
    %145 = arith.addf %143, %144 : vector<2x256xf32>
    %146 = arith.negf %145 : vector<2x256xf32>
    %147 = math.exp %146 : vector<2x256xf32>
    %cst_55 = arith.constant 1.000000e+00 : f32
    %148 = vector.broadcast %cst_55 : f32 to vector<2x256xf32>
    %149 = arith.addf %148, %147 : vector<2x256xf32>
    %150 = arith.divf %148, %149 : vector<2x256xf32>
    %151 = math.tanh %145 : vector<2x256xf32>
    %152 = vector.extract_strided_slice %150 {offsets = [0, 0], sizes = [2, 32], strides = [1, 1]} : vector<2x256xf32> to vector<2x32xf32>
    %153 = vector.extract_strided_slice %150 {offsets = [0, 128], sizes = [2, 32], strides = [1, 1]} : vector<2x256xf32> to vector<2x32xf32>
    %154 = tpu.concatenate %152, %153 in 1 : vector<2x32xf32>, vector<2x32xf32> -> vector<2x64xf32>
    %155 = vector.extract_strided_slice %150 {offsets = [0, 32], sizes = [2, 32], strides = [1, 1]} : vector<2x256xf32> to vector<2x32xf32>
    %156 = vector.extract_strided_slice %150 {offsets = [0, 160], sizes = [2, 32], strides = [1, 1]} : vector<2x256xf32> to vector<2x32xf32>
    %157 = tpu.concatenate %155, %156 in 1 : vector<2x32xf32>, vector<2x32xf32> -> vector<2x64xf32>
    %158 = vector.extract_strided_slice %151 {offsets = [0, 64], sizes = [2, 32], strides = [1, 1]} : vector<2x256xf32> to vector<2x32xf32>
    %159 = vector.extract_strided_slice %151 {offsets = [0, 192], sizes = [2, 32], strides = [1, 1]} : vector<2x256xf32> to vector<2x32xf32>
    %160 = tpu.concatenate %158, %159 in 1 : vector<2x32xf32>, vector<2x32xf32> -> vector<2x64xf32>
    %161 = vector.extract_strided_slice %150 {offsets = [0, 96], sizes = [2, 32], strides = [1, 1]} : vector<2x256xf32> to vector<2x32xf32>
    %162 = vector.extract_strided_slice %150 {offsets = [0, 224], sizes = [2, 32], strides = [1, 1]} : vector<2x256xf32> to vector<2x32xf32>
    %163 = tpu.concatenate %161, %162 in 1 : vector<2x32xf32>, vector<2x32xf32> -> vector<2x64xf32>
    %164 = arith.mulf %157, %138 : vector<2x64xf32>
    %165 = arith.mulf %154, %160 : vector<2x64xf32>
    %166 = arith.addf %164, %165 : vector<2x64xf32>
    %167 = math.tanh %166 : vector<2x64xf32>
    %168 = arith.mulf %163, %167 : vector<2x64xf32>
    %169 = vector.extract_strided_slice %53 {offsets = [8, 0], sizes = [2, 128], strides = [1, 1]} : vector<16x256xf32> to vector<2x128xf32>
    %170 = vector.extract_strided_slice %53 {offsets = [6, 128], sizes = [2, 128], strides = [1, 1]} : vector<16x256xf32> to vector<2x128xf32>
    %171 = tpu.concatenate %169, %170 in 1 : vector<2x128xf32>, vector<2x128xf32> -> vector<2x256xf32>
    %cst_56 = arith.constant dense<0.000000e+00> : vector<2x256xf32>
    %172 = tpu.matmul %168, %54, %cst_56 {dimension_numbers = #tpu.dot_dimension_numbers<[1], [0], [0], [1], [0, 0, 1, 1], [], []>, precision = #tpu.contract_precision<fp32>} : vector<2x64xf32>, vector<64x256xf32>, vector<2x256xf32> -> vector<2x256xf32>
    %173 = arith.addf %171, %172 : vector<2x256xf32>
    %174 = arith.negf %173 : vector<2x256xf32>
    %175 = math.exp %174 : vector<2x256xf32>
    %cst_57 = arith.constant 1.000000e+00 : f32
    %176 = vector.broadcast %cst_57 : f32 to vector<2x256xf32>
    %177 = arith.addf %176, %175 : vector<2x256xf32>
    %178 = arith.divf %176, %177 : vector<2x256xf32>
    %179 = math.tanh %173 : vector<2x256xf32>
    %180 = vector.extract_strided_slice %178 {offsets = [0, 0], sizes = [2, 32], strides = [1, 1]} : vector<2x256xf32> to vector<2x32xf32>
    %181 = vector.extract_strided_slice %178 {offsets = [0, 128], sizes = [2, 32], strides = [1, 1]} : vector<2x256xf32> to vector<2x32xf32>
    %182 = tpu.concatenate %180, %181 in 1 : vector<2x32xf32>, vector<2x32xf32> -> vector<2x64xf32>
    %183 = vector.extract_strided_slice %178 {offsets = [0, 32], sizes = [2, 32], strides = [1, 1]} : vector<2x256xf32> to vector<2x32xf32>
    %184 = vector.extract_strided_slice %178 {offsets = [0, 160], sizes = [2, 32], strides = [1, 1]} : vector<2x256xf32> to vector<2x32xf32>
    %185 = tpu.concatenate %183, %184 in 1 : vector<2x32xf32>, vector<2x32xf32> -> vector<2x64xf32>
    %186 = vector.extract_strided_slice %179 {offsets = [0, 64], sizes = [2, 32], strides = [1, 1]} : vector<2x256xf32> to vector<2x32xf32>
    %187 = vector.extract_strided_slice %179 {offsets = [0, 192], sizes = [2, 32], strides = [1, 1]} : vector<2x256xf32> to vector<2x32xf32>
    %188 = tpu.concatenate %186, %187 in 1 : vector<2x32xf32>, vector<2x32xf32> -> vector<2x64xf32>
    %189 = vector.extract_strided_slice %178 {offsets = [0, 96], sizes = [2, 32], strides = [1, 1]} : vector<2x256xf32> to vector<2x32xf32>
    %190 = vector.extract_strided_slice %178 {offsets = [0, 224], sizes = [2, 32], strides = [1, 1]} : vector<2x256xf32> to vector<2x32xf32>
    %191 = tpu.concatenate %189, %190 in 1 : vector<2x32xf32>, vector<2x32xf32> -> vector<2x64xf32>
    %192 = arith.mulf %185, %166 : vector<2x64xf32>
    %193 = arith.mulf %182, %188 : vector<2x64xf32>
    %194 = arith.addf %192, %193 : vector<2x64xf32>
    %195 = math.tanh %194 : vector<2x64xf32>
    %196 = arith.mulf %191, %195 : vector<2x64xf32>
    %197 = vector.extract_strided_slice %53 {offsets = [10, 0], sizes = [2, 128], strides = [1, 1]} : vector<16x256xf32> to vector<2x128xf32>
    %198 = vector.extract_strided_slice %53 {offsets = [4, 128], sizes = [2, 128], strides = [1, 1]} : vector<16x256xf32> to vector<2x128xf32>
    %199 = tpu.concatenate %197, %198 in 1 : vector<2x128xf32>, vector<2x128xf32> -> vector<2x256xf32>
    %cst_58 = arith.constant dense<0.000000e+00> : vector<2x256xf32>
    %200 = tpu.matmul %196, %54, %cst_58 {dimension_numbers = #tpu.dot_dimension_numbers<[1], [0], [0], [1], [0, 0, 1, 1], [], []>, precision = #tpu.contract_precision<fp32>} : vector<2x64xf32>, vector<64x256xf32>, vector<2x256xf32> -> vector<2x256xf32>
    %201 = arith.addf %199, %200 : vector<2x256xf32>
    %202 = arith.negf %201 : vector<2x256xf32>
    %203 = math.exp %202 : vector<2x256xf32>
    %cst_59 = arith.constant 1.000000e+00 : f32
    %204 = vector.broadcast %cst_59 : f32 to vector<2x256xf32>
    %205 = arith.addf %204, %203 : vector<2x256xf32>
    %206 = arith.divf %204, %205 : vector<2x256xf32>
    %207 = math.tanh %201 : vector<2x256xf32>
    %208 = vector.extract_strided_slice %206 {offsets = [0, 0], sizes = [2, 32], strides = [1, 1]} : vector<2x256xf32> to vector<2x32xf32>
    %209 = vector.extract_strided_slice %206 {offsets = [0, 128], sizes = [2, 32], strides = [1, 1]} : vector<2x256xf32> to vector<2x32xf32>
    %210 = tpu.concatenate %208, %209 in 1 : vector<2x32xf32>, vector<2x32xf32> -> vector<2x64xf32>
    %211 = vector.extract_strided_slice %206 {offsets = [0, 32], sizes = [2, 32], strides = [1, 1]} : vector<2x256xf32> to vector<2x32xf32>
    %212 = vector.extract_strided_slice %206 {offsets = [0, 160], sizes = [2, 32], strides = [1, 1]} : vector<2x256xf32> to vector<2x32xf32>
    %213 = tpu.concatenate %211, %212 in 1 : vector<2x32xf32>, vector<2x32xf32> -> vector<2x64xf32>
    %214 = vector.extract_strided_slice %207 {offsets = [0, 64], sizes = [2, 32], strides = [1, 1]} : vector<2x256xf32> to vector<2x32xf32>
    %215 = vector.extract_strided_slice %207 {offsets = [0, 192], sizes = [2, 32], strides = [1, 1]} : vector<2x256xf32> to vector<2x32xf32>
    %216 = tpu.concatenate %214, %215 in 1 : vector<2x32xf32>, vector<2x32xf32> -> vector<2x64xf32>
    %217 = vector.extract_strided_slice %206 {offsets = [0, 96], sizes = [2, 32], strides = [1, 1]} : vector<2x256xf32> to vector<2x32xf32>
    %218 = vector.extract_strided_slice %206 {offsets = [0, 224], sizes = [2, 32], strides = [1, 1]} : vector<2x256xf32> to vector<2x32xf32>
    %219 = tpu.concatenate %217, %218 in 1 : vector<2x32xf32>, vector<2x32xf32> -> vector<2x64xf32>
    %220 = arith.mulf %213, %194 : vector<2x64xf32>
    %221 = arith.mulf %210, %216 : vector<2x64xf32>
    %222 = arith.addf %220, %221 : vector<2x64xf32>
    %223 = math.tanh %222 : vector<2x64xf32>
    %224 = arith.mulf %219, %223 : vector<2x64xf32>
    %225 = vector.extract_strided_slice %53 {offsets = [12, 0], sizes = [2, 128], strides = [1, 1]} : vector<16x256xf32> to vector<2x128xf32>
    %226 = vector.extract_strided_slice %53 {offsets = [2, 128], sizes = [2, 128], strides = [1, 1]} : vector<16x256xf32> to vector<2x128xf32>
    %227 = tpu.concatenate %225, %226 in 1 : vector<2x128xf32>, vector<2x128xf32> -> vector<2x256xf32>
    %cst_60 = arith.constant dense<0.000000e+00> : vector<2x256xf32>
    %228 = tpu.matmul %224, %54, %cst_60 {dimension_numbers = #tpu.dot_dimension_numbers<[1], [0], [0], [1], [0, 0, 1, 1], [], []>, precision = #tpu.contract_precision<fp32>} : vector<2x64xf32>, vector<64x256xf32>, vector<2x256xf32> -> vector<2x256xf32>
    %229 = arith.addf %227, %228 : vector<2x256xf32>
    %230 = arith.negf %229 : vector<2x256xf32>
    %231 = math.exp %230 : vector<2x256xf32>
    %cst_61 = arith.constant 1.000000e+00 : f32
    %232 = vector.broadcast %cst_61 : f32 to vector<2x256xf32>
    %233 = arith.addf %232, %231 : vector<2x256xf32>
    %234 = arith.divf %232, %233 : vector<2x256xf32>
    %235 = math.tanh %229 : vector<2x256xf32>
    %236 = vector.extract_strided_slice %234 {offsets = [0, 0], sizes = [2, 32], strides = [1, 1]} : vector<2x256xf32> to vector<2x32xf32>
    %237 = vector.extract_strided_slice %234 {offsets = [0, 128], sizes = [2, 32], strides = [1, 1]} : vector<2x256xf32> to vector<2x32xf32>
    %238 = tpu.concatenate %236, %237 in 1 : vector<2x32xf32>, vector<2x32xf32> -> vector<2x64xf32>
    %239 = vector.extract_strided_slice %234 {offsets = [0, 32], sizes = [2, 32], strides = [1, 1]} : vector<2x256xf32> to vector<2x32xf32>
    %240 = vector.extract_strided_slice %234 {offsets = [0, 160], sizes = [2, 32], strides = [1, 1]} : vector<2x256xf32> to vector<2x32xf32>
    %241 = tpu.concatenate %239, %240 in 1 : vector<2x32xf32>, vector<2x32xf32> -> vector<2x64xf32>
    %242 = vector.extract_strided_slice %235 {offsets = [0, 64], sizes = [2, 32], strides = [1, 1]} : vector<2x256xf32> to vector<2x32xf32>
    %243 = vector.extract_strided_slice %235 {offsets = [0, 192], sizes = [2, 32], strides = [1, 1]} : vector<2x256xf32> to vector<2x32xf32>
    %244 = tpu.concatenate %242, %243 in 1 : vector<2x32xf32>, vector<2x32xf32> -> vector<2x64xf32>
    %245 = vector.extract_strided_slice %234 {offsets = [0, 96], sizes = [2, 32], strides = [1, 1]} : vector<2x256xf32> to vector<2x32xf32>
    %246 = vector.extract_strided_slice %234 {offsets = [0, 224], sizes = [2, 32], strides = [1, 1]} : vector<2x256xf32> to vector<2x32xf32>
    %247 = tpu.concatenate %245, %246 in 1 : vector<2x32xf32>, vector<2x32xf32> -> vector<2x64xf32>
    %248 = arith.mulf %241, %222 : vector<2x64xf32>
    %249 = arith.mulf %238, %244 : vector<2x64xf32>
    %250 = arith.addf %248, %249 : vector<2x64xf32>
    %251 = math.tanh %250 : vector<2x64xf32>
    %252 = arith.mulf %247, %251 : vector<2x64xf32>
    %253 = vector.extract_strided_slice %53 {offsets = [14, 0], sizes = [2, 128], strides = [1, 1]} : vector<16x256xf32> to vector<2x128xf32>
    %254 = vector.extract_strided_slice %53 {offsets = [0, 128], sizes = [2, 128], strides = [1, 1]} : vector<16x256xf32> to vector<2x128xf32>
    %255 = tpu.concatenate %253, %254 in 1 : vector<2x128xf32>, vector<2x128xf32> -> vector<2x256xf32>
    %cst_62 = arith.constant dense<0.000000e+00> : vector<2x256xf32>
    %256 = tpu.matmul %252, %54, %cst_62 {dimension_numbers = #tpu.dot_dimension_numbers<[1], [0], [0], [1], [0, 0, 1, 1], [], []>, precision = #tpu.contract_precision<fp32>} : vector<2x64xf32>, vector<64x256xf32>, vector<2x256xf32> -> vector<2x256xf32>
    %257 = arith.addf %255, %256 : vector<2x256xf32>
    %258 = arith.negf %257 : vector<2x256xf32>
    %259 = math.exp %258 : vector<2x256xf32>
    %cst_63 = arith.constant 1.000000e+00 : f32
    %260 = vector.broadcast %cst_63 : f32 to vector<2x256xf32>
    %261 = arith.addf %260, %259 : vector<2x256xf32>
    %262 = arith.divf %260, %261 : vector<2x256xf32>
    %263 = math.tanh %257 : vector<2x256xf32>
    %264 = vector.extract_strided_slice %262 {offsets = [0, 0], sizes = [2, 32], strides = [1, 1]} : vector<2x256xf32> to vector<2x32xf32>
    %265 = vector.extract_strided_slice %262 {offsets = [0, 128], sizes = [2, 32], strides = [1, 1]} : vector<2x256xf32> to vector<2x32xf32>
    %266 = tpu.concatenate %264, %265 in 1 : vector<2x32xf32>, vector<2x32xf32> -> vector<2x64xf32>
    %267 = vector.extract_strided_slice %262 {offsets = [0, 32], sizes = [2, 32], strides = [1, 1]} : vector<2x256xf32> to vector<2x32xf32>
    %268 = vector.extract_strided_slice %262 {offsets = [0, 160], sizes = [2, 32], strides = [1, 1]} : vector<2x256xf32> to vector<2x32xf32>
    %269 = tpu.concatenate %267, %268 in 1 : vector<2x32xf32>, vector<2x32xf32> -> vector<2x64xf32>
    %270 = vector.extract_strided_slice %263 {offsets = [0, 64], sizes = [2, 32], strides = [1, 1]} : vector<2x256xf32> to vector<2x32xf32>
    %271 = vector.extract_strided_slice %263 {offsets = [0, 192], sizes = [2, 32], strides = [1, 1]} : vector<2x256xf32> to vector<2x32xf32>
    %272 = tpu.concatenate %270, %271 in 1 : vector<2x32xf32>, vector<2x32xf32> -> vector<2x64xf32>
    %273 = vector.extract_strided_slice %262 {offsets = [0, 96], sizes = [2, 32], strides = [1, 1]} : vector<2x256xf32> to vector<2x32xf32>
    %274 = vector.extract_strided_slice %262 {offsets = [0, 224], sizes = [2, 32], strides = [1, 1]} : vector<2x256xf32> to vector<2x32xf32>
    %275 = tpu.concatenate %273, %274 in 1 : vector<2x32xf32>, vector<2x32xf32> -> vector<2x64xf32>
    %276 = arith.mulf %269, %250 : vector<2x64xf32>
    %277 = arith.mulf %266, %272 : vector<2x64xf32>
    %278 = arith.addf %276, %277 : vector<2x64xf32>
    %279 = math.tanh %278 : vector<2x64xf32>
    %280 = arith.mulf %275, %279 : vector<2x64xf32>
    %281 = vector.extract_strided_slice %84 {offsets = [0, 0], sizes = [1, 32], strides = [1, 1]} : vector<2x64xf32> to vector<1x32xf32>
    %282 = vector.extract_strided_slice %280 {offsets = [0, 32], sizes = [1, 32], strides = [1, 1]} : vector<2x64xf32> to vector<1x32xf32>
    %283 = tpu.concatenate %281, %282 in 1 : vector<1x32xf32>, vector<1x32xf32> -> vector<1x64xf32>
    %284 = vector.extract_strided_slice %112 {offsets = [0, 0], sizes = [1, 32], strides = [1, 1]} : vector<2x64xf32> to vector<1x32xf32>
    %285 = vector.extract_strided_slice %252 {offsets = [0, 32], sizes = [1, 32], strides = [1, 1]} : vector<2x64xf32> to vector<1x32xf32>
    %286 = tpu.concatenate %284, %285 in 1 : vector<1x32xf32>, vector<1x32xf32> -> vector<1x64xf32>
    %287 = vector.extract_strided_slice %140 {offsets = [0, 0], sizes = [1, 32], strides = [1, 1]} : vector<2x64xf32> to vector<1x32xf32>
    %288 = vector.extract_strided_slice %224 {offsets = [0, 32], sizes = [1, 32], strides = [1, 1]} : vector<2x64xf32> to vector<1x32xf32>
    %289 = tpu.concatenate %287, %288 in 1 : vector<1x32xf32>, vector<1x32xf32> -> vector<1x64xf32>
    %290 = vector.extract_strided_slice %168 {offsets = [0, 0], sizes = [1, 32], strides = [1, 1]} : vector<2x64xf32> to vector<1x32xf32>
    %291 = vector.extract_strided_slice %196 {offsets = [0, 32], sizes = [1, 32], strides = [1, 1]} : vector<2x64xf32> to vector<1x32xf32>
    %292 = tpu.concatenate %290, %291 in 1 : vector<1x32xf32>, vector<1x32xf32> -> vector<1x64xf32>
    %293 = vector.extract_strided_slice %196 {offsets = [0, 0], sizes = [1, 32], strides = [1, 1]} : vector<2x64xf32> to vector<1x32xf32>
    %294 = vector.extract_strided_slice %168 {offsets = [0, 32], sizes = [1, 32], strides = [1, 1]} : vector<2x64xf32> to vector<1x32xf32>
    %295 = tpu.concatenate %293, %294 in 1 : vector<1x32xf32>, vector<1x32xf32> -> vector<1x64xf32>
    %296 = vector.extract_strided_slice %224 {offsets = [0, 0], sizes = [1, 32], strides = [1, 1]} : vector<2x64xf32> to vector<1x32xf32>
    %297 = vector.extract_strided_slice %140 {offsets = [0, 32], sizes = [1, 32], strides = [1, 1]} : vector<2x64xf32> to vector<1x32xf32>
    %298 = tpu.concatenate %296, %297 in 1 : vector<1x32xf32>, vector<1x32xf32> -> vector<1x64xf32>
    %299 = vector.extract_strided_slice %252 {offsets = [0, 0], sizes = [1, 32], strides = [1, 1]} : vector<2x64xf32> to vector<1x32xf32>
    %300 = vector.extract_strided_slice %112 {offsets = [0, 32], sizes = [1, 32], strides = [1, 1]} : vector<2x64xf32> to vector<1x32xf32>
    %301 = tpu.concatenate %299, %300 in 1 : vector<1x32xf32>, vector<1x32xf32> -> vector<1x64xf32>
    %302 = vector.extract_strided_slice %280 {offsets = [0, 0], sizes = [1, 32], strides = [1, 1]} : vector<2x64xf32> to vector<1x32xf32>
    %303 = vector.extract_strided_slice %84 {offsets = [0, 32], sizes = [1, 32], strides = [1, 1]} : vector<2x64xf32> to vector<1x32xf32>
    %304 = tpu.concatenate %302, %303 in 1 : vector<1x32xf32>, vector<1x32xf32> -> vector<1x64xf32>
    %305 = tpu.concatenate %283, %286, %289, %292, %295, %298, %301, %304 in 0 : vector<1x64xf32>, vector<1x64xf32>, vector<1x64xf32>, vector<1x64xf32>, vector<1x64xf32>, vector<1x64xf32>, vector<1x64xf32>, vector<1x64xf32> -> vector<8x64xf32>
    %306 = vector.extract_strided_slice %84 {offsets = [1, 0], sizes = [1, 32], strides = [1, 1]} : vector<2x64xf32> to vector<1x32xf32>
    %307 = vector.extract_strided_slice %280 {offsets = [1, 32], sizes = [1, 32], strides = [1, 1]} : vector<2x64xf32> to vector<1x32xf32>
    %308 = tpu.concatenate %306, %307 in 1 : vector<1x32xf32>, vector<1x32xf32> -> vector<1x64xf32>
    %309 = vector.extract_strided_slice %112 {offsets = [1, 0], sizes = [1, 32], strides = [1, 1]} : vector<2x64xf32> to vector<1x32xf32>
    %310 = vector.extract_strided_slice %252 {offsets = [1, 32], sizes = [1, 32], strides = [1, 1]} : vector<2x64xf32> to vector<1x32xf32>
    %311 = tpu.concatenate %309, %310 in 1 : vector<1x32xf32>, vector<1x32xf32> -> vector<1x64xf32>
    %312 = vector.extract_strided_slice %140 {offsets = [1, 0], sizes = [1, 32], strides = [1, 1]} : vector<2x64xf32> to vector<1x32xf32>
    %313 = vector.extract_strided_slice %224 {offsets = [1, 32], sizes = [1, 32], strides = [1, 1]} : vector<2x64xf32> to vector<1x32xf32>
    %314 = tpu.concatenate %312, %313 in 1 : vector<1x32xf32>, vector<1x32xf32> -> vector<1x64xf32>
    %315 = vector.extract_strided_slice %168 {offsets = [1, 0], sizes = [1, 32], strides = [1, 1]} : vector<2x64xf32> to vector<1x32xf32>
    %316 = vector.extract_strided_slice %196 {offsets = [1, 32], sizes = [1, 32], strides = [1, 1]} : vector<2x64xf32> to vector<1x32xf32>
    %317 = tpu.concatenate %315, %316 in 1 : vector<1x32xf32>, vector<1x32xf32> -> vector<1x64xf32>
    %318 = vector.extract_strided_slice %196 {offsets = [1, 0], sizes = [1, 32], strides = [1, 1]} : vector<2x64xf32> to vector<1x32xf32>
    %319 = vector.extract_strided_slice %168 {offsets = [1, 32], sizes = [1, 32], strides = [1, 1]} : vector<2x64xf32> to vector<1x32xf32>
    %320 = tpu.concatenate %318, %319 in 1 : vector<1x32xf32>, vector<1x32xf32> -> vector<1x64xf32>
    %321 = vector.extract_strided_slice %224 {offsets = [1, 0], sizes = [1, 32], strides = [1, 1]} : vector<2x64xf32> to vector<1x32xf32>
    %322 = vector.extract_strided_slice %140 {offsets = [1, 32], sizes = [1, 32], strides = [1, 1]} : vector<2x64xf32> to vector<1x32xf32>
    %323 = tpu.concatenate %321, %322 in 1 : vector<1x32xf32>, vector<1x32xf32> -> vector<1x64xf32>
    %324 = vector.extract_strided_slice %252 {offsets = [1, 0], sizes = [1, 32], strides = [1, 1]} : vector<2x64xf32> to vector<1x32xf32>
    %325 = vector.extract_strided_slice %112 {offsets = [1, 32], sizes = [1, 32], strides = [1, 1]} : vector<2x64xf32> to vector<1x32xf32>
    %326 = tpu.concatenate %324, %325 in 1 : vector<1x32xf32>, vector<1x32xf32> -> vector<1x64xf32>
    %327 = vector.extract_strided_slice %280 {offsets = [1, 0], sizes = [1, 32], strides = [1, 1]} : vector<2x64xf32> to vector<1x32xf32>
    %328 = vector.extract_strided_slice %84 {offsets = [1, 32], sizes = [1, 32], strides = [1, 1]} : vector<2x64xf32> to vector<1x32xf32>
    %329 = tpu.concatenate %327, %328 in 1 : vector<1x32xf32>, vector<1x32xf32> -> vector<1x64xf32>
    %330 = tpu.concatenate %308, %311, %314, %317, %320, %323, %326, %329 in 0 : vector<1x64xf32>, vector<1x64xf32>, vector<1x64xf32>, vector<1x64xf32>, vector<1x64xf32>, vector<1x64xf32>, vector<1x64xf32>, vector<1x64xf32> -> vector<8x64xf32>
    %331 = tpu.concatenate %305, %330 in 0 : vector<8x64xf32>, vector<8x64xf32> -> vector<16x64xf32>
    %c0_64 = arith.constant 0 : index
    %c0_65 = arith.constant 0 : index
    %332 = vector.load %arg5[%c0_64, %c0_65] : memref<16x32xf32, #tpu.memory_space<vmem>>, vector<16x32xf32>
    %c0_66 = arith.constant 0 : index
    %c0_67 = arith.constant 0 : index
    %333 = vector.load %arg6[%c0_66, %c0_67] : memref<32x32xf32, #tpu.memory_space<vmem>>, vector<32x32xf32>
    %cst_68 = arith.constant dense<0.000000e+00> : vector<16x32xf32>
    %334 = tpu.matmul %332, %333, %cst_68 {dimension_numbers = #tpu.dot_dimension_numbers<[1], [0], [0], [1], [0, 0, 1, 1], [], []>, precision = #tpu.contract_precision<fp32>} : vector<16x32xf32>, vector<32x32xf32>, vector<16x32xf32> -> vector<16x32xf32>
    %c0_69 = arith.constant 0 : index
    %c0_70 = arith.constant 0 : index
    %335 = vector.load %arg7[%c0_69, %c0_70] : memref<1x32xf32, #tpu.memory_space<vmem>>, vector<1x32xf32>
    %336 = vector.broadcast %335 : vector<1x32xf32> to vector<16x32xf32>
    %337 = arith.addf %334, %336 : vector<16x32xf32>
    %c0_71 = arith.constant 0 : index
    %c0_72 = arith.constant 0 : index
    %338 = vector.load %arg8[%c0_71, %c0_72] : memref<64x32xf32, #tpu.memory_space<vmem>>, vector<64x32xf32>
    %cst_73 = arith.constant dense<0.000000e+00> : vector<16x32xf32>
    %339 = tpu.matmul %331, %338, %cst_73 {dimension_numbers = #tpu.dot_dimension_numbers<[1], [0], [0], [1], [0, 0, 1, 1], [], []>, precision = #tpu.contract_precision<fp32>} : vector<16x64xf32>, vector<64x32xf32>, vector<16x32xf32> -> vector<16x32xf32>
    %c0_74 = arith.constant 0 : index
    %c0_75 = arith.constant 0 : index
    %340 = vector.load %arg9[%c0_74, %c0_75] : memref<1x32xf32, #tpu.memory_space<vmem>>, vector<1x32xf32>
    %341 = vector.broadcast %340 : vector<1x32xf32> to vector<16x32xf32>
    %342 = arith.addf %339, %341 : vector<16x32xf32>
    %c0_76 = arith.constant 0 : index
    %c0_77 = arith.constant 0 : index
    %343 = vector.load %arg10[%c0_76, %c0_77] : memref<64x32xf32, #tpu.memory_space<vmem>>, vector<64x32xf32>
    %cst_78 = arith.constant dense<0.000000e+00> : vector<16x32xf32>
    %344 = tpu.matmul %331, %343, %cst_78 {dimension_numbers = #tpu.dot_dimension_numbers<[1], [0], [0], [1], [0, 0, 1, 1], [], []>, precision = #tpu.contract_precision<fp32>} : vector<16x64xf32>, vector<64x32xf32>, vector<16x32xf32> -> vector<16x32xf32>
    %c0_79 = arith.constant 0 : index
    %c0_80 = arith.constant 0 : index
    %345 = vector.load %arg11[%c0_79, %c0_80] : memref<1x32xf32, #tpu.memory_space<vmem>>, vector<1x32xf32>
    %346 = vector.broadcast %345 : vector<1x32xf32> to vector<16x32xf32>
    %347 = arith.addf %344, %346 : vector<16x32xf32>
    %348 = math.tanh %347 : vector<16x32xf32>
    %c0_81 = arith.constant 0 : index
    %c0_82 = arith.constant 0 : index
    %349 = vector.load %arg12[%c0_81, %c0_82] : memref<32x16xf32, #tpu.memory_space<vmem>>, vector<32x16xf32>
    %cst_83 = arith.constant dense<0.000000e+00> : vector<16x16xf32>
    %350 = tpu.matmul %348, %349, %cst_83 {dimension_numbers = #tpu.dot_dimension_numbers<[1], [0], [0], [1], [0, 0, 1, 1], [], []>, precision = #tpu.contract_precision<fp32>} : vector<16x32xf32>, vector<32x16xf32>, vector<16x16xf32> -> vector<16x16xf32>
    %c0_84 = arith.constant 0 : index
    %c0_85 = arith.constant 0 : index
    %351 = vector.load %arg13[%c0_84, %c0_85] : memref<1x16xf32, #tpu.memory_space<vmem>>, vector<1x16xf32>
    %352 = vector.broadcast %351 : vector<1x16xf32> to vector<16x16xf32>
    %353 = arith.addf %350, %352 : vector<16x16xf32>
    %c0_86 = arith.constant 0 : index
    %c0_87 = arith.constant 0 : index
    %354 = vector.load %arg14[%c0_86, %c0_87] : memref<2x64xf32, #tpu.memory_space<vmem>>, vector<2x64xf32>
    %c0_88 = arith.constant 0 : index
    %c0_89 = arith.constant 0 : index
    %355 = vector.load %arg15[%c0_88, %c0_89] : memref<1x2xf32, #tpu.memory_space<vmem>>, vector<1x2xf32>
    %356 = vector.extract_strided_slice %342 {offsets = [0, 0], sizes = [8, 32], strides = [1, 1]} : vector<16x32xf32> to vector<8x32xf32>
    %cst_90 = arith.constant dense<0.000000e+00> : vector<16x8xf32>
    %357 = tpu.matmul %337, %356, %cst_90 {dimension_numbers = #tpu.dot_dimension_numbers<[1], [1], [0], [0], [0, 0, 1, 0], [], []>, precision = #tpu.contract_precision<fp32>} : vector<16x32xf32>, vector<8x32xf32>, vector<16x8xf32> -> vector<16x8xf32>
    %cst_91 = arith.constant dense<0xFF800000> : vector<16xf32>
    %358 = vector.multi_reduction <maximumf>, %357, %cst_91 [1] : vector<16x8xf32> to vector<16xf32>
    %cst_92 = arith.constant 0xFF800000 : f32
    %359 = vector.broadcast %cst_92 : f32 to vector<16xf32>
    %360 = arith.maximumf %359, %358 : vector<16xf32>
    %361 = vector.shape_cast %360 : vector<16xf32> to vector<16x1xf32>
    %362 = vector.broadcast %361 : vector<16x1xf32> to vector<16x8xf32>
    %363 = arith.subf %357, %362 : vector<16x8xf32>
    %364 = math.exp %363 : vector<16x8xf32>
    %cst_93 = arith.constant dense<0.000000e+00> : vector<16xf32>
    %365 = vector.multi_reduction <add>, %364, %cst_93 [1] : vector<16x8xf32> to vector<16xf32>
    %366 = vector.shape_cast %365 : vector<16xf32> to vector<16x1xf32>
    %367 = vector.broadcast %366 : vector<16x1xf32> to vector<16x8xf32>
    %368 = arith.divf %364, %367 : vector<16x8xf32>
    %cst_94 = arith.constant dense<0.000000e+00> : vector<16x64xf32>
    %369 = tpu.matmul %368, %305, %cst_94 {dimension_numbers = #tpu.dot_dimension_numbers<[1], [0], [0], [1], [0, 0, 1, 1], [], []>, precision = #tpu.contract_precision<fp32>} : vector<16x8xf32>, vector<8x64xf32>, vector<16x64xf32> -> vector<16x64xf32>
    %370 = vector.extract_strided_slice %353 {offsets = [0, 0], sizes = [8, 16], strides = [1, 1]} : vector<16x16xf32> to vector<8x16xf32>
    %cst_95 = arith.constant dense<0xFF800000> : vector<16xf32>
    %371 = vector.multi_reduction <maximumf>, %370, %cst_95 [0] : vector<8x16xf32> to vector<16xf32>
    %cst_96 = arith.constant 0xFF800000 : f32
    %372 = vector.broadcast %cst_96 : f32 to vector<16xf32>
    %373 = arith.maximumf %372, %371 : vector<16xf32>
    %374 = vector.shape_cast %373 : vector<16xf32> to vector<1x16xf32>
    %375 = vector.broadcast %374 : vector<1x16xf32> to vector<8x16xf32>
    %376 = arith.subf %370, %375 : vector<8x16xf32>
    %377 = math.exp %376 : vector<8x16xf32>
    %cst_97 = arith.constant dense<0.000000e+00> : vector<16xf32>
    %378 = vector.multi_reduction <add>, %377, %cst_97 [0] : vector<8x16xf32> to vector<16xf32>
    %379 = vector.shape_cast %378 : vector<16xf32> to vector<1x16xf32>
    %380 = vector.broadcast %379 : vector<1x16xf32> to vector<8x16xf32>
    %381 = arith.divf %377, %380 : vector<8x16xf32>
    %cst_98 = arith.constant dense<0.000000e+00> : vector<16x64xf32>
    %382 = tpu.matmul %381, %305, %cst_98 {dimension_numbers = #tpu.dot_dimension_numbers<[0], [0], [1], [1], [0, 1, 1, 1], [], []>, precision = #tpu.contract_precision<fp32>} : vector<8x16xf32>, vector<8x64xf32>, vector<16x64xf32> -> vector<16x64xf32>
    %383 = vector.extract_strided_slice %354 {offsets = [0, 0], sizes = [1, 64], strides = [1, 1]} : vector<2x64xf32> to vector<1x64xf32>
    %384 = vector.broadcast %383 : vector<1x64xf32> to vector<16x64xf32>
    %385 = arith.mulf %369, %384 : vector<16x64xf32>
    %cst_99 = arith.constant dense<0.000000e+00> : vector<16xf32>
    %386 = vector.multi_reduction <add>, %385, %cst_99 [1] : vector<16x64xf32> to vector<16xf32>
    %387 = vector.shape_cast %386 : vector<16xf32> to vector<16x1xf32>
    %388 = vector.extract_strided_slice %355 {offsets = [0, 0], sizes = [1, 1], strides = [1, 1]} : vector<1x2xf32> to vector<1x1xf32>
    %389 = vector.broadcast %388 : vector<1x1xf32> to vector<16x1xf32>
    %390 = arith.addf %387, %389 : vector<16x1xf32>
    %391 = arith.negf %390 : vector<16x1xf32>
    %392 = math.exp %391 : vector<16x1xf32>
    %cst_100 = arith.constant 1.000000e+00 : f32
    %393 = vector.broadcast %cst_100 : f32 to vector<16x1xf32>
    %394 = arith.addf %393, %392 : vector<16x1xf32>
    %395 = arith.divf %393, %394 : vector<16x1xf32>
    %396 = vector.extract_strided_slice %354 {offsets = [1, 0], sizes = [1, 64], strides = [1, 1]} : vector<2x64xf32> to vector<1x64xf32>
    %397 = vector.broadcast %396 : vector<1x64xf32> to vector<16x64xf32>
    %398 = arith.mulf %382, %397 : vector<16x64xf32>
    %cst_101 = arith.constant dense<0.000000e+00> : vector<16xf32>
    %399 = vector.multi_reduction <add>, %398, %cst_101 [1] : vector<16x64xf32> to vector<16xf32>
    %400 = vector.shape_cast %399 : vector<16xf32> to vector<16x1xf32>
    %401 = vector.extract_strided_slice %355 {offsets = [0, 1], sizes = [1, 1], strides = [1, 1]} : vector<1x2xf32> to vector<1x1xf32>
    %402 = vector.broadcast %401 : vector<1x1xf32> to vector<16x1xf32>
    %403 = arith.addf %400, %402 : vector<16x1xf32>
    %404 = arith.negf %403 : vector<16x1xf32>
    %405 = math.exp %404 : vector<16x1xf32>
    %cst_102 = arith.constant 1.000000e+00 : f32
    %406 = vector.broadcast %cst_102 : f32 to vector<16x1xf32>
    %407 = arith.addf %406, %405 : vector<16x1xf32>
    %408 = arith.divf %406, %407 : vector<16x1xf32>
    %409 = arith.addf %395, %408 : vector<16x1xf32>
    %410 = arith.divf %395, %409 : vector<16x1xf32>
    %411 = vector.broadcast %410 : vector<16x1xf32> to vector<16x64xf32>
    %412 = arith.mulf %411, %369 : vector<16x64xf32>
    %cst_103 = arith.constant 1.000000e+00 : f32
    %413 = vector.broadcast %cst_103 : f32 to vector<16x1xf32>
    %414 = arith.subf %413, %410 : vector<16x1xf32>
    %415 = vector.broadcast %414 : vector<16x1xf32> to vector<16x64xf32>
    %416 = arith.mulf %415, %382 : vector<16x64xf32>
    %417 = arith.addf %412, %416 : vector<16x64xf32>
    %418 = vector.extract_strided_slice %342 {offsets = [8, 0], sizes = [8, 32], strides = [1, 1]} : vector<16x32xf32> to vector<8x32xf32>
    %cst_104 = arith.constant dense<0.000000e+00> : vector<16x8xf32>
    %419 = tpu.matmul %337, %418, %cst_104 {dimension_numbers = #tpu.dot_dimension_numbers<[1], [1], [0], [0], [0, 0, 1, 0], [], []>, precision = #tpu.contract_precision<fp32>} : vector<16x32xf32>, vector<8x32xf32>, vector<16x8xf32> -> vector<16x8xf32>
    %cst_105 = arith.constant dense<0xFF800000> : vector<16xf32>
    %420 = vector.multi_reduction <maximumf>, %419, %cst_105 [1] : vector<16x8xf32> to vector<16xf32>
    %cst_106 = arith.constant 0xFF800000 : f32
    %421 = vector.broadcast %cst_106 : f32 to vector<16xf32>
    %422 = arith.maximumf %421, %420 : vector<16xf32>
    %423 = vector.shape_cast %422 : vector<16xf32> to vector<16x1xf32>
    %424 = vector.broadcast %423 : vector<16x1xf32> to vector<16x8xf32>
    %425 = arith.subf %419, %424 : vector<16x8xf32>
    %426 = math.exp %425 : vector<16x8xf32>
    %cst_107 = arith.constant dense<0.000000e+00> : vector<16xf32>
    %427 = vector.multi_reduction <add>, %426, %cst_107 [1] : vector<16x8xf32> to vector<16xf32>
    %428 = vector.shape_cast %427 : vector<16xf32> to vector<16x1xf32>
    %429 = vector.broadcast %428 : vector<16x1xf32> to vector<16x8xf32>
    %430 = arith.divf %426, %429 : vector<16x8xf32>
    %cst_108 = arith.constant dense<0.000000e+00> : vector<16x64xf32>
    %431 = tpu.matmul %430, %330, %cst_108 {dimension_numbers = #tpu.dot_dimension_numbers<[1], [0], [0], [1], [0, 0, 1, 1], [], []>, precision = #tpu.contract_precision<fp32>} : vector<16x8xf32>, vector<8x64xf32>, vector<16x64xf32> -> vector<16x64xf32>
    %432 = vector.extract_strided_slice %353 {offsets = [8, 0], sizes = [8, 16], strides = [1, 1]} : vector<16x16xf32> to vector<8x16xf32>
    %cst_109 = arith.constant dense<0xFF800000> : vector<16xf32>
    %433 = vector.multi_reduction <maximumf>, %432, %cst_109 [0] : vector<8x16xf32> to vector<16xf32>
    %cst_110 = arith.constant 0xFF800000 : f32
    %434 = vector.broadcast %cst_110 : f32 to vector<16xf32>
    %435 = arith.maximumf %434, %433 : vector<16xf32>
    %436 = vector.shape_cast %435 : vector<16xf32> to vector<1x16xf32>
    %437 = vector.broadcast %436 : vector<1x16xf32> to vector<8x16xf32>
    %438 = arith.subf %432, %437 : vector<8x16xf32>
    %439 = math.exp %438 : vector<8x16xf32>
    %cst_111 = arith.constant dense<0.000000e+00> : vector<16xf32>
    %440 = vector.multi_reduction <add>, %439, %cst_111 [0] : vector<8x16xf32> to vector<16xf32>
    %441 = vector.shape_cast %440 : vector<16xf32> to vector<1x16xf32>
    %442 = vector.broadcast %441 : vector<1x16xf32> to vector<8x16xf32>
    %443 = arith.divf %439, %442 : vector<8x16xf32>
    %cst_112 = arith.constant dense<0.000000e+00> : vector<16x64xf32>
    %444 = tpu.matmul %443, %330, %cst_112 {dimension_numbers = #tpu.dot_dimension_numbers<[0], [0], [1], [1], [0, 1, 1, 1], [], []>, precision = #tpu.contract_precision<fp32>} : vector<8x16xf32>, vector<8x64xf32>, vector<16x64xf32> -> vector<16x64xf32>
    %445 = vector.extract_strided_slice %354 {offsets = [0, 0], sizes = [1, 64], strides = [1, 1]} : vector<2x64xf32> to vector<1x64xf32>
    %446 = vector.broadcast %445 : vector<1x64xf32> to vector<16x64xf32>
    %447 = arith.mulf %431, %446 : vector<16x64xf32>
    %cst_113 = arith.constant dense<0.000000e+00> : vector<16xf32>
    %448 = vector.multi_reduction <add>, %447, %cst_113 [1] : vector<16x64xf32> to vector<16xf32>
    %449 = vector.shape_cast %448 : vector<16xf32> to vector<16x1xf32>
    %450 = vector.extract_strided_slice %355 {offsets = [0, 0], sizes = [1, 1], strides = [1, 1]} : vector<1x2xf32> to vector<1x1xf32>
    %451 = vector.broadcast %450 : vector<1x1xf32> to vector<16x1xf32>
    %452 = arith.addf %449, %451 : vector<16x1xf32>
    %453 = arith.negf %452 : vector<16x1xf32>
    %454 = math.exp %453 : vector<16x1xf32>
    %cst_114 = arith.constant 1.000000e+00 : f32
    %455 = vector.broadcast %cst_114 : f32 to vector<16x1xf32>
    %456 = arith.addf %455, %454 : vector<16x1xf32>
    %457 = arith.divf %455, %456 : vector<16x1xf32>
    %458 = vector.extract_strided_slice %354 {offsets = [1, 0], sizes = [1, 64], strides = [1, 1]} : vector<2x64xf32> to vector<1x64xf32>
    %459 = vector.broadcast %458 : vector<1x64xf32> to vector<16x64xf32>
    %460 = arith.mulf %444, %459 : vector<16x64xf32>
    %cst_115 = arith.constant dense<0.000000e+00> : vector<16xf32>
    %461 = vector.multi_reduction <add>, %460, %cst_115 [1] : vector<16x64xf32> to vector<16xf32>
    %462 = vector.shape_cast %461 : vector<16xf32> to vector<16x1xf32>
    %463 = vector.extract_strided_slice %355 {offsets = [0, 1], sizes = [1, 1], strides = [1, 1]} : vector<1x2xf32> to vector<1x1xf32>
    %464 = vector.broadcast %463 : vector<1x1xf32> to vector<16x1xf32>
    %465 = arith.addf %462, %464 : vector<16x1xf32>
    %466 = arith.negf %465 : vector<16x1xf32>
    %467 = math.exp %466 : vector<16x1xf32>
    %cst_116 = arith.constant 1.000000e+00 : f32
    %468 = vector.broadcast %cst_116 : f32 to vector<16x1xf32>
    %469 = arith.addf %468, %467 : vector<16x1xf32>
    %470 = arith.divf %468, %469 : vector<16x1xf32>
    %471 = arith.addf %457, %470 : vector<16x1xf32>
    %472 = arith.divf %457, %471 : vector<16x1xf32>
    %473 = vector.broadcast %472 : vector<16x1xf32> to vector<16x64xf32>
    %474 = arith.mulf %473, %431 : vector<16x64xf32>
    %cst_117 = arith.constant 1.000000e+00 : f32
    %475 = vector.broadcast %cst_117 : f32 to vector<16x1xf32>
    %476 = arith.subf %475, %472 : vector<16x1xf32>
    %477 = vector.broadcast %476 : vector<16x1xf32> to vector<16x64xf32>
    %478 = arith.mulf %477, %444 : vector<16x64xf32>
    %479 = arith.addf %474, %478 : vector<16x64xf32>
    %480 = tpu.concatenate %417, %479 in 0 : vector<16x64xf32>, vector<16x64xf32> -> vector<32x64xf32>
    %c0_118 = arith.constant 0 : index
    %c0_119 = arith.constant 0 : index
    %481 = vector.load %arg16[%c0_118, %c0_119] : memref<64x32xf32, #tpu.memory_space<vmem>>, vector<64x32xf32>
    %cst_120 = arith.constant dense<0.000000e+00> : vector<32x32xf32>
    %482 = tpu.matmul %480, %481, %cst_120 {dimension_numbers = #tpu.dot_dimension_numbers<[1], [0], [0], [1], [0, 0, 1, 1], [], []>, precision = #tpu.contract_precision<fp32>} : vector<32x64xf32>, vector<64x32xf32>, vector<32x32xf32> -> vector<32x32xf32>
    %c0_121 = arith.constant 0 : index
    %c0_122 = arith.constant 0 : index
    %483 = vector.load %arg17[%c0_121, %c0_122] : memref<1x32xf32, #tpu.memory_space<vmem>>, vector<1x32xf32>
    %484 = vector.broadcast %483 : vector<1x32xf32> to vector<32x32xf32>
    %485 = arith.addf %482, %484 : vector<32x32xf32>
    %cst_123 = arith.constant 0.000000e+00 : f32
    %486 = vector.broadcast %cst_123 : f32 to vector<32x32xf32>
    %487 = arith.maximumf %485, %486 : vector<32x32xf32>
    %c0_124 = arith.constant 0 : index
    %c0_125 = arith.constant 0 : index
    %488 = vector.load %arg18[%c0_124, %c0_125] : memref<1x32xf32, #tpu.memory_space<vmem>>, vector<1x32xf32>
    %cst_126 = arith.constant dense<0.000000e+00> : vector<1x32xf32>
    %489 = tpu.matmul %488, %487, %cst_126 {dimension_numbers = #tpu.dot_dimension_numbers<[1], [1], [0], [0], [0, 0, 1, 0], [], []>, precision = #tpu.contract_precision<fp32>} : vector<1x32xf32>, vector<32x32xf32>, vector<1x32xf32> -> vector<1x32xf32>
    %c0_127 = arith.constant 0 : index
    %c0_128 = arith.constant 0 : index
    %490 = vector.load %arg19[%c0_127, %c0_128] : memref<1x1xf32, #tpu.memory_space<vmem>>, vector<1x1xf32>
    %491 = vector.broadcast %490 : vector<1x1xf32> to vector<1x32xf32>
    %492 = arith.addf %489, %491 : vector<1x32xf32>
    %493 = vector.extract_strided_slice %492 {offsets = [0, 0], sizes = [1, 16], strides = [1, 1]} : vector<1x32xf32> to vector<1x16xf32>
    %494 = vector.extract_strided_slice %492 {offsets = [0, 16], sizes = [1, 16], strides = [1, 1]} : vector<1x32xf32> to vector<1x16xf32>
    %495 = tpu.concatenate %493, %494 in 0 : vector<1x16xf32>, vector<1x16xf32> -> vector<2x16xf32>
    %cst_129 = arith.constant dense<0xFF800000> : vector<16xf32>
    %496 = vector.multi_reduction <maximumf>, %495, %cst_129 [0] : vector<2x16xf32> to vector<16xf32>
    %497 = vector.shape_cast %496 : vector<16xf32> to vector<1x16xf32>
    %498 = vector.broadcast %497 : vector<1x16xf32> to vector<2x16xf32>
    %499 = arith.subf %495, %498 : vector<2x16xf32>
    %500 = math.exp %499 : vector<2x16xf32>
    %cst_130 = arith.constant dense<0.000000e+00> : vector<16xf32>
    %501 = vector.multi_reduction <add>, %500, %cst_130 [0] : vector<2x16xf32> to vector<16xf32>
    %502 = vector.shape_cast %501 : vector<16xf32> to vector<1x16xf32>
    %503 = math.log %502 : vector<1x16xf32>
    %504 = vector.broadcast %503 : vector<1x16xf32> to vector<2x16xf32>
    %505 = arith.subf %499, %504 : vector<2x16xf32>
    %c0_131 = arith.constant 0 : index
    %c0_132 = arith.constant 0 : index
    %506 = vector.load %arg20[%c0_131, %c0_132] : memref<2x16xf32, #tpu.memory_space<vmem>>, vector<2x16xf32>
    tpu.vector_store %arg20[%c0_131, %c0_132], %505 {strides = array<i32>} : memref<2x16xf32, #tpu.memory_space<vmem>>, vector<2x16xf32>,
    return
  }
}

</mosaic_0001>

<bundles_post_ra>
// kernel: xmltc_forward.1
= control target key start
LH: loop header
LB: loop body
LE: loop exit
PB: predicated region body
PF: predicated region fallthrough
CT: control target
= control target key end

     0   :  { %s18641_s0 = inlined_call_operand.vmem [shape: s32[2,8], index: 0, kind: input, shape index: {}]   ;;  %s18642_s1 = inlined_call_operand.vmem [shape: f32[100,32], index: 1, kind: input, shape index: {}]   ;;  %s18643_s2 = inlined_call_operand.vmem [shape: f32[32,256], index: 2, kind: input, shape index: {}]   ;;  %s18644_s3 = inlined_call_operand.vmem [shape: f32[1,256], index: 3, kind: input, shape index: {}]   ;;  %s18645_s4 = inlined_call_operand.vmem [shape: f32[64,256], index: 4, kind: input, shape index: {}]   ;;  %s18646_s5 = inlined_call_operand.vmem [shape: f32[16,32], index: 5, kind: input, shape index: {}]   ;;  %s18647_s6 = inlined_call_operand.vmem [shape: f32[32,32], index: 6, kind: input, shape index: {}]   ;;  %s18648_s7 = inlined_call_operand.vmem [shape: f32[1,32], index: 7, kind: input, shape index: {}]   ;;  %s18649_s8 = inlined_call_operand.vmem [shape: f32[64,32], index: 8, kind: input, shape index: {}]   ;;  %s18650_s9 = inlined_call_operand.vmem [shape: f32[1,32], index: 9, kind: input, shape index: {}]   ;;  %s18651_s10 = inlined_call_operand.vmem [shape: f32[64,32], index: 10, kind: input, shape index: {}]   ;;  %s18652_s11 = inlined_call_operand.vmem [shape: f32[1,32], index: 11, kind: input, shape index: {}]   ;;  %s18653_s12 = inlined_call_operand.vmem [shape: f32[32,16], index: 12, kind: input, shape index: {}]   ;;  %s18654_s13 = inlined_call_operand.vmem [shape: f32[1,16], index: 13, kind: input, shape index: {}]   ;;  %s18655_s14 = inlined_call_operand.vmem [shape: f32[2,64], index: 14, kind: input, shape index: {}]   ;;  %s18656_s15 = inlined_call_operand.vmem [shape: f32[1,2], index: 15, kind: input, shape index: {}]   ;;  %s18657_s16 = inlined_call_operand.vmem [shape: f32[64,32], index: 16, kind: input, shape index: {}]   ;;  %s18658_s17 = inlined_call_operand.vmem [shape: f32[1,32], index: 17, kind: input, shape index: {}]   ;;  %s18659_s18 = inlined_call_operand.vmem [shape: f32[1,32], index: 18, kind: input, shape index: {}]   ;;  %s18660_s19 = inlined_call_operand.<no memory space> [shape: f32[1,1], index: 19, kind: input, shape index: {}]   ;;  %s18661_s20 = inlined_call_operand.hbm [shape: f32[2,16], index: 20, kind: output, shape index: {}]  }
   0x1   :  { %18716 = sst [smem:[#allocation13_spill]] %s18641_s0  ;;  %v25_v0 = vstv %s18660_s19 }
   0x2   :  { %18717 = sst [smem:[#allocation14_spill]] %s18642_s1  ;;  %26 = vst [vmem:[#allocation2] sm:$0x1] %v25_v0 }
   0x3   :  { %18718 = sst [smem:[#allocation15_spill]] %s18643_s2 }
   0x4   :  { %18719 = sst [smem:[#allocation16_spill]] %s18644_s3 }
   0x5   :  { %18720 = sst [smem:[#allocation17_spill]] %s18645_s4 }
   0x6   :  { %18721 = sst [smem:[#allocation18_spill]] %s18659_s18 }
   0x7   :  { %18722 = sst [smem:[#allocation19_spill]] %s18661_s20 }
   0x8   :  { %27 = vsyncpa [#allocation5], 0 }
   0x9   :  { %28 = vsyncpa [#allocation4], 0  ;;  %s18723_s2 = sld [smem:[#allocation13_spill]] }
   0xf   :  { %s35_s25 = sshll.u32 %s18723_s2, 4  ;;  %s36_s25 = int_to_ptr.vmem [resolvable:$true] %s35_s25 }
  0x10   :  { %s16278_s3 = scalar_lea.vmem %s36_s25, 32  ;;  %p16283_p1 = scmp.lt.s32.totalorder %s36_s25, %s36_s25 }
  0x11   :  { %p16279_p0 = scmp.ne.s32.totalorder %s36_s25, %s16278_s3  ;;  %p16284_p2 = scmp.lt.s32.totalorder %s16278_s3, %s16278_s3 }
  0x13   :  { %p16285_p3 = por %p16284_p2, %p16283_p1 }
  0x15   :  { %p16286_p4 = pnand %p16285_p3, %p16279_p0 }
  0x17   :  { %16289 = shalt.err (!%p16286_p4)
}
  0x18   :  { %s16316_s26 = smov [#allocation3]  }
  0x19   :  { %38 = dma.vmem_to_smem %s36_s25, 32, %s16316_s26, [#allocation5]  }
  0x1a   :  { %16312 = dma.done.wait [#allocation5], 32  }
  0x1b   :  { %16313 = vsyncadd [#allocation5], 4294967264 }
  0x1c   :  { %80 = sfence }
  0x1d   :  { %s18724_s28 = sld [smem:[#allocation17_spill]]  ;;  %s16449_s21 = sld [smem:[#allocation3]]  ;;  %v18683_v10 = vmov 0.0   ;;  %vm171_vm0 = vcmask 1040384   ;;  %vm173_vm1 = vcmask 1041408   ;;  %vm175_vm2 = vcmask 1042432  }
  0x1e   :  { %914 = vmatprep.mubr.f32.mxu1 %v18683_v10  ;;  %291 = vmatprep.mubr.f32.mxu0 %v18683_v10  ;;  %s18725_s1 = sld [smem:[#allocation15_spill]]  ;;  %s16601_s4 = sld [smem:[#allocation3 + $0x80]]  ;;  %vm177_vm3 = vcmask 1043456   ;;  %vm179_vm4 = vcmask 1044480   ;;  %vm181_vm5 = vcmask 1045504   ;;  %vm183_vm6 = vcmask 1046528  }
  0x1f   :  { %s16617_s23 = sld [smem:[#allocation3 + $0x1]]  ;;  %s16632_s24 = sld [smem:[#allocation3 + $0x2]]  ;;  %vm212_vm7 = vcmask 261120   ;;  %vm830_vm8 = vcmask 523264   ;;  %vm9340_vm9 = vcmask 64512   ;;  %vm9858_vm10 = vcmask 130048  }
  0x20   :  { %s16644_s2 = sld [smem:[#allocation3 + $0x3]]  ;;  %s18726_s19 = sld [smem:[#allocation14_spill]]  ;;  %vm16324_vm11 = vmmov 0   ;;  %vm13360_vm12 = vcmask 123904  }
  0x21   :  { %s16651_s25 = sld [smem:[#allocation3 + $0x83]]  ;;  %s16677_s22 = sld [smem:[#allocation3 + $0x84]] }
  0x23   :  { %v812_v1 = vld [vmem:[%s18724_s28 + $0x8] sm:$0xff]  ;;  %v814_v2 = vld [vmem:[%s18724_s28 + $0x18] sm:$0xff]  ;;  %v16447_v3 = vld [vmem:[%s18724_s28] sm:$0xff] }
  0x24   :  { %v834_v4 = vand.u32 4294901760, %v812_v1  ;;  %v838_v5 = vand.u32 4294901760, %v814_v2  ;;  %v16454_v6 = vld [vmem:[%s18724_s28 + $0x10] sm:$0xff]  ;;  %v836_v7 = vand.u32 4294901760, %v16447_v3  ;;  %v16460_v8 = vld [vmem:[%s18724_s28 + $0x28] sm:$0xff]  ;;  %v16465_v9 = vld [vmem:[%s18724_s28 + $0x38] sm:$0xff] }
  0x25   :  { %v840_v11 = vand.u32 4294901760, %v16454_v6  ;;  %v842_v12 = vand.u32 4294901760, %v16460_v8  ;;  %v846_v13 = vand.u32 4294901760, %v16465_v9  ;;  %v16475_v14 = vld [vmem:[%s18724_s28 + $0x20] sm:$0xff]  ;;  %v16480_v15 = vld [vmem:[%s18724_s28 + $0x30] sm:$0xff]  ;;  %v16485_v16 = vld [vmem:[%s18724_s28 + $0x48] sm:$0xff] }
  0x26   :  { %v16487_v17 = vpack.c.bf16 %v838_v5, %v834_v4  ;;  %v844_v18 = vand.u32 4294901760, %v16475_v14  ;;  %v848_v19 = vand.u32 4294901760, %v16480_v15  ;;  %v16494_v20 = vld [vmem:[%s18724_s28 + $0x58] sm:$0xff]  ;;  %v850_v21 = vand.u32 4294901760, %v16485_v16  ;;  %v16500_v22 = vld [vmem:[%s18724_s28 + $0x40] sm:$0xff]  ;;  %v16505_v23 = vld [vmem:[%s18724_s28 + $0x50] sm:$0xff]  ;;  %s82_s27 = scalar_lea.vmem %s18726_s19, %s16449_s21  ;;  %s85_s0 = scalar_lea.vmem %s18726_s19, %s16601_s4 }
  0x27   :  { %v16511_v24 = vpack.c.bf16 %v840_v11, %v836_v7  ;;  %v16517_v25 = vpack.c.bf16 %v846_v13, %v842_v12  ;;  %v854_v26 = vand.u32 4294901760, %v16494_v20  ;;  %v852_v27 = vand.u32 4294901760, %v16500_v22  ;;  %v16524_v28 = vld [vmem:[%s18724_s28 + $0x68] sm:$0xff]  ;;  %v16529_v29 = vld [vmem:[%s18724_s28 + $0x78] sm:$0xff]  ;;  %v16534_v30 = vld [vmem:[%s18724_s28 + $0x60] sm:$0xff]  ;;  %s88_s3 = scalar_lea.vmem %s18726_s19, %s16617_s23  ;;  %s16762_s23 = sld [smem:[#allocation3 + $0x85]] }
  0x28   :  { %14647 = vmatprep.subr.bf16.mxu1 %v16487_v17  ;;  %v16541_v31 = vpack.c.bf16 %v848_v19, %v844_v18  ;;  %v856_v32 = vand.u32 4294901760, %v16505_v23  ;;  %v18685_v33 = vand.u32 4294901760, %v16524_v28  ;;  %v18671_v34 = vand.u32 4294901760, %v16529_v29  ;;  %v16549_v35 = vld [vmem:[%s18724_s28 + $0x70] sm:$0xff]  ;;  %v193_v36 = vld [vmem:[%s18725_s1 + $0x8] sm:$0xff]  ;;  %v195_v37 = vld [vmem:[%s18725_s1 + $0x18] sm:$0xff]  ;;  %s109_s29 = scalar_lea.vmem %s18726_s19, %s16677_s22 }
  0x29   :  { %14649 = vmatpush1.bf16.msra.mxu1 %v16511_v24  ;;  %v16562_v38 = vpack.c.bf16 %v854_v26, %v850_v21  ;;  %v18670_v39 = vand.u32 4294901760, %v16534_v30  ;;  %v18669_v40 = vand.u32 4294901760, %v16549_v35  ;;  %v219_v41 = vand.u32 4294901760, %v193_v36  ;;  %v192_v42 = vld [vmem:[%s18725_s1] sm:$0xff]  ;;  %v194_v43 = vld [vmem:[%s18725_s1 + $0x10] sm:$0xff]  ;;  %v197_v52 = vld [vmem:[%s18725_s1 + $0x28] sm:$0xff] }
  0x2a   :  { %14651 = vmatprep.subr.bf16.mxu1 %v16517_v25  ;;  %v16577_v44 = vpack.c.bf16 %v856_v32, %v852_v27  ;;  %v16583_v45 = vpack.c.bf16 %v18671_v34, %v18685_v33  ;;  %v223_v46 = vand.u32 4294901760, %v195_v37  ;;  %v221_v47 = vand.u32 4294901760, %v192_v42  ;;  %v199_v53 = vld [vmem:[%s18725_s1 + $0x38] sm:$0xff]  ;;  %v196_v58 = vld [vmem:[%s18725_s1 + $0x20] sm:$0xff]  ;;  %v198_v59 = vld [vmem:[%s18725_s1 + $0x30] sm:$0xff]  ;;  %s16619_s28 = sld [smem:[#allocation3 + $0x81]] }
  0x2b   :  { %v16589_v48 = vpack.c.bf16 %v18669_v40, %v18670_v39  ;;  %v16591_v49 = vsub.f32 %v193_v36, %v219_v41  ;;  %v225_v50 = vand.u32 4294901760, %v194_v43  ;;  %v16593_v51 = vsub.f32 %v812_v1, %v834_v4  ;;  %s16634_s1 = sld [smem:[#allocation3 + $0x82]]  ;;  %s16772_s21 = sld [smem:[#allocation3 + $0x7]] }
  0x2c   :  { %v16603_v54 = vpack.c.bf16 %v223_v46, %v219_v41  ;;  %v16605_v55 = vsub.f32 %v195_v37, %v223_v46  ;;  %v16607_v56 = vsub.f32 %v192_v42, %v221_v47  ;;  %v16609_v57 = vsub.f32 %v814_v2, %v838_v5  ;;  %s16777_s4 = sld [smem:[#allocation3 + $0x87]] }
  0x2d   :  { %14653 = vmatpush1.bf16.msra.mxu1 %v16541_v31  ;;  %v16622_v60 = vpack.c.bf16 %v225_v50, %v221_v47  ;;  %v16624_v61 = vsub.f32 %v194_v43, %v225_v50  ;;  %v18668_v62 = vand.u32 4294901760, %v16593_v51  ;;  %v16630_v63 = vsub.f32 %v16447_v3, %v836_v7 }
  0x2e   :  { %14655 = vmatprep.subr.bf16.mxu1 %v16562_v38  ;;  %14599 = vmatprep.subr.bf16.mxu0 %v16603_v54  ;;  %v18667_v0 = vand.u32 4294901760, %v16609_v57  ;;  %v16642_v1 = vsub.f32 %v16454_v6, %v840_v11  ;;  %v227_v2 = vand.u32 4294901760, %v197_v52  ;;  %v231_v4 = vand.u32 4294901760, %v199_v53 }
  0x2f   :  { %14601 = vmatpush1.bf16.msra.mxu0 %v16622_v60  ;;  %v929_v3 = vsub.f32 %v16593_v51, %v18668_v62  ;;  %v18666_v5 = vand.u32 4294901760, %v16630_v63  ;;  %v229_v7 = vand.u32 4294901760, %v196_v58  ;;  %v233_v36 = vand.u32 4294901760, %v198_v59 }
  0x30   :  { %v941_v6 = vsub.f32 %v16609_v57, %v18667_v0  ;;  %v18665_v11 = vand.u32 4294901760, %v16642_v1  ;;  %v16657_v37 = vpack.c.bf16 %v231_v4, %v227_v2  ;;  %v16659_v41 = vsub.f32 %v197_v52, %v227_v2  ;;  %s91_s30 = scalar_lea.vmem %s18726_s19, %s16619_s28  ;;  %s16765_s28 = sld [smem:[#allocation3 + $0x6]] }
  0x31   :  { %14657 = vmatpush1.bf16.msra.mxu1 %v16577_v44  ;;  %v930_v42 = vand.u32 4294901760, %v929_v3  ;;  %v935_v43 = vsub.f32 %v16630_v63, %v18666_v5  ;;  %v16669_v46 = vsub.f32 %v199_v53, %v231_v4  ;;  %v16671_v47 = vpack.c.bf16 %v233_v36, %v229_v7  ;;  %v86_v4 = vld [vmem:[%s85_s0] sm:$0x1]  ;;  %s94_s0 = scalar_lea.vmem %s18726_s19, %s16632_s24  ;;  %s97_s26 = scalar_lea.vmem %s18726_s19, %s16634_s1 }
  0x32   :  { %14659 = vmatprep.subr.bf16.mxu1 %v16583_v45  ;;  %v942_v50 = vand.u32 4294901760, %v941_v6  ;;  %v947_v52 = vsub.f32 %v16642_v1, %v18665_v11  ;;  %14603 = vmatprep.subr.bf16.mxu0 %v16657_v37  ;;  %v16684_v53 = vsub.f32 %v196_v58, %v229_v7  ;;  %v16686_v2 = vsub.f32 %v198_v59, %v233_v36  ;;  %v89_v36 = vld [vmem:[%s88_s3] sm:$0x1]  ;;  %s124_s18 = scalar_lea.vmem %s18726_s19, %s16772_s21  ;;  %s127_s21 = scalar_lea.vmem %s18726_s19, %s16777_s4 }
  0x33   :  { %v936_v3 = vand.u32 4294901760, %v935_v43  ;;  %14605 = vmatpush1.bf16.msra.mxu0 %v16671_v47  ;;  %v16700_v58 = vsub.f32 %v16460_v8, %v842_v12  ;;  %v16705_v59 = vsub.f32 %v16465_v9, %v846_v13  ;;  %v16710_v7 = vsub.f32 %v16475_v14, %v844_v18  ;;  %v92_v6 = vld [vmem:[%s91_s30] sm:$0x1]  ;;  %s100_s30 = scalar_lea.vmem %s18726_s19, %s16644_s2  ;;  %s16752_s2 = sld [smem:[#allocation3 + $0x5]] }
  0x34   :  { %v16720_v8 = vpack.c.bf16 %v942_v50, %v930_v42  ;;  %v948_v9 = vand.u32 4294901760, %v947_v52  ;;  %v16725_v12 = vsub.f32 %v16480_v15, %v848_v19  ;;  %v83_v13 = vld [vmem:[%s82_s27] sm:$0x1]  ;;  %v130_v43 = vrot.slane %v86_v4, 7  ;;  %s103_s27 = scalar_lea.vmem %s18726_s19, %s16651_s25  ;;  %s16758_s25 = sld [smem:[#allocation3 + $0x4]] }
  0x35   :  { %v95_v14 = vld [vmem:[%s94_s0] sm:$0x1]  ;;  %14661 = vmatpush1.bf16.msra.mxu1 %v16589_v48  ;;  %v18673_v11 = vand.u32 4294901760, %v16700_v58  ;;  %v18672_v42 = vand.u32 4294901760, %v16705_v59  ;;  %v18674_v50 = vand.u32 4294901760, %v16710_v7  ;;  %v133_v15 = vrot.slane %v89_v36, 6 }
  0x36   :  { %v98_v18 = vld [vmem:[%s97_s26] sm:$0x1]  ;;  %14663 = vmatprep.subr.bf16.mxu1 %v16720_v8  ;;  %v16740_v19 = vpack.c.bf16 %v948_v9, %v936_v3  ;;  %v18682_v4 = vand.u32 4294901760, %v16725_v12  ;;  %v136_v0 = vrot.slane %v92_v6, 5  ;;  %v139_v62 = vrot.slane %v95_v14, 4  ;;  %s16770_s0 = sld [smem:[#allocation3 + $0x86]]  ;;  %s115_s26 = scalar_lea.vmem %s18726_s19, %s16762_s23 }
  0x37   :  { %v101_v52 = vld [vmem:[%s100_s30] sm:$0x1]  ;;  %v953_v40 = vsub.f32 %v16700_v58, %v18673_v11  ;;  %v965_v39 = vsub.f32 %v16705_v59, %v18672_v42  ;;  %v959_v36 = vsub.f32 %v16710_v7, %v18674_v50  ;;  %v142_v34 = vrot.slane %v98_v18, 3  ;;  %s16318_s4 = smov 64  }
  0x38   :  { %v104_v5 = vld [vmem:[%s103_s27] sm:$0x1]  ;;  %920 = vmatmul.mubr.f32.vlgmr.msra.gmra.mrb[0].mxu1 %v18683_v10  ;;  %v971_v3 = vsub.f32 %v16725_v12, %v18682_v4  ;;  %v145_v6 = vrot.slane %v101_v52, 2  ;;  %v172_v18 = vsel %vm171_vm0, %v83_v13, %v130_v43  ;;  %v18681_v43 = vand.u32 4294901760, %v16591_v49 }
  0x39   :  { %v148_v9 = vrot.slane %v104_v5, 1  ;;  %14665 = vmatpush1.bf16.msra.mxu1 %v16740_v19  ;;  %v954_v14 = vand.u32 4294901760, %v953_v40  ;;  %v966_v42 = vand.u32 4294901760, %v965_v39  ;;  %v960_v11 = vand.u32 4294901760, %v959_v36  ;;  %1070 = vmatprep.mubr.f32.mxu1 %v18683_v10  ;;  %s112_s24 = scalar_lea.vmem %s18726_s19, %s16752_s2  ;;  %s118_s2 = scalar_lea.vmem %s18726_s19, %s16765_s28 }
  0x3a   :  { %v972_v50 = vand.u32 4294901760, %v971_v3  ;;  %v174_v52 = vsel %vm173_vm1, %v172_v18, %v133_v15  ;;  %v18679_v15 = vand.u32 4294901760, %v16607_v56  ;;  %v317_v3 = vsub.f32 %v16591_v49, %v18681_v43  ;;  %s106_s3 = scalar_lea.vmem %s18726_s19, %s16758_s25  ;;  %s18756_s25 = sld [smem:[#allocation16_spill]] }
  0x3b   :  { %v16767_v5 = vpack.c.bf16 %v966_v42, %v954_v14  ;;  %v176_v40 = vsel %vm175_vm2, %v174_v52, %v136_v0  ;;  %v18680_v42 = vand.u32 4294901760, %v16605_v55  ;;  %v110_v14 = vld [vmem:[%s109_s29] sm:$0x1] }
  0x3c   :  { %v16774_v39 = vpack.c.bf16 %v972_v50, %v960_v11  ;;  %v178_v13 = vsel %vm177_vm3, %v176_v40, %v139_v62  ;;  %v18678_v11 = vand.u32 4294901760, %v16624_v61  ;;  %v16794_v62 = vsub.f32 %v16485_v16, %v850_v21  ;;  %s121_s1 = scalar_lea.vmem %s18726_s19, %s16770_s0  ;;  %v107_v33 = vld [vmem:[%s106_s3] sm:$0x1] }
  0x3d   :  { %18727 = vst [vmem:[#allocation9_spill] sm:$0xff] %v16767_v5  ;;  %14667 = vmatprep.subr.bf16.mxu1 %v16767_v5  ;;  %v180_v0 = vsel %vm179_vm4, %v178_v13, %v142_v34  ;;  %v16799_v50 = vsub.f32 %v16494_v20, %v854_v26  ;;  %v329_v34 = vsub.f32 %v16605_v55, %v18680_v42  ;;  %v318_v52 = vand.u32 4294901760, %v317_v3 }
  0x3e   :  { %18728 = vst [vmem:[#allocation10_spill] sm:$0xff] %v16774_v39  ;;  %14669 = vmatpush1.bf16.msra.mxu1 %v16774_v39  ;;  %v182_v36 = vsel %vm181_vm5, %v180_v0, %v145_v6  ;;  %v323_v16 = vsub.f32 %v16607_v56, %v18679_v15  ;;  %v335_v21 = vsub.f32 %v16624_v61, %v18678_v11  ;;  %v18677_v26 = vand.u32 4294901760, %v16794_v62  ;;  %v122_v11 = vld [vmem:[%s121_s1] sm:$0x1] }
  0x3f   :  { %v184_v20 = vsel %vm183_vm6, %v182_v36, %v148_v9  ;;  %v18676_v6 = vand.u32 4294901760, %v16799_v50  ;;  %v330_v40 = vand.u32 4294901760, %v329_v34  ;;  %v113_v34 = vld [vmem:[%s112_s24] sm:$0x1]  ;;  %v151_v15 = vrot.slane %v110_v14, 7  ;;  %s16319_s24 = smov 96  }
  0x40   :  { %v214_v18 = vsel %vm212_vm7, %v184_v20, 0  ;;  %v324_v9 = vand.u32 4294901760, %v323_v16  ;;  %v336_v0 = vand.u32 4294901760, %v335_v21  ;;  %v977_v36 = vsub.f32 %v16794_v62, %v18677_v26  ;;  %v116_v16 = vld [vmem:[%s115_s26] sm:$0x1]  ;;  %s16320_s26 = smov 32  }
  0x41   :  { %v16838_v13 = vand.u32 4294901760, %v214_v18  ;;  %v989_v3 = vsub.f32 %v16799_v50, %v18676_v6  ;;  %v14606_v20 = vpack.c.bf16 %v330_v40, %v318_v52  ;;  %v16857_v21 = vsub.f32 %v16500_v22, %v852_v27  ;;  %v119_v26 = vld [vmem:[%s118_s2] sm:$0x1] }
  0x42   :  { %v16862_v6 = vsub.f32 %v16505_v23, %v856_v32  ;;  %v14608_v43 = vpack.c.bf16 %v336_v0, %v324_v9  ;;  %v978_v4 = vand.u32 4294901760, %v977_v36  ;;  %v125_v52 = vld [vmem:[%s124_s18] sm:$0x1]  ;;  %v154_v39 = vrot.slane %v113_v34, 6 }
  0x43   :  { %v16865_v42 = vsub.f32 %v214_v18, %v16838_v13  ;;  %v990_v10 = vand.u32 4294901760, %v989_v3  ;;  %v128_v40 = vld [vmem:[%s127_s21] sm:$0x1]  ;;  %14607 = vmatprep.subr.bf16.mxu0 %v14606_v20  ;;  %v18691_v22 = vand.u32 4294901760, %v16857_v21  ;;  %v157_v23 = vrot.slane %v116_v16, 5  ;;  %s18778_s21 = sld [smem:[#allocation18_spill]] }
  0x44   :  { %v18690_v27 = vand.u32 4294901760, %v16862_v6  ;;  %v160_v14 = vrot.slane %v119_v26, 4  ;;  %v163_v18 = vrot.slane %v122_v11, 3  ;;  %v166_v36 = vrot.slane %v125_v52, 2 }
  0x45   :  { %v18692_v32 = vand.u32 4294901760, %v16865_v42  ;;  %v16870_v5 = vpack.c.bf16 %v990_v10, %v978_v4  ;;  %v983_v9 = vsub.f32 %v16857_v21, %v18691_v22  ;;  %v169_v3 = vrot.slane %v128_v40, 1 }
  0x46   :  { %v995_v0 = vsub.f32 %v16862_v6, %v18690_v27  ;;  %v185_v10 = vsel %vm171_vm0, %v107_v33, %v151_v15  ;;  %v340_v4 = vand.u32 4294901760, %v16659_v41  ;;  %v352_v11 = vand.u32 4294901760, %v16669_v46 }
  0x47   :  { %v295_v34 = vsub.f32 %v16865_v42, %v18692_v32  ;;  %14671 = vmatprep.subr.bf16.mxu1 %v16870_v5  ;;  %v984_v26 = vand.u32 4294901760, %v983_v9  ;;  %v186_v20 = vsel %vm173_vm1, %v185_v10, %v154_v39  ;;  %v346_v27 = vand.u32 4294901760, %v16684_v53 }
  0x48   :  { %v996_v16 = vand.u32 4294901760, %v995_v0  ;;  %v187_v40 = vsel %vm175_vm2, %v186_v20, %v157_v23  ;;  %v341_v22 = vsub.f32 %v16659_v41, %v340_v4  ;;  %v353_v33 = vsub.f32 %v16669_v46, %v352_v11 }
  0x49   :  { %v296_v52 = vand.u32 4294901760, %v295_v34  ;;  %v188_v9 = vsel %vm177_vm3, %v187_v40, %v160_v14  ;;  %v347_v39 = vsub.f32 %v16684_v53, %v346_v27  ;;  %v358_v0 = vand.u32 4294901760, %v16686_v2 }
  0x4a   :  { %v16894_v15 = vpack.c.bf16 %v996_v16, %v984_v26  ;;  %v189_v23 = vsel %vm179_vm4, %v188_v9, %v163_v18  ;;  %v342_v34 = vand.u32 4294901760, %v341_v22  ;;  %v354_v10 = vand.u32 4294901760, %v353_v33 }
  0x4b   :  { %297 = vmatmul.mubr.f32.vlgmr.msra.gmra.mrb[0].mxu0 %v296_v52  ;;  %v18729_v20 = vand.u32 4294901760, %v16524_v28  ;;  %v190_v14 = vsel %vm181_vm5, %v189_v23, %v166_v36  ;;  %v348_v26 = vand.u32 4294901760, %v347_v39  ;;  %v359_v16 = vsub.f32 %v16686_v2, %v358_v0 }
  0x4c   :  { %14609 = vmatpush1.bf16.msra.mxu0 %v14608_v43  ;;  %14673 = vmatpush1.bf16.msra.mxu1 %v16894_v15  ;;  %v18730_v52 = vand.u32 4294901760, %v16529_v29  ;;  %v18731_v18 = vmov 0.0   ;;  %v14610_v40 = vpack.c.bf16 %v354_v10, %v342_v34  ;;  %v18732_v33 = vand.u32 4294901760, %v16534_v30 }
  0x4d   :  { %v16905_v32 = vsub.f32 %v16524_v28, %v18729_v20  ;;  %302 = vmatprep.mubr.f32.mxu0 %v18731_v18  ;;  %v191_v28 = vsel %vm183_vm6, %v190_v14, %v169_v3  ;;  %v360_v39 = vand.u32 4294901760, %v359_v16  ;;  %v14614_v34 = vpack.c.bf16 %v16605_v55, %v16591_v49 }
  0x4e   :  { %v16915_v22 = vsub.f32 %v16529_v29, %v18730_v52  ;;  %v16923_v36 = vsub.f32 %v16534_v30, %v18732_v33  ;;  %v217_v9 = vsel %vm212_vm7, %v191_v28, 0  ;;  %v18733_v29 = vand.u32 4294901760, %v16549_v35  ;;  %14611 = vmatprep.subr.bf16.mxu0 %v14610_v40 }
  0x4f   :  { %v18694_v43 = vand.u32 4294901760, %v16905_v32  ;;  %v16932_v52 = vand.u32 4294901760, %v217_v9  ;;  %v14612_v10 = vpack.c.bf16 %v360_v39, %v348_v26 }
  0x50   :  { %v18693_v23 = vand.u32 4294901760, %v16915_v22  ;;  %v16930_v20 = vsub.f32 %v16549_v35, %v18733_v29  ;;  %v18696_v30 = vand.u32 4294901760, %v16923_v36 }
  0x51   :  { %v1001_v3 = vsub.f32 %v16905_v32, %v18694_v43  ;;  %v16945_v16 = vsub.f32 %v217_v9, %v16932_v52  ;;  %14613 = vmatpush1.bf16.msra.mxu0 %v14612_v10 }
  0x52   :  { %v1013_v14 = vsub.f32 %v16915_v22, %v18693_v23  ;;  %v18695_v35 = vand.u32 4294901760, %v16930_v20  ;;  %v1007_v40 = vsub.f32 %v16923_v36, %v18696_v30  ;;  %14615 = vmatprep.subr.bf16.mxu0 %v14614_v34  ;;  %v18735_v34 = vand.u32 4294901760, %v16609_v57 }
  0x53   :  { %v1002_v28 = vand.u32 4294901760, %v1001_v3  ;;  %v305_v39 = vand.u32 4294901760, %v16945_v16  ;;  %v16961_v3 = vpack.c.bf16 %v16609_v57, %v16593_v51  ;;  %v16981_v30 = vpack.c.bf16 %v16642_v1, %v16630_v63 }
  0x54   :  { %v1014_v33 = vand.u32 4294901760, %v1013_v14  ;;  %v1019_v26 = vsub.f32 %v16930_v20, %v18695_v35  ;;  %v1008_v29 = vand.u32 4294901760, %v1007_v40  ;;  %v18734_v35 = vand.u32 4294901760, %v16593_v51 }
  0x55   :  { %v306_v9 = vsub.f32 %v16945_v16, %v305_v39  ;;  %v18736_v40 = vand.u32 4294901760, %v16630_v63  ;;  %v18739_v51 = vand.u32 4294901760, %v16705_v59  ;;  %v18740_v57 = vand.u32 4294901760, %v16710_v7 }
  0x56   :  { %v16954_v23 = vpack.c.bf16 %v1014_v33, %v1002_v28  ;;  %v1020_v43 = vand.u32 4294901760, %v1019_v26  ;;  %v16970_v28 = vpack.c.bf16 %v18735_v34, %v18734_v35  ;;  %v18737_v33 = vand.u32 4294901760, %v16642_v1 }
  0x57   :  { %v307_v14 = vand.u32 4294901760, %v306_v9  ;;  %v18741_v35 = vand.u32 4294901760, %v16725_v12  ;;  %v16998_v34 = vpack.c.bf16 %v16705_v59, %v16700_v58  ;;  %v14616_v63 = vpack.c.bf16 %v16624_v61, %v16607_v56 }
  0x58   :  { %14675 = vmatprep.subr.bf16.mxu1 %v16954_v23  ;;  %v16964_v10 = vpack.c.bf16 %v1020_v43, %v1008_v29  ;;  %v16976_v26 = vpack.c.bf16 %v18737_v33, %v18736_v40  ;;  %v18738_v43 = vand.u32 4294901760, %v16700_v58  ;;  %v14618_v1 = vpack.c.bf16 %v16669_v46, %v16659_v41 }
  0x59   :  { %v16993_v9 = vpack.c.bf16 %v18741_v35, %v18740_v57  ;;  %308 = vmatmul.mubr.f32.gmra.mrb[2].mxu0 %v307_v14  ;;  %v17009_v14 = vpack.c.bf16 %v16725_v12, %v16710_v7  ;;  %v17016_v58 = vpack.c.bf16 %v16799_v50, %v16794_v62  ;;  %v14620_v59 = vpack.c.bf16 %v16686_v2, %v16684_v53 }
  0x5a   :  { %14677 = vmatpush1.bf16.msra.mxu1 %v16964_v10  ;;  %v16987_v29 = vpack.c.bf16 %v18739_v51, %v18738_v43  ;;  %418 = vmatprep.mubr.f32.mxu0 %v18731_v18  ;;  %v17024_v7 = vpack.c.bf16 %v16862_v6, %v16857_v21  ;;  %v17030_v12 = vpack.c.bf16 %v16915_v22, %v16905_v32  ;;  %v18742_v33 = vand.u32 4294901760, %v16591_v49 }
  0x5b   :  { %14679 = vmatprep.subr.bf16.mxu1 %v16961_v3  ;;  %v17037_v40 = vpack.c.bf16 %v16930_v20, %v16923_v36  ;;  %v18743_v43 = vand.u32 4294901760, %v16605_v55  ;;  %v18744_v57 = vand.u32 4294901760, %v16607_v56  ;;  %v18745_v35 = vand.u32 4294901760, %v16624_v61 }
  0x5c   :  { %v14634_v49 = vpack.c.bf16 %v352_v11, %v340_v4  ;;  %v18746_v55 = vand.u32 4294901760, %v16865_v42  ;;  %v14636_v56 = vpack.c.bf16 %v358_v0, %v346_v27  ;;  %v18750_v41 = vand.u32 4294901760, %v16862_v6  ;;  %v200_v27 = vld [vmem:[%s18756_s25] sm:$0x3] }
  0x5d   :  { %1072 = vmatmul.mubr.f32.vlgmr.msra.gmra.mrb[0].mxu1 %v18731_v18  ;;  %420 = vmatmul.mubr.f32.vlgmr.msra.gmra.mrb[0].mxu0 %v16838_v13  ;;  %v14630_v51 = vpack.c.bf16 %v18743_v43, %v18742_v33  ;;  %v18752_v53 = vand.u32 4294901760, %v16915_v22  ;;  %v202_v6 = vlaneseq }
  0x5e   :  { %14681 = vmatpush1.bf16.msra.mxu1 %v16981_v30  ;;  %1174 = vmatprep.mubr.f32.mxu1 %v18731_v18 }
  0x5f   :  { %14683 = vmatprep.subr.bf16.mxu1 %v16998_v34  ;;  %14617 = vmatpush1.bf16.msra.mxu0 %v14616_v63  ;;  %v14632_v63 = vpack.c.bf16 %v18745_v35, %v18744_v57 }
  0x60   :  { %425 = vmatprep.mubr.f32.mxu0 %v18731_v18  ;;  %14619 = vmatprep.subr.bf16.mxu0 %v14618_v1 }
  0x61   :  { %427 = vmatmul.mubr.f32.gmra.mrb[2].mxu0 %v16932_v52 }
  0x62   :  { %14685 = vmatpush1.bf16.msra.mxu1 %v17009_v14  ;;  %513 = vmatprep.mubr.f32.mxu0 %v18731_v18 }
  0x63   :  { %14687 = vmatprep.subr.bf16.mxu1 %v17016_v58  ;;  %14621 = vmatpush1.bf16.msra.mxu0 %v14620_v59 }
  0x64   :  { %14623 = vmatprep.subr.bf16.mxu0 %v16603_v54 }
  0x66   :  { %14689 = vmatpush1.bf16.msra.mxu1 %v17024_v7  ;;  %516 = vmatmul.mubr.f32.vlgmr.msra.gmra.mrb[0].mxu0 %v16865_v42  ;;  %v18753_v42 = vand.u32 4294901760, %v16923_v36 }
  0x67   :  { %14691 = vmatprep.subr.bf16.mxu1 %v17030_v12  ;;  %14625 = vmatpush1.bf16.msra.mxu0 %v16622_v60 }
  0x68   :  { %521 = vmatprep.mubr.f32.mxu0 %v18731_v18  ;;  %14627 = vmatprep.subr.bf16.mxu0 %v16657_v37 }
  0x6a   :  { %14693 = vmatpush1.bf16.msra.mxu1 %v17037_v40  ;;  %524 = vmatmul.mubr.f32.gmra.mrb[2].mxu0 %v16945_v16 }
  0x6b   :  { %14695 = vmatprep.subr.bf16.mxu1 %v16487_v17  ;;  %14629 = vmatpush1.bf16.msra.mxu0 %v16671_v47 }
  0x6c   :  { %602 = vmatprep.mubr.f32.mxu0 %v18731_v18  ;;  %14631 = vmatprep.subr.bf16.mxu0 %v14630_v51 }
  0x6d   :  { %1177 = vmatmul.mubr.f32.vlgmr.msra.gmra.mrb[0].mxu1 %v18731_v18 }
  0x6e   :  { %14697 = vmatpush1.bf16.msra.mxu1 %v16511_v24  ;;  %1263 = vmatprep.mubr.f32.mxu1 %v18731_v18 }
  0x6f   :  { %606 = vmatmul.mubr.f32.vlgmr.msra.gmra.mrb[0].mxu0 %v18746_v55  ;;  %14699 = vmatprep.subr.bf16.mxu1 %v16517_v25 }
  0x70   :  { %14633 = vmatpush1.bf16.msra.mxu0 %v14632_v63  ;;  %611 = vmatprep.mubr.f32.mxu0 %v18731_v18 }
  0x71   :  { %14635 = vmatprep.subr.bf16.mxu0 %v14634_v49 }
  0x72   :  { %14701 = vmatpush1.bf16.msra.mxu1 %v16541_v31 }
  0x73   :  { %615 = vmatmul.mubr.f32.gmra.mrb[2].mxu0 %v305_v39  ;;  %14703 = vmatprep.subr.bf16.mxu1 %v16562_v38 }
  0x74   :  { %14637 = vmatpush1.bf16.msra.mxu0 %v14636_v56  ;;  %709 = vmatprep.mubr.f32.mxu0 %v18731_v18 }
  0x75   :  { %14639 = vmatprep.subr.bf16.mxu0 %v16603_v54  ;;  %v18747_v54 = vand.u32 4294901760, %v16794_v62  ;;  %v18754_v62 = vand.u32 4294901760, %v16930_v20 }
  0x76   :  { %14705 = vmatpush1.bf16.msra.mxu1 %v16577_v44 }
  0x77   :  { %711 = vmatmul.mubr.f32.vlgmr.msra.gmra.mrb[0].mxu0 %v16838_v13  ;;  %14707 = vmatprep.subr.bf16.mxu1 %v16583_v45 }
  0x78   :  { %14641 = vmatpush1.bf16.msra.mxu0 %v16622_v60  ;;  %716 = vmatprep.mubr.f32.mxu0 %v18731_v18  ;;  %v18748_v60 = vand.u32 4294901760, %v16799_v50  ;;  %v17127_v50 = vpack.c.bf16 %v18754_v62, %v18753_v42 }
  0x79   :  { %14643 = vmatprep.subr.bf16.mxu0 %v16657_v37  ;;  %v18749_v37 = vand.u32 4294901760, %v16857_v21 }
  0x7a   :  { %14709 = vmatpush1.bf16.msra.mxu1 %v16589_v48  ;;  %v17099_v61 = vpack.c.bf16 %v18748_v60, %v18747_v54 }
  0x7b   :  { %718 = vmatmul.mubr.f32.gmra.mrb[2].mxu0 %v16932_v52  ;;  %14711 = vmatprep.subr.bf16.mxu1 %v16970_v28  ;;  %v17109_v46 = vpack.c.bf16 %v18750_v41, %v18749_v37 }
  0x7c   :  { %14645 = vmatpush1.bf16.msra.mxu0 %v16671_v47  ;;  %796 = vmatprep.mubr.f32.mxu0 %v18731_v18  ;;  %v18751_v47 = vand.u32 4294901760, %v16905_v32 }
  0x7d   :  { %1267 = vmatmul.mubr.f32.vlgmr.msra.gmra.mrb[0].mxu1 %v18731_v18  ;;  %14743 = vmatprep.subr.bf16.mxu0 %v16487_v17 }
  0x7e   :  { %14713 = vmatpush1.bf16.msra.mxu1 %v16976_v26  ;;  %1385 = vmatprep.mubr.f32.mxu1 %v18731_v18  ;;  %v17117_v2 = vpack.c.bf16 %v18752_v53, %v18751_v47 }
  0x7f   :  { %798 = vmatmul.mubr.f32.vlgmr.msra.gmra.mrb[0].mxu0 %v16838_v13  ;;  %14715 = vmatprep.subr.bf16.mxu1 %v16987_v29  ;;  %v17156_v13 = vshrl.u32 %v202_v6, 7 }
  0x80   :  { %803 = vmatprep.mubr.f32.mxu0 %v18731_v18  ;;  %14745 = vmatpush1.bf16.msra.mxu0 %v16511_v24 }
  0x81   :  { %14747 = vmatprep.subr.bf16.mxu0 %v16517_v25  ;;  %18755 = vst [vmem:[#allocation11_spill] sm:$0xff] %v17156_v13  ;;  %v18697_v21 = vsub.s32 1, %v17156_v13  ;;  %v17165_v4 = vsub.s32 0, %v17156_v13 }
  0x82   :  { %14717 = vmatpush1.bf16.msra.mxu1 %v16993_v9 }
  0x83   :  { %805 = vmatmul.mubr.f32.gmra.mrb[2].mxu0 %v16932_v52  ;;  %14719 = vmatprep.subr.bf16.mxu1 %v17099_v61  ;;  %v209_v32 = vrot.slane %v200_v27, %v18697_v21  ;;  %18757 = vst [vmem:[#allocation12_spill] sm:$0xff] %v17165_v4  ;;  %v205_v36 = vrot.slane %v200_v27, %v17165_v4 }
  0x84   :  { %14749 = vmatpush1.bf16.msra.mxu0 %v16541_v31  ;;  %1613 = vmatprep.mubr.f32.mxu0 %v18731_v18 }
  0x85   :  { %14751 = vmatprep.subr.bf16.mxu0 %v16562_v38 }
  0x86   :  { %14721 = vmatpush1.bf16.msra.mxu1 %v17109_v46 }
  0x87   :  { %14723 = vmatprep.subr.bf16.mxu1 %v17117_v2 }
  0x88   :  { %14753 = vmatpush1.bf16.msra.mxu0 %v16577_v44 }
  0x89   :  { %14755 = vmatprep.subr.bf16.mxu0 %v16583_v45 }
  0x8a   :  { %14725 = vmatpush1.bf16.msra.mxu1 %v17127_v50 }
  0x8b   :  { %14727 = vmatprep.subr.bf16.mxu1 %v16487_v17 }
  0x8c   :  { %14757 = vmatpush1.bf16.msra.mxu0 %v16589_v48 }
  0x8d   :  { %1387 = vmatmul.mubr.f32.vlgmr.msra.gmra.mrb[0].mxu1 %v18731_v18  ;;  %14759 = vmatprep.subr.bf16.mxu0 %v16720_v8 }
  0x8e   :  { %14729 = vmatpush1.bf16.msra.mxu1 %v16511_v24  ;;  %1473 = vmatprep.mubr.f32.mxu1 %v18731_v18 }
  0x8f   :  { %14731 = vmatprep.subr.bf16.mxu1 %v16517_v25 }
  0x92   :  { %14733 = vmatpush1.bf16.msra.mxu1 %v16541_v31 }
  0x93   :  { %14735 = vmatprep.subr.bf16.mxu1 %v16562_v38 }
  0x96   :  { %14737 = vmatpush1.bf16.msra.mxu1 %v16577_v44 }
  0x97   :  { %14739 = vmatprep.subr.bf16.mxu1 %v16583_v45 }
  0x9a   :  { %14741 = vmatpush1.bf16.msra.mxu1 %v16589_v48 }
  0x9b   :  { %14839 = vmatprep.subr.bf16.mxu1 %v16487_v17 }
  0x9d   :  { %1475 = vmatmul.mubr.f32.vlgmr.msra.gmra.mrb[0].mxu1 %v18731_v18 }
  0x9e   :  { %14841 = vmatpush1.bf16.msra.mxu1 %v16511_v24  ;;  %2320 = vmatprep.mubr.f32.mxu1 %v18731_v18 }
  0x9f   :  { %14843 = vmatprep.subr.bf16.mxu1 %v16517_v25 }
  0xa2   :  { %14845 = vmatpush1.bf16.msra.mxu1 %v16541_v31 }
  0xa3   :  { %14847 = vmatprep.subr.bf16.mxu1 %v16562_v38 }
  0xa6   :  { %14849 = vmatpush1.bf16.msra.mxu1 %v16577_v44 }
  0xa7   :  { %14851 = vmatprep.subr.bf16.mxu1 %v16583_v45 }
  0xaa   :  { %14853 = vmatpush1.bf16.msra.mxu1 %v16589_v48 }
  0xab   :  { %14855 = vmatprep.subr.bf16.mxu1 %v16720_v8 }
 0x152   :  { %v799_v11 = vpop.f32.mrb[0].mxu0 }
 0x153   :  { %v801_v0 = vpop.f32.mrb[1].mxu0  ;;  %v17174_v1 = vadd.f32 %v799_v11, %v205_v36 }
 0x154   :  { %v17167_v22 = vadd.f32 %v801_v0, %v209_v32 }
 0x156   :  { %v806_v20 = vpop.f32.mrb[2].mxu0 }
 0x157   :  { %v17170_v52 = vadd.f32 %v806_v20, %v205_v36  ;;  %v808_v16 = vpop.f32.mrb[3].mxu0 }
 0x158   :  { %v17172_v39 = vadd.f32 %v808_v16, %v209_v32 }
 0x15a   :  { %v828_v33 = vrot.slane %v17172_v39, 6 }
 0x170   :  { %v1476_v59 = vpop.f32.mrb[0].mxu1 }
 0x171   :  { %v1481_v43 = vadd.f32 %v17174_v1, %v1476_v59  ;;  %v1478_v51 = vpop.f32.mrb[1].mxu1 }
 0x172   :  { %v1482_v57 = vadd.f32 %v1478_v51, %v828_v33 }
 0x173   :  { %v13428_v35 = vmul.f32 -1.442695, %v1481_v43  ;;  %16094 = vtanh.f32 %v1481_v43 }
 0x174   :  { %v13429_v63 = vmul.f32 -1.442695, %v1482_v57 }
 0x175   :  { %16096 = vpow2.f32 %v13428_v35 }
 0x176   :  { %16098 = vpow2.f32 %v13429_v63 }
 0x177   :  { %16100 = vtanh.f32 %v1482_v57 }
 0x17d   :  { %v16095_v49 = vpop.eup %16094 }
 0x17e   :  { %1508 = vrot.lane.b32.xlu1 %v16095_v49, %s16318_s4 }
 0x17f   :  { %v16097_v55 = vpop.eup %16096 }
 0x180   :  { %v16099_v56 = vpop.eup %16098  ;;  %v1489_v37 = vadd.f32 1.0, %v16097_v55 }
 0x181   :  { %v16101_v54 = vpop.eup %16100  ;;  %v1490_v60 = vadd.f32 1.0, %v16099_v56 }
 0x182   :  { %1512 = vrot.lane.b32.xlu1 %v16101_v54, %s16319_s24 }
 0x183   :  { %16102 = vrcp.f32 %v1490_v60  ;;  %v18758_v60 = vld [vmem:[#allocation9_spill] sm:$0xff] }
 0x184   :  { %16104 = vrcp.f32 %v1489_v37  ;;  %v18759_v37 = vld [vmem:[#allocation10_spill] sm:$0xff] }
 0x18d   :  { %v16103_v41 = vpop.eup %16102 }
 0x18e   :  { %1498 = vrot.lane.b32.xlu0 %v16103_v41, %s16320_s26  ;;  %1519 = vrot.lane.b32.xlu1 %v16103_v41, %s16318_s4  ;;  %v16105_v47 = vpop.eup %16104 }
 0x192   :  { %1503 = vrot.lane.b32.xlu0 %v16105_v47, %s16319_s24 }
 0x196   :  { %1516 = vrot.lane.b32.xlu0 %v16105_v47, %s16320_s26 }
 0x1f0   :  { %v1509_v53 = vpop.permute.xlu1 %1508 }
 0x1f4   :  { %v1513_v62 = vpop.permute.xlu1 %1512 }
 0x1f5   :  { %v1515_v32 = vsel %vm212_vm7, %v1509_v53, %v1513_v62 }
 0x200   :  { %v1499_v42 = vpop.permute.xlu0 %1498  ;;  %v1520_v59 = vpop.permute.xlu1 %1519 }
 0x201   :  { %v1501_v6 = vsel %vm212_vm7, %v16105_v47, %v1499_v42  ;;  %v1528_v42 = vrot.slane %v17172_v39, 2 }
 0x202   :  { %v1524_v0 = vmul.f32 %v1515_v32, %v1501_v6 }
 0x204   :  { %v1504_v27 = vpop.permute.xlu0 %1503 }
 0x205   :  { %v1506_v11 = vsel %vm212_vm7, %v1504_v27, %v16103_v41 }
 0x206   :  { %v1523_v36 = vmul.f32 0.0, %v1506_v11 }
 0x208   :  { %v17189_v20 = vadd.f32 %v1524_v0, %v1523_v36  ;;  %v1517_v16 = vpop.permute.xlu0 %1516 }
 0x209   :  { %v1522_v51 = vsel %vm212_vm7, %v1517_v16, %v1520_v59 }
 0x20a   :  { %16106 = vtanh.f32 %v17189_v20 }
 0x214   :  { %v16107_v43 = vpop.eup %16106 }
 0x215   :  { %v17193_v57 = vmul.f32 %v16107_v43, %v1522_v51 }
 0x217   :  { %v1531_v35 = vsel %vm830_vm8, %v17193_v57, 0 }
 0x218   :  { %v1614_v63 = vand.u32 4294901760, %v1531_v35 }
 0x21a   :  { %v1615_v49 = vsub.f32 %v1531_v35, %v1614_v63 }
 0x21c   :  { %v1616_v55 = vand.u32 4294901760, %v1615_v49 }
 0x21e   :  { %v1617_v56 = vsub.f32 %v1615_v49, %v1616_v55 }
 0x220   :  { %v1618_v54 = vand.u32 4294901760, %v1617_v56 }
 0x222   :  { %1619 = vmatmul.mubr.f32.vlgmr.msra.gmra.mrb[4].mxu0 %v1618_v54 }
 0x223   :  { %14761 = vmatpush1.bf16.msra.mxu0 %v16740_v19  ;;  %1769 = vmatprep.mubr.f32.mxu0 %v18731_v18 }
 0x224   :  { %14763 = vmatprep.subr.bf16.mxu0 %v18758_v60 }
 0x227   :  { %14765 = vmatpush1.bf16.msra.mxu0 %v18759_v37 }
 0x228   :  { %14767 = vmatprep.subr.bf16.mxu0 %v16870_v5 }
 0x22b   :  { %14769 = vmatpush1.bf16.msra.mxu0 %v16894_v15 }
 0x22c   :  { %14771 = vmatprep.subr.bf16.mxu0 %v16954_v23 }
 0x22f   :  { %14773 = vmatpush1.bf16.msra.mxu0 %v16964_v10 }
 0x230   :  { %14775 = vmatprep.subr.bf16.mxu0 %v16961_v3 }
 0x232   :  { %1771 = vmatmul.mubr.f32.vlgmr.msra.gmra.mrb[4].mxu0 %v1614_v63 }
 0x233   :  { %14777 = vmatpush1.bf16.msra.mxu0 %v16981_v30  ;;  %1873 = vmatprep.mubr.f32.mxu0 %v18731_v18 }
 0x234   :  { %14779 = vmatprep.subr.bf16.mxu0 %v16998_v34 }
 0x237   :  { %14781 = vmatpush1.bf16.msra.mxu0 %v17009_v14 }
 0x238   :  { %14783 = vmatprep.subr.bf16.mxu0 %v17016_v58 }
 0x23b   :  { %14785 = vmatpush1.bf16.msra.mxu0 %v17024_v7 }
 0x23c   :  { %14787 = vmatprep.subr.bf16.mxu0 %v17030_v12 }
 0x23f   :  { %14789 = vmatpush1.bf16.msra.mxu0 %v17037_v40 }
 0x240   :  { %14791 = vmatprep.subr.bf16.mxu0 %v16487_v17 }
 0x242   :  { %1876 = vmatmul.mubr.f32.vlgmr.msra.gmra.mrb[4].mxu0 %v1615_v49 }
 0x243   :  { %14793 = vmatpush1.bf16.msra.mxu0 %v16511_v24  ;;  %1962 = vmatprep.mubr.f32.mxu0 %v18731_v18 }
 0x244   :  { %14795 = vmatprep.subr.bf16.mxu0 %v16517_v25 }
 0x247   :  { %14797 = vmatpush1.bf16.msra.mxu0 %v16541_v31 }
 0x248   :  { %14799 = vmatprep.subr.bf16.mxu0 %v16562_v38 }
 0x24b   :  { %14801 = vmatpush1.bf16.msra.mxu0 %v16577_v44 }
 0x24c   :  { %14803 = vmatprep.subr.bf16.mxu0 %v16583_v45 }
 0x24f   :  { %14805 = vmatpush1.bf16.msra.mxu0 %v16589_v48 }
 0x250   :  { %14807 = vmatprep.subr.bf16.mxu0 %v16970_v28 }
 0x252   :  { %1966 = vmatmul.mubr.f32.vlgmr.msra.gmra.mrb[4].mxu0 %v1616_v55 }
 0x253   :  { %14809 = vmatpush1.bf16.msra.mxu0 %v16976_v26  ;;  %2084 = vmatprep.mubr.f32.mxu0 %v18731_v18 }
 0x254   :  { %14811 = vmatprep.subr.bf16.mxu0 %v16987_v29 }
 0x257   :  { %14813 = vmatpush1.bf16.msra.mxu0 %v16993_v9 }
 0x258   :  { %14815 = vmatprep.subr.bf16.mxu0 %v17099_v61 }
 0x25b   :  { %14817 = vmatpush1.bf16.msra.mxu0 %v17109_v46 }
 0x25c   :  { %14819 = vmatprep.subr.bf16.mxu0 %v17117_v2 }
 0x25f   :  { %14821 = vmatpush1.bf16.msra.mxu0 %v17127_v50 }
 0x260   :  { %14823 = vmatprep.subr.bf16.mxu0 %v16487_v17 }
 0x262   :  { %2086 = vmatmul.mubr.f32.vlgmr.msra.gmra.mrb[4].mxu0 %v1614_v63 }
 0x263   :  { %14825 = vmatpush1.bf16.msra.mxu0 %v16511_v24  ;;  %2172 = vmatprep.mubr.f32.mxu0 %v18731_v18 }
 0x264   :  { %14827 = vmatprep.subr.bf16.mxu0 %v16517_v25 }
 0x267   :  { %14829 = vmatpush1.bf16.msra.mxu0 %v16541_v31 }
 0x268   :  { %14831 = vmatprep.subr.bf16.mxu0 %v16562_v38 }
 0x26b   :  { %14833 = vmatpush1.bf16.msra.mxu0 %v16577_v44 }
 0x26c   :  { %14835 = vmatprep.subr.bf16.mxu0 %v16583_v45 }
 0x26f   :  { %14837 = vmatpush1.bf16.msra.mxu0 %v16589_v48 }
 0x270   :  { %14935 = vmatprep.subr.bf16.mxu0 %v16487_v17 }
 0x272   :  { %2174 = vmatmul.mubr.f32.vlgmr.msra.gmra.mrb[4].mxu0 %v1614_v63 }
 0x273   :  { %14937 = vmatpush1.bf16.msra.mxu0 %v16511_v24  ;;  %3027 = vmatprep.mubr.f32.mxu0 %v18731_v18 }
 0x274   :  { %14939 = vmatprep.subr.bf16.mxu0 %v16517_v25 }
 0x277   :  { %14941 = vmatpush1.bf16.msra.mxu0 %v16541_v31 }
 0x278   :  { %14943 = vmatprep.subr.bf16.mxu0 %v16562_v38 }
 0x27b   :  { %14945 = vmatpush1.bf16.msra.mxu0 %v16577_v44 }
 0x27c   :  { %14947 = vmatprep.subr.bf16.mxu0 %v16583_v45 }
 0x27f   :  { %14949 = vmatpush1.bf16.msra.mxu0 %v16589_v48 }
 0x280   :  { %14951 = vmatprep.subr.bf16.mxu0 %v16720_v8 }
 0x345   :  { %v2175_v41 = vpop.f32.mrb[4].mxu0 }
 0x346   :  { %v2182_v47 = vrot.slane %v2175_v41, 6  ;;  %v2177_v53 = vpop.f32.mrb[5].mxu0  ;;  %v2229_v41 = vrot.slane %v17189_v20, 6 }
 0x347   :  { %v2183_v62 = vrot.slane %v2177_v53, 6 }
 0x348   :  { %v2186_v6 = vadd.f32 %v17174_v1, %v2182_v47 }
 0x349   :  { %v2187_v27 = vadd.f32 %v2183_v62, %v1528_v42 }
 0x34a   :  { %v13430_v32 = vmul.f32 -1.442695, %v2186_v6 }
 0x34b   :  { %v13431_v11 = vmul.f32 -1.442695, %v2187_v27 }
 0x34c   :  { %16108 = vpow2.f32 %v13430_v32 }
 0x34d   :  { %16110 = vpow2.f32 %v13431_v11 }
 0x356   :  { %v16109_v0 = vpop.eup %16108 }
 0x357   :  { %v16111_v36 = vpop.eup %16110  ;;  %v2194_v16 = vadd.f32 1.0, %v16109_v0 }
 0x358   :  { %v2195_v59 = vadd.f32 1.0, %v16111_v36 }
 0x359   :  { %16112 = vrcp.f32 %v2194_v16 }
 0x35a   :  { %16114 = vrcp.f32 %v2195_v59 }
 0x35b   :  { %16116 = vtanh.f32 %v2187_v27 }
 0x35c   :  { %16118 = vtanh.f32 %v2186_v6 }
 0x363   :  { %v16113_v43 = vpop.eup %16112 }
 0x364   :  { %v16115_v51 = vpop.eup %16114  ;;  %2208 = vrot.lane.b32.xlu1 %v16113_v43, %s16319_s24 }
 0x365   :  { %2203 = vrot.lane.b32.xlu0 %v16115_v51, %s16320_s26  ;;  %v16117_v35 = vpop.eup %16116 }
 0x366   :  { %v16119_v63 = vpop.eup %16118 }
 0x368   :  { %2217 = vrot.lane.b32.xlu1 %v16117_v35, %s16319_s24 }
 0x369   :  { %2213 = vrot.lane.b32.xlu0 %v16119_v63, %s16318_s4 }
 0x36c   :  { %2224 = vrot.lane.b32.xlu1 %v16115_v51, %s16318_s4 }
 0x36d   :  { %2221 = vrot.lane.b32.xlu0 %v16113_v43, %s16320_s26 }
 0x3d6   :  { %v2209_v49 = vpop.permute.xlu1 %2208 }
 0x3d7   :  { %v2204_v55 = vpop.permute.xlu0 %2203  ;;  %v2211_v56 = vsel %vm212_vm7, %v2209_v49, %v16115_v51 }
 0x3d8   :  { %v2206_v53 = vsel %vm212_vm7, %v16113_v43, %v2204_v55  ;;  %v2231_v6 = vmul.f32 %v2229_v41, %v2211_v56 }
 0x3da   :  { %v2218_v54 = vpop.permute.xlu1 %2217 }
 0x3db   :  { %v2214_v47 = vpop.permute.xlu0 %2213 }
 0x3dc   :  { %v2220_v62 = vsel %vm212_vm7, %v2214_v47, %v2218_v54 }
 0x3dd   :  { %v2232_v27 = vmul.f32 %v2220_v62, %v2206_v53 }
 0x3de   :  { %v2225_v11 = vpop.permute.xlu1 %2224 }
 0x3df   :  { %v17265_v32 = vadd.f32 %v2232_v27, %v2231_v6  ;;  %v2222_v0 = vpop.permute.xlu0 %2221 }
 0x3e0   :  { %v2227_v16 = vsel %vm212_vm7, %v2222_v0, %v2225_v11 }
 0x3e1   :  { %16120 = vtanh.f32 %v17265_v32 }
 0x3eb   :  { %v16121_v36 = vpop.eup %16120 }
 0x3ec   :  { %v17269_v59 = vmul.f32 %v16121_v36, %v2227_v16 }
 0x3ee   :  { %v2237_v20 = vrot.slane %v17269_v59, 2 }
 0x3f0   :  { %v2238_v51 = vsel %vm830_vm8, %v2237_v20, 0 }
 0x3f1   :  { %v2321_v43 = vand.u32 4294901760, %v2238_v51 }
 0x3f3   :  { %v2322_v35 = vsub.f32 %v2238_v51, %v2321_v43 }
 0x3f5   :  { %v2323_v63 = vand.u32 4294901760, %v2322_v35 }
 0x3f7   :  { %v2324_v49 = vsub.f32 %v2322_v35, %v2323_v63 }
 0x3f9   :  { %v2325_v55 = vand.u32 4294901760, %v2324_v49 }
 0x3fb   :  { %2326 = vmatmul.mubr.f32.vlgmr.msra.gmra.mrb[2].mxu1 %v2325_v55 }
 0x3fc   :  { %14857 = vmatpush1.bf16.msra.mxu1 %v16740_v19  ;;  %2476 = vmatprep.mubr.f32.mxu1 %v18731_v18 }
 0x3fd   :  { %14859 = vmatprep.subr.bf16.mxu1 %v18758_v60 }
 0x400   :  { %14861 = vmatpush1.bf16.msra.mxu1 %v18759_v37 }
 0x401   :  { %14863 = vmatprep.subr.bf16.mxu1 %v16870_v5 }
 0x404   :  { %14865 = vmatpush1.bf16.msra.mxu1 %v16894_v15 }
 0x405   :  { %14867 = vmatprep.subr.bf16.mxu1 %v16954_v23 }
 0x408   :  { %14869 = vmatpush1.bf16.msra.mxu1 %v16964_v10 }
 0x409   :  { %14871 = vmatprep.subr.bf16.mxu1 %v16961_v3 }
 0x40b   :  { %2478 = vmatmul.mubr.f32.vlgmr.msra.gmra.mrb[2].mxu1 %v2321_v43 }
 0x40c   :  { %14873 = vmatpush1.bf16.msra.mxu1 %v16981_v30  ;;  %2580 = vmatprep.mubr.f32.mxu1 %v18731_v18 }
 0x40d   :  { %14875 = vmatprep.subr.bf16.mxu1 %v16998_v34 }
 0x410   :  { %14877 = vmatpush1.bf16.msra.mxu1 %v17009_v14 }
 0x411   :  { %14879 = vmatprep.subr.bf16.mxu1 %v17016_v58 }
 0x414   :  { %14881 = vmatpush1.bf16.msra.mxu1 %v17024_v7 }
 0x415   :  { %14883 = vmatprep.subr.bf16.mxu1 %v17030_v12 }
 0x418   :  { %14885 = vmatpush1.bf16.msra.mxu1 %v17037_v40 }
 0x419   :  { %14887 = vmatprep.subr.bf16.mxu1 %v16487_v17 }
 0x41b   :  { %2583 = vmatmul.mubr.f32.vlgmr.msra.gmra.mrb[2].mxu1 %v2322_v35 }
 0x41c   :  { %14889 = vmatpush1.bf16.msra.mxu1 %v16511_v24  ;;  %2669 = vmatprep.mubr.f32.mxu1 %v18731_v18 }
 0x41d   :  { %14891 = vmatprep.subr.bf16.mxu1 %v16517_v25 }
 0x420   :  { %14893 = vmatpush1.bf16.msra.mxu1 %v16541_v31 }
 0x421   :  { %14895 = vmatprep.subr.bf16.mxu1 %v16562_v38 }
 0x424   :  { %14897 = vmatpush1.bf16.msra.mxu1 %v16577_v44 }
 0x425   :  { %14899 = vmatprep.subr.bf16.mxu1 %v16583_v45 }
 0x428   :  { %14901 = vmatpush1.bf16.msra.mxu1 %v16589_v48 }
 0x429   :  { %14903 = vmatprep.subr.bf16.mxu1 %v16970_v28 }
 0x42b   :  { %2673 = vmatmul.mubr.f32.vlgmr.msra.gmra.mrb[2].mxu1 %v2323_v63 }
 0x42c   :  { %14905 = vmatpush1.bf16.msra.mxu1 %v16976_v26  ;;  %2791 = vmatprep.mubr.f32.mxu1 %v18731_v18 }
 0x42d   :  { %14907 = vmatprep.subr.bf16.mxu1 %v16987_v29 }
 0x430   :  { %14909 = vmatpush1.bf16.msra.mxu1 %v16993_v9 }
 0x431   :  { %14911 = vmatprep.subr.bf16.mxu1 %v17099_v61 }
 0x434   :  { %14913 = vmatpush1.bf16.msra.mxu1 %v17109_v46 }
 0x435   :  { %14915 = vmatprep.subr.bf16.mxu1 %v17117_v2 }
 0x438   :  { %14917 = vmatpush1.bf16.msra.mxu1 %v17127_v50 }
 0x439   :  { %14919 = vmatprep.subr.bf16.mxu1 %v16487_v17 }
 0x43b   :  { %2793 = vmatmul.mubr.f32.vlgmr.msra.gmra.mrb[2].mxu1 %v2321_v43 }
 0x43c   :  { %14921 = vmatpush1.bf16.msra.mxu1 %v16511_v24  ;;  %2879 = vmatprep.mubr.f32.mxu1 %v18731_v18 }
 0x43d   :  { %14923 = vmatprep.subr.bf16.mxu1 %v16517_v25 }
 0x440   :  { %14925 = vmatpush1.bf16.msra.mxu1 %v16541_v31 }
 0x441   :  { %14927 = vmatprep.subr.bf16.mxu1 %v16562_v38 }
 0x444   :  { %14929 = vmatpush1.bf16.msra.mxu1 %v16577_v44 }
 0x445   :  { %14931 = vmatprep.subr.bf16.mxu1 %v16583_v45 }
 0x448   :  { %14933 = vmatpush1.bf16.msra.mxu1 %v16589_v48 }
 0x449   :  { %15031 = vmatprep.subr.bf16.mxu1 %v16487_v17 }
 0x44b   :  { %2881 = vmatmul.mubr.f32.vlgmr.msra.gmra.mrb[2].mxu1 %v2321_v43 }
 0x44c   :  { %15033 = vmatpush1.bf16.msra.mxu1 %v16511_v24  ;;  %3737 = vmatprep.mubr.f32.mxu1 %v18731_v18 }
 0x44d   :  { %15035 = vmatprep.subr.bf16.mxu1 %v16517_v25 }
 0x450   :  { %15037 = vmatpush1.bf16.msra.mxu1 %v16541_v31 }
 0x451   :  { %15039 = vmatprep.subr.bf16.mxu1 %v16562_v38 }
 0x454   :  { %15041 = vmatpush1.bf16.msra.mxu1 %v16577_v44 }
 0x455   :  { %15043 = vmatprep.subr.bf16.mxu1 %v16583_v45 }
 0x458   :  { %15045 = vmatpush1.bf16.msra.mxu1 %v16589_v48 }
 0x459   :  { %15047 = vmatprep.subr.bf16.mxu1 %v16720_v8 }
 0x51e   :  { %v2882_v56 = vpop.f32.mrb[2].mxu1 }
 0x51f   :  { %v2889_v54 = vrot.slane %v2882_v56, 4  ;;  %v2884_v41 = vpop.f32.mrb[3].mxu1  ;;  %v2936_v56 = vrot.slane %v17265_v32, 6 }
 0x520   :  { %v2890_v47 = vrot.slane %v2884_v41, 4 }
 0x521   :  { %v2893_v53 = vadd.f32 %v17174_v1, %v2889_v54 }
 0x522   :  { %v2894_v62 = vadd.f32 %v2890_v47, %v828_v33 }
 0x523   :  { %v13432_v6 = vmul.f32 -1.442695, %v2893_v53 }
 0x524   :  { %v13433_v27 = vmul.f32 -1.442695, %v2894_v62 }
 0x525   :  { %16122 = vpow2.f32 %v13432_v6 }
 0x526   :  { %16124 = vpow2.f32 %v13433_v27 }
 0x52f   :  { %v16123_v11 = vpop.eup %16122 }
 0x530   :  { %v16125_v0 = vpop.eup %16124  ;;  %v2901_v36 = vadd.f32 1.0, %v16123_v11 }
 0x531   :  { %v2902_v16 = vadd.f32 1.0, %v16125_v0 }
 0x532   :  { %16126 = vrcp.f32 %v2901_v36 }
 0x533   :  { %16128 = vrcp.f32 %v2902_v16 }
 0x534   :  { %16130 = vtanh.f32 %v2894_v62 }
 0x535   :  { %16132 = vtanh.f32 %v2893_v53 }
 0x53c   :  { %v16127_v20 = vpop.eup %16126 }
 0x53d   :  { %v16129_v51 = vpop.eup %16128  ;;  %2915 = vrot.lane.b32.xlu1 %v16127_v20, %s16319_s24 }
 0x53e   :  { %2910 = vrot.lane.b32.xlu0 %v16129_v51, %s16320_s26  ;;  %v16131_v43 = vpop.eup %16130 }
 0x53f   :  { %v16133_v33 = vpop.eup %16132 }
 0x541   :  { %2924 = vrot.lane.b32.xlu1 %v16131_v43, %s16319_s24 }
 0x542   :  { %2920 = vrot.lane.b32.xlu0 %v16133_v33, %s16318_s4 }
 0x545   :  { %2931 = vrot.lane.b32.xlu1 %v16129_v51, %s16318_s4 }
 0x546   :  { %2928 = vrot.lane.b32.xlu0 %v16127_v20, %s16320_s26 }
 0x5af   :  { %v2916_v35 = vpop.permute.xlu1 %2915 }
 0x5b0   :  { %v2911_v63 = vpop.permute.xlu0 %2910  ;;  %v2918_v49 = vsel %vm212_vm7, %v2916_v35, %v16129_v51 }
 0x5b1   :  { %v2913_v41 = vsel %vm212_vm7, %v16127_v20, %v2911_v63  ;;  %v2938_v53 = vmul.f32 %v2936_v56, %v2918_v49 }
 0x5b3   :  { %v2925_v55 = vpop.permute.xlu1 %2924 }
 0x5b4   :  { %v2921_v54 = vpop.permute.xlu0 %2920 }
 0x5b5   :  { %v2927_v47 = vsel %vm212_vm7, %v2921_v54, %v2925_v55 }
 0x5b6   :  { %v2939_v62 = vmul.f32 %v2927_v47, %v2913_v41 }
 0x5b7   :  { %v2932_v27 = vpop.permute.xlu1 %2931 }
 0x5b8   :  { %v17340_v6 = vadd.f32 %v2939_v62, %v2938_v53  ;;  %v2929_v11 = vpop.permute.xlu0 %2928 }
 0x5b9   :  { %v2934_v36 = vsel %vm212_vm7, %v2929_v11, %v2932_v27 }
 0x5ba   :  { %16134 = vtanh.f32 %v17340_v6 }
 0x5c4   :  { %v16135_v0 = vpop.eup %16134 }
 0x5c5   :  { %v17344_v16 = vmul.f32 %v16135_v0, %v2934_v36 }
 0x5c7   :  { %v2944_v32 = vrot.slane %v17344_v16, 4 }
 0x5c9   :  { %v2945_v51 = vsel %vm830_vm8, %v2944_v32, 0 }
 0x5ca   :  { %v3028_v20 = vand.u32 4294901760, %v2945_v51 }
 0x5cc   :  { %v3029_v43 = vsub.f32 %v2945_v51, %v3028_v20 }
 0x5ce   :  { %v3030_v33 = vand.u32 4294901760, %v3029_v43 }
 0x5d0   :  { %v3031_v35 = vsub.f32 %v3029_v43, %v3030_v33 }
 0x5d2   :  { %v3032_v63 = vand.u32 4294901760, %v3031_v35  ;;  %v3643_v35 = vrot.slane %v17340_v6, 6 }
 0x5d4   :  { %3033 = vmatmul.mubr.f32.vlgmr.msra.gmra.mrb[6].mxu0 %v3032_v63 }
 0x5d5   :  { %14953 = vmatpush1.bf16.msra.mxu0 %v16740_v19  ;;  %3183 = vmatprep.mubr.f32.mxu0 %v18731_v18 }
 0x5d6   :  { %14955 = vmatprep.subr.bf16.mxu0 %v18758_v60 }
 0x5d9   :  { %14957 = vmatpush1.bf16.msra.mxu0 %v18759_v37 }
 0x5da   :  { %14959 = vmatprep.subr.bf16.mxu0 %v16870_v5 }
 0x5dd   :  { %14961 = vmatpush1.bf16.msra.mxu0 %v16894_v15 }
 0x5de   :  { %14963 = vmatprep.subr.bf16.mxu0 %v16954_v23 }
 0x5e1   :  { %14965 = vmatpush1.bf16.msra.mxu0 %v16964_v10 }
 0x5e2   :  { %14967 = vmatprep.subr.bf16.mxu0 %v16961_v3 }
 0x5e4   :  { %3185 = vmatmul.mubr.f32.vlgmr.msra.gmra.mrb[6].mxu0 %v3028_v20 }
 0x5e5   :  { %14969 = vmatpush1.bf16.msra.mxu0 %v16981_v30  ;;  %3287 = vmatprep.mubr.f32.mxu0 %v18731_v18 }
 0x5e6   :  { %14971 = vmatprep.subr.bf16.mxu0 %v16998_v34 }
 0x5e9   :  { %14973 = vmatpush1.bf16.msra.mxu0 %v17009_v14 }
 0x5ea   :  { %14975 = vmatprep.subr.bf16.mxu0 %v17016_v58 }
 0x5ed   :  { %14977 = vmatpush1.bf16.msra.mxu0 %v17024_v7 }
 0x5ee   :  { %14979 = vmatprep.subr.bf16.mxu0 %v17030_v12 }
 0x5f1   :  { %14981 = vmatpush1.bf16.msra.mxu0 %v17037_v40 }
 0x5f2   :  { %14983 = vmatprep.subr.bf16.mxu0 %v16487_v17 }
 0x5f4   :  { %3290 = vmatmul.mubr.f32.vlgmr.msra.gmra.mrb[6].mxu0 %v3029_v43 }
 0x5f5   :  { %14985 = vmatpush1.bf16.msra.mxu0 %v16511_v24  ;;  %3376 = vmatprep.mubr.f32.mxu0 %v18731_v18 }
 0x5f6   :  { %14987 = vmatprep.subr.bf16.mxu0 %v16517_v25 }
 0x5f9   :  { %14989 = vmatpush1.bf16.msra.mxu0 %v16541_v31 }
 0x5fa   :  { %14991 = vmatprep.subr.bf16.mxu0 %v16562_v38 }
 0x5fd   :  { %14993 = vmatpush1.bf16.msra.mxu0 %v16577_v44 }
 0x5fe   :  { %14995 = vmatprep.subr.bf16.mxu0 %v16583_v45 }
 0x601   :  { %14997 = vmatpush1.bf16.msra.mxu0 %v16589_v48 }
 0x602   :  { %14999 = vmatprep.subr.bf16.mxu0 %v16970_v28 }
 0x604   :  { %3380 = vmatmul.mubr.f32.vlgmr.msra.gmra.mrb[6].mxu0 %v3030_v33 }
 0x605   :  { %15001 = vmatpush1.bf16.msra.mxu0 %v16976_v26  ;;  %3498 = vmatprep.mubr.f32.mxu0 %v18731_v18 }
 0x606   :  { %15003 = vmatprep.subr.bf16.mxu0 %v16987_v29 }
 0x609   :  { %15005 = vmatpush1.bf16.msra.mxu0 %v16993_v9 }
 0x60a   :  { %15007 = vmatprep.subr.bf16.mxu0 %v17099_v61 }
 0x60d   :  { %15009 = vmatpush1.bf16.msra.mxu0 %v17109_v46 }
 0x60e   :  { %15011 = vmatprep.subr.bf16.mxu0 %v17117_v2 }
 0x611   :  { %15013 = vmatpush1.bf16.msra.mxu0 %v17127_v50 }
 0x612   :  { %15015 = vmatprep.subr.bf16.mxu0 %v16487_v17 }
 0x614   :  { %3500 = vmatmul.mubr.f32.vlgmr.msra.gmra.mrb[6].mxu0 %v3028_v20 }
 0x615   :  { %15017 = vmatpush1.bf16.msra.mxu0 %v16511_v24  ;;  %3586 = vmatprep.mubr.f32.mxu0 %v18731_v18 }
 0x616   :  { %15019 = vmatprep.subr.bf16.mxu0 %v16517_v25 }
 0x619   :  { %15021 = vmatpush1.bf16.msra.mxu0 %v16541_v31 }
 0x61a   :  { %15023 = vmatprep.subr.bf16.mxu0 %v16562_v38 }
 0x61d   :  { %15025 = vmatpush1.bf16.msra.mxu0 %v16577_v44 }
 0x61e   :  { %15027 = vmatprep.subr.bf16.mxu0 %v16583_v45 }
 0x621   :  { %15029 = vmatpush1.bf16.msra.mxu0 %v16589_v48 }
 0x622   :  { %15127 = vmatprep.subr.bf16.mxu0 %v16487_v17 }
 0x624   :  { %3588 = vmatmul.mubr.f32.vlgmr.msra.gmra.mrb[6].mxu0 %v3028_v20 }
 0x625   :  { %15129 = vmatpush1.bf16.msra.mxu0 %v16511_v24  ;;  %4439 = vmatprep.mubr.f32.mxu0 %v18731_v18 }
 0x626   :  { %15131 = vmatprep.subr.bf16.mxu0 %v16517_v25 }
 0x629   :  { %15133 = vmatpush1.bf16.msra.mxu0 %v16541_v31 }
 0x62a   :  { %15135 = vmatprep.subr.bf16.mxu0 %v16562_v38 }
 0x62d   :  { %15137 = vmatpush1.bf16.msra.mxu0 %v16577_v44 }
 0x62e   :  { %15139 = vmatprep.subr.bf16.mxu0 %v16583_v45 }
 0x631   :  { %15141 = vmatpush1.bf16.msra.mxu0 %v16589_v48 }
 0x632   :  { %15143 = vmatprep.subr.bf16.mxu0 %v16720_v8 }
 0x6f7   :  { %v3589_v49 = vpop.f32.mrb[6].mxu0 }
 0x6f8   :  { %v3596_v55 = vrot.slane %v3589_v49, 2  ;;  %v3591_v56 = vpop.f32.mrb[7].mxu0 }
 0x6f9   :  { %v3597_v54 = vrot.slane %v3591_v56, 2 }
 0x6fa   :  { %v3600_v41 = vadd.f32 %v17174_v1, %v3596_v55 }
 0x6fb   :  { %v3601_v47 = vadd.f32 %v3597_v54, %v1528_v42 }
 0x6fc   :  { %v13434_v53 = vmul.f32 -1.442695, %v3600_v41 }
 0x6fd   :  { %v13435_v62 = vmul.f32 -1.442695, %v3601_v47 }
 0x6fe   :  { %16136 = vpow2.f32 %v13434_v53 }
 0x6ff   :  { %16138 = vpow2.f32 %v13435_v62 }
 0x708   :  { %v16137_v27 = vpop.eup %16136 }
 0x709   :  { %v16139_v11 = vpop.eup %16138  ;;  %v3608_v0 = vadd.f32 1.0, %v16137_v27 }
 0x70a   :  { %v3609_v36 = vadd.f32 1.0, %v16139_v11 }
 0x70b   :  { %16140 = vrcp.f32 %v3608_v0 }
 0x70c   :  { %16142 = vrcp.f32 %v3609_v36 }
 0x70d   :  { %16144 = vtanh.f32 %v3601_v47 }
 0x70e   :  { %16146 = vtanh.f32 %v3600_v41 }
 0x715   :  { %v16141_v32 = vpop.eup %16140 }
 0x716   :  { %v16143_v51 = vpop.eup %16142  ;;  %3622 = vrot.lane.b32.xlu1 %v16141_v32, %s16319_s24 }
 0x717   :  { %3617 = vrot.lane.b32.xlu0 %v16143_v51, %s16320_s26  ;;  %v16145_v39 = vpop.eup %16144 }
 0x718   :  { %v16147_v1 = vpop.eup %16146 }
 0x71a   :  { %3631 = vrot.lane.b32.xlu1 %v16145_v39, %s16319_s24 }
 0x71b   :  { %3627 = vrot.lane.b32.xlu0 %v16147_v1, %s16318_s4 }
 0x71e   :  { %3638 = vrot.lane.b32.xlu1 %v16143_v51, %s16318_s4 }
 0x71f   :  { %3635 = vrot.lane.b32.xlu0 %v16141_v32, %s16320_s26 }
 0x788   :  { %v3623_v42 = vpop.permute.xlu1 %3622 }
 0x789   :  { %v3618_v20 = vpop.permute.xlu0 %3617  ;;  %v3625_v43 = vsel %vm212_vm7, %v3623_v42, %v16143_v51 }
 0x78a   :  { %v3620_v49 = vsel %vm212_vm7, %v16141_v32, %v3618_v20  ;;  %v3645_v56 = vmul.f32 %v3643_v35, %v3625_v43  ;;  %v3651_v20 = vrot.slane %v17167_v22, 6 }
 0x78c   :  { %v3632_v33 = vpop.permute.xlu1 %3631 }
 0x78d   :  { %v3628_v63 = vpop.permute.xlu0 %3627 }
 0x78e   :  { %v3634_v55 = vsel %vm212_vm7, %v3628_v63, %v3632_v33 }
 0x78f   :  { %v3646_v54 = vmul.f32 %v3634_v55, %v3620_v49 }
 0x790   :  { %v3639_v47 = vpop.permute.xlu1 %3638 }
 0x791   :  { %v17415_v41 = vadd.f32 %v3646_v54, %v3645_v56  ;;  %v3636_v53 = vpop.permute.xlu0 %3635 }
 0x792   :  { %v3641_v27 = vsel %vm212_vm7, %v3636_v53, %v3639_v47 }
 0x793   :  { %16148 = vtanh.f32 %v17415_v41 }
 0x79d   :  { %v16149_v62 = vpop.eup %16148 }
 0x79e   :  { %v17419_v11 = vmul.f32 %v16149_v62, %v3641_v27 }
 0x7a0   :  { %v18698_v6 = vrot.slane %v17419_v11, 6 }
 0x7a2   :  { %v3655_v0 = vsel %vm830_vm8, %v18698_v6, 0 }
 0x7a3   :  { %v3738_v36 = vand.u32 4294901760, %v3655_v0 }
 0x7a5   :  { %v3739_v32 = vsub.f32 %v3655_v0, %v3738_v36 }
 0x7a7   :  { %v3740_v51 = vand.u32 4294901760, %v3739_v32 }
 0x7a9   :  { %v3741_v39 = vsub.f32 %v3739_v32, %v3740_v51 }
 0x7ab   :  { %v3742_v1 = vand.u32 4294901760, %v3741_v39 }
 0x7ad   :  { %3743 = vmatmul.mubr.f32.vlgmr.msra.gmra.mrb[4].mxu1 %v3742_v1  ;;  %v4347_v1 = vrot.slane %v17415_v41, 6 }
 0x7ae   :  { %15049 = vmatpush1.bf16.msra.mxu1 %v16740_v19  ;;  %3893 = vmatprep.mubr.f32.mxu1 %v18731_v18 }
 0x7af   :  { %15051 = vmatprep.subr.bf16.mxu1 %v18758_v60 }
 0x7b2   :  { %15053 = vmatpush1.bf16.msra.mxu1 %v18759_v37 }
 0x7b3   :  { %15055 = vmatprep.subr.bf16.mxu1 %v16870_v5 }
 0x7b6   :  { %15057 = vmatpush1.bf16.msra.mxu1 %v16894_v15 }
 0x7b7   :  { %15059 = vmatprep.subr.bf16.mxu1 %v16954_v23 }
 0x7ba   :  { %15061 = vmatpush1.bf16.msra.mxu1 %v16964_v10 }
 0x7bb   :  { %15063 = vmatprep.subr.bf16.mxu1 %v16961_v3 }
 0x7bd   :  { %3895 = vmatmul.mubr.f32.vlgmr.msra.gmra.mrb[4].mxu1 %v3738_v36 }
 0x7be   :  { %15065 = vmatpush1.bf16.msra.mxu1 %v16981_v30  ;;  %3997 = vmatprep.mubr.f32.mxu1 %v18731_v18 }
 0x7bf   :  { %15067 = vmatprep.subr.bf16.mxu1 %v16998_v34 }
 0x7c2   :  { %15069 = vmatpush1.bf16.msra.mxu1 %v17009_v14 }
 0x7c3   :  { %15071 = vmatprep.subr.bf16.mxu1 %v17016_v58 }
 0x7c6   :  { %15073 = vmatpush1.bf16.msra.mxu1 %v17024_v7 }
 0x7c7   :  { %15075 = vmatprep.subr.bf16.mxu1 %v17030_v12 }
 0x7ca   :  { %15077 = vmatpush1.bf16.msra.mxu1 %v17037_v40 }
 0x7cb   :  { %15079 = vmatprep.subr.bf16.mxu1 %v16487_v17 }
 0x7cd   :  { %4000 = vmatmul.mubr.f32.vlgmr.msra.gmra.mrb[4].mxu1 %v3739_v32 }
 0x7ce   :  { %15081 = vmatpush1.bf16.msra.mxu1 %v16511_v24  ;;  %4086 = vmatprep.mubr.f32.mxu1 %v18731_v18 }
 0x7cf   :  { %15083 = vmatprep.subr.bf16.mxu1 %v16517_v25 }
 0x7d2   :  { %15085 = vmatpush1.bf16.msra.mxu1 %v16541_v31 }
 0x7d3   :  { %15087 = vmatprep.subr.bf16.mxu1 %v16562_v38 }
 0x7d6   :  { %15089 = vmatpush1.bf16.msra.mxu1 %v16577_v44 }
 0x7d7   :  { %15091 = vmatprep.subr.bf16.mxu1 %v16583_v45 }
 0x7da   :  { %15093 = vmatpush1.bf16.msra.mxu1 %v16589_v48 }
 0x7db   :  { %15095 = vmatprep.subr.bf16.mxu1 %v16970_v28 }
 0x7dd   :  { %4090 = vmatmul.mubr.f32.vlgmr.msra.gmra.mrb[4].mxu1 %v3740_v51 }
 0x7de   :  { %15097 = vmatpush1.bf16.msra.mxu1 %v16976_v26  ;;  %4208 = vmatprep.mubr.f32.mxu1 %v18731_v18 }
 0x7df   :  { %15099 = vmatprep.subr.bf16.mxu1 %v16987_v29 }
 0x7e2   :  { %15101 = vmatpush1.bf16.msra.mxu1 %v16993_v9 }
 0x7e3   :  { %15103 = vmatprep.subr.bf16.mxu1 %v17099_v61 }
 0x7e6   :  { %15105 = vmatpush1.bf16.msra.mxu1 %v17109_v46 }
 0x7e7   :  { %15107 = vmatprep.subr.bf16.mxu1 %v17117_v2 }
 0x7ea   :  { %15109 = vmatpush1.bf16.msra.mxu1 %v17127_v50 }
 0x7eb   :  { %15111 = vmatprep.subr.bf16.mxu1 %v16487_v17 }
 0x7ed   :  { %4210 = vmatmul.mubr.f32.vlgmr.msra.gmra.mrb[4].mxu1 %v3738_v36 }
 0x7ee   :  { %15113 = vmatpush1.bf16.msra.mxu1 %v16511_v24  ;;  %4296 = vmatprep.mubr.f32.mxu1 %v18731_v18 }
 0x7ef   :  { %15115 = vmatprep.subr.bf16.mxu1 %v16517_v25 }
 0x7f2   :  { %15117 = vmatpush1.bf16.msra.mxu1 %v16541_v31 }
 0x7f3   :  { %15119 = vmatprep.subr.bf16.mxu1 %v16562_v38 }
 0x7f6   :  { %15121 = vmatpush1.bf16.msra.mxu1 %v16577_v44 }
 0x7f7   :  { %15123 = vmatprep.subr.bf16.mxu1 %v16583_v45 }
 0x7fa   :  { %15125 = vmatpush1.bf16.msra.mxu1 %v16589_v48 }
 0x7fb   :  { %15223 = vmatprep.subr.bf16.mxu1 %v16487_v17 }
 0x7fd   :  { %4298 = vmatmul.mubr.f32.vlgmr.msra.gmra.mrb[4].mxu1 %v3738_v36 }
 0x7fe   :  { %15225 = vmatpush1.bf16.msra.mxu1 %v16511_v24  ;;  %5146 = vmatprep.mubr.f32.mxu1 %v18731_v18 }
 0x7ff   :  { %15227 = vmatprep.subr.bf16.mxu1 %v16517_v25 }
 0x802   :  { %15229 = vmatpush1.bf16.msra.mxu1 %v16541_v31 }
 0x803   :  { %15231 = vmatprep.subr.bf16.mxu1 %v16562_v38 }
 0x806   :  { %15233 = vmatpush1.bf16.msra.mxu1 %v16577_v44 }
 0x807   :  { %15235 = vmatprep.subr.bf16.mxu1 %v16583_v45 }
 0x80a   :  { %15237 = vmatpush1.bf16.msra.mxu1 %v16589_v48 }
 0x80b   :  { %15239 = vmatprep.subr.bf16.mxu1 %v16720_v8 }
 0x8d0   :  { %v4299_v42 = vpop.f32.mrb[4].mxu1 }
 0x8d1   :  { %v4304_v43 = vadd.f32 %v17170_v52, %v4299_v42  ;;  %v4301_v33 = vpop.f32.mrb[5].mxu1 }
 0x8d2   :  { %v4305_v35 = vadd.f32 %v4301_v33, %v3651_v20 }
 0x8d3   :  { %v13436_v63 = vmul.f32 -1.442695, %v4304_v43 }
 0x8d4   :  { %v13437_v49 = vmul.f32 -1.442695, %v4305_v35 }
 0x8d5   :  { %16150 = vpow2.f32 %v13436_v63 }
 0x8d6   :  { %16152 = vpow2.f32 %v13437_v49 }
 0x8df   :  { %v16151_v55 = vpop.eup %16150 }
 0x8e0   :  { %v16153_v56 = vpop.eup %16152  ;;  %v4312_v54 = vadd.f32 1.0, %v16151_v55 }
 0x8e1   :  { %v4313_v47 = vadd.f32 1.0, %v16153_v56 }
 0x8e2   :  { %16154 = vrcp.f32 %v4312_v54 }
 0x8e3   :  { %16156 = vrcp.f32 %v4313_v47 }
 0x8e4   :  { %16158 = vtanh.f32 %v4305_v35 }
 0x8e5   :  { %16160 = vtanh.f32 %v4304_v43 }
 0x8ec   :  { %v16155_v53 = vpop.eup %16154 }
 0x8ed   :  { %v16157_v62 = vpop.eup %16156  ;;  %4326 = vrot.lane.b32.xlu1 %v16155_v53, %s16319_s24 }
 0x8ee   :  { %4321 = vrot.lane.b32.xlu0 %v16157_v62, %s16320_s26  ;;  %v16159_v27 = vpop.eup %16158 }
 0x8ef   :  { %v16161_v0 = vpop.eup %16160 }
 0x8f1   :  { %4335 = vrot.lane.b32.xlu1 %v16159_v27, %s16319_s24 }
 0x8f2   :  { %4331 = vrot.lane.b32.xlu0 %v16161_v0, %s16318_s4 }
 0x8f5   :  { %4342 = vrot.lane.b32.xlu1 %v16157_v62, %s16318_s4 }
 0x8f6   :  { %4339 = vrot.lane.b32.xlu0 %v16155_v53, %s16320_s26 }
 0x95f   :  { %v4327_v36 = vpop.permute.xlu1 %4326 }
 0x960   :  { %v4322_v32 = vpop.permute.xlu0 %4321  ;;  %v4329_v51 = vsel %vm212_vm7, %v4327_v36, %v16157_v62 }
 0x961   :  { %v4324_v43 = vsel %vm212_vm7, %v16155_v53, %v4322_v32  ;;  %v4349_v35 = vmul.f32 %v4347_v1, %v4329_v51 }
 0x963   :  { %v4336_v39 = vpop.permute.xlu1 %4335 }
 0x964   :  { %v4332_v42 = vpop.permute.xlu0 %4331 }
 0x965   :  { %v4338_v33 = vsel %vm212_vm7, %v4332_v42, %v4336_v39  ;;  %v4354_v42 = vrot.slane %v17167_v22, 2 }
 0x966   :  { %v4350_v63 = vmul.f32 %v4338_v33, %v4324_v43 }
 0x967   :  { %v4343_v55 = vpop.permute.xlu1 %4342 }
 0x968   :  { %v17493_v49 = vadd.f32 %v4350_v63, %v4349_v35  ;;  %v4340_v56 = vpop.permute.xlu0 %4339 }
 0x969   :  { %v4345_v47 = vsel %vm212_vm7, %v4340_v56, %v4343_v55 }
 0x96a   :  { %16162 = vtanh.f32 %v17493_v49 }
 0x974   :  { %v16163_v54 = vpop.eup %16162 }
 0x975   :  { %v17497_v62 = vmul.f32 %v16163_v54, %v4345_v47 }
 0x977   :  { %v4357_v41 = vsel %vm830_vm8, %v17497_v62, 0 }
 0x978   :  { %v4440_v27 = vand.u32 4294901760, %v4357_v41 }
 0x97a   :  { %v4441_v53 = vsub.f32 %v4357_v41, %v4440_v27 }
 0x97c   :  { %v4442_v0 = vand.u32 4294901760, %v4441_v53 }
 0x97e   :  { %v4443_v36 = vsub.f32 %v4441_v53, %v4442_v0 }
 0x980   :  { %v4444_v32 = vand.u32 4294901760, %v4443_v36 }
 0x982   :  { %4445 = vmatmul.mubr.f32.vlgmr.msra.gmra.mrb[8].mxu0 %v4444_v32 }
 0x983   :  { %15145 = vmatpush1.bf16.msra.mxu0 %v16740_v19  ;;  %4595 = vmatprep.mubr.f32.mxu0 %v18731_v18 }
 0x984   :  { %15147 = vmatprep.subr.bf16.mxu0 %v18758_v60 }
 0x987   :  { %15149 = vmatpush1.bf16.msra.mxu0 %v18759_v37 }
 0x988   :  { %15151 = vmatprep.subr.bf16.mxu0 %v16870_v5 }
 0x98b   :  { %15153 = vmatpush1.bf16.msra.mxu0 %v16894_v15 }
 0x98c   :  { %15155 = vmatprep.subr.bf16.mxu0 %v16954_v23 }
 0x98f   :  { %15157 = vmatpush1.bf16.msra.mxu0 %v16964_v10 }
 0x990   :  { %15159 = vmatprep.subr.bf16.mxu0 %v16961_v3 }
 0x992   :  { %4597 = vmatmul.mubr.f32.vlgmr.msra.gmra.mrb[8].mxu0 %v4440_v27 }
 0x993   :  { %15161 = vmatpush1.bf16.msra.mxu0 %v16981_v30  ;;  %4699 = vmatprep.mubr.f32.mxu0 %v18731_v18 }
 0x994   :  { %15163 = vmatprep.subr.bf16.mxu0 %v16998_v34 }
 0x997   :  { %15165 = vmatpush1.bf16.msra.mxu0 %v17009_v14 }
 0x998   :  { %15167 = vmatprep.subr.bf16.mxu0 %v17016_v58 }
 0x99b   :  { %15169 = vmatpush1.bf16.msra.mxu0 %v17024_v7 }
 0x99c   :  { %15171 = vmatprep.subr.bf16.mxu0 %v17030_v12 }
 0x99f   :  { %15173 = vmatpush1.bf16.msra.mxu0 %v17037_v40 }
 0x9a0   :  { %15175 = vmatprep.subr.bf16.mxu0 %v16487_v17 }
 0x9a2   :  { %4702 = vmatmul.mubr.f32.vlgmr.msra.gmra.mrb[8].mxu0 %v4441_v53 }
 0x9a3   :  { %15177 = vmatpush1.bf16.msra.mxu0 %v16511_v24  ;;  %4788 = vmatprep.mubr.f32.mxu0 %v18731_v18 }
 0x9a4   :  { %15179 = vmatprep.subr.bf16.mxu0 %v16517_v25 }
 0x9a7   :  { %15181 = vmatpush1.bf16.msra.mxu0 %v16541_v31 }
 0x9a8   :  { %15183 = vmatprep.subr.bf16.mxu0 %v16562_v38 }
 0x9ab   :  { %15185 = vmatpush1.bf16.msra.mxu0 %v16577_v44 }
 0x9ac   :  { %15187 = vmatprep.subr.bf16.mxu0 %v16583_v45 }
 0x9af   :  { %15189 = vmatpush1.bf16.msra.mxu0 %v16589_v48 }
 0x9b0   :  { %15191 = vmatprep.subr.bf16.mxu0 %v16970_v28 }
 0x9b2   :  { %4792 = vmatmul.mubr.f32.vlgmr.msra.gmra.mrb[8].mxu0 %v4442_v0 }
 0x9b3   :  { %15193 = vmatpush1.bf16.msra.mxu0 %v16976_v26  ;;  %4910 = vmatprep.mubr.f32.mxu0 %v18731_v18 }
 0x9b4   :  { %15195 = vmatprep.subr.bf16.mxu0 %v16987_v29 }
 0x9b7   :  { %15197 = vmatpush1.bf16.msra.mxu0 %v16993_v9 }
 0x9b8   :  { %15199 = vmatprep.subr.bf16.mxu0 %v17099_v61 }
 0x9bb   :  { %15201 = vmatpush1.bf16.msra.mxu0 %v17109_v46 }
 0x9bc   :  { %15203 = vmatprep.subr.bf16.mxu0 %v17117_v2 }
 0x9bf   :  { %15205 = vmatpush1.bf16.msra.mxu0 %v17127_v50 }
 0x9c0   :  { %15207 = vmatprep.subr.bf16.mxu0 %v16487_v17 }
 0x9c2   :  { %4912 = vmatmul.mubr.f32.vlgmr.msra.gmra.mrb[8].mxu0 %v4440_v27 }
 0x9c3   :  { %15209 = vmatpush1.bf16.msra.mxu0 %v16511_v24  ;;  %4998 = vmatprep.mubr.f32.mxu0 %v18731_v18 }
 0x9c4   :  { %15211 = vmatprep.subr.bf16.mxu0 %v16517_v25 }
 0x9c7   :  { %15213 = vmatpush1.bf16.msra.mxu0 %v16541_v31 }
 0x9c8   :  { %15215 = vmatprep.subr.bf16.mxu0 %v16562_v38 }
 0x9cb   :  { %15217 = vmatpush1.bf16.msra.mxu0 %v16577_v44 }
 0x9cc   :  { %15219 = vmatprep.subr.bf16.mxu0 %v16583_v45 }
 0x9cf   :  { %15221 = vmatpush1.bf16.msra.mxu0 %v16589_v48 }
 0x9d0   :  { %15319 = vmatprep.subr.bf16.mxu0 %v16487_v17 }
 0x9d2   :  { %5000 = vmatmul.mubr.f32.vlgmr.msra.gmra.mrb[8].mxu0 %v4440_v27 }
 0x9d3   :  { %15321 = vmatpush1.bf16.msra.mxu0 %v16511_v24  ;;  %5853 = vmatprep.mubr.f32.mxu0 %v18731_v18 }
 0x9d4   :  { %15323 = vmatprep.subr.bf16.mxu0 %v16517_v25 }
 0x9d7   :  { %15325 = vmatpush1.bf16.msra.mxu0 %v16541_v31 }
 0x9d8   :  { %15327 = vmatprep.subr.bf16.mxu0 %v16562_v38 }
 0x9db   :  { %15329 = vmatpush1.bf16.msra.mxu0 %v16577_v44 }
 0x9dc   :  { %15331 = vmatprep.subr.bf16.mxu0 %v16583_v45 }
 0x9df   :  { %15333 = vmatpush1.bf16.msra.mxu0 %v16589_v48 }
 0x9e0   :  { %15335 = vmatprep.subr.bf16.mxu0 %v16720_v8 }
 0xaa5   :  { %v5001_v51 = vpop.f32.mrb[8].mxu0 }
 0xaa6   :  { %v5008_v39 = vrot.slane %v5001_v51, 6  ;;  %v5003_v1 = vpop.f32.mrb[9].mxu0 }
 0xaa7   :  { %v5009_v43 = vrot.slane %v5003_v1, 6  ;;  %v5055_v1 = vrot.slane %v17493_v49, 6 }
 0xaa8   :  { %v5012_v33 = vadd.f32 %v17170_v52, %v5008_v39 }
 0xaa9   :  { %v5013_v35 = vadd.f32 %v5009_v43, %v4354_v42 }
 0xaaa   :  { %v13438_v63 = vmul.f32 -1.442695, %v5012_v33 }
 0xaab   :  { %v13439_v55 = vmul.f32 -1.442695, %v5013_v35 }
 0xaac   :  { %16164 = vpow2.f32 %v13438_v63 }
 0xaad   :  { %16166 = vpow2.f32 %v13439_v55 }
 0xab6   :  { %v16165_v56 = vpop.eup %16164 }
 0xab7   :  { %v16167_v54 = vpop.eup %16166  ;;  %v5020_v47 = vadd.f32 1.0, %v16165_v56 }
 0xab8   :  { %v5021_v41 = vadd.f32 1.0, %v16167_v54 }
 0xab9   :  { %16168 = vrcp.f32 %v5020_v47 }
 0xaba   :  { %16170 = vrcp.f32 %v5021_v41 }
 0xabb   :  { %16172 = vtanh.f32 %v5013_v35 }
 0xabc   :  { %16174 = vtanh.f32 %v5012_v33 }
 0xac3   :  { %v16169_v8 = vpop.eup %16168 }
 0xac4   :  { %v16171_v27 = vpop.eup %16170  ;;  %5034 = vrot.lane.b32.xlu1 %v16169_v8, %s16319_s24 }
 0xac5   :  { %5029 = vrot.lane.b32.xlu0 %v16171_v27, %s16320_s26  ;;  %v16173_v53 = vpop.eup %16172 }
 0xac6   :  { %v16175_v0 = vpop.eup %16174 }
 0xac8   :  { %5043 = vrot.lane.b32.xlu1 %v16173_v53, %s16319_s24 }
 0xac9   :  { %5039 = vrot.lane.b32.xlu0 %v16175_v0, %s16318_s4 }
 0xacc   :  { %5050 = vrot.lane.b32.xlu1 %v16171_v27, %s16318_s4 }
 0xacd   :  { %5047 = vrot.lane.b32.xlu0 %v16169_v8, %s16320_s26 }
 0xb36   :  { %v5035_v36 = vpop.permute.xlu1 %5034 }
 0xb37   :  { %v5030_v32 = vpop.permute.xlu0 %5029  ;;  %v5037_v51 = vsel %vm212_vm7, %v5035_v36, %v16171_v27 }
 0xb38   :  { %v5032_v33 = vsel %vm212_vm7, %v16169_v8, %v5030_v32  ;;  %v5057_v63 = vmul.f32 %v5055_v1, %v5037_v51 }
 0xb3a   :  { %v5044_v39 = vpop.permute.xlu1 %5043 }
 0xb3b   :  { %v5040_v43 = vpop.permute.xlu0 %5039 }
 0xb3c   :  { %v5046_v35 = vsel %vm212_vm7, %v5040_v43, %v5044_v39 }
 0xb3d   :  { %v5058_v55 = vmul.f32 %v5046_v35, %v5032_v33 }
 0xb3e   :  { %v5051_v54 = vpop.permute.xlu1 %5050 }
 0xb3f   :  { %v17569_v56 = vadd.f32 %v5058_v55, %v5057_v63  ;;  %v5048_v47 = vpop.permute.xlu0 %5047 }
 0xb40   :  { %v5053_v53 = vsel %vm212_vm7, %v5048_v47, %v5051_v54 }
 0xb41   :  { %16176 = vtanh.f32 %v17569_v56 }
 0xb4b   :  { %v16177_v41 = vpop.eup %16176 }
 0xb4c   :  { %v17573_v27 = vmul.f32 %v16177_v41, %v5053_v53 }
 0xb4e   :  { %v5063_v49 = vrot.slane %v17573_v27, 2 }
 0xb50   :  { %v5064_v0 = vsel %vm830_vm8, %v5063_v49, 0 }
 0xb51   :  { %v5147_v8 = vand.u32 4294901760, %v5064_v0 }
 0xb53   :  { %v5148_v36 = vsub.f32 %v5064_v0, %v5147_v8 }
 0xb55   :  { %v5149_v32 = vand.u32 4294901760, %v5148_v36 }
 0xb57   :  { %v5150_v51 = vsub.f32 %v5148_v36, %v5149_v32 }
 0xb59   :  { %v5151_v39 = vand.u32 4294901760, %v5150_v51 }
 0xb5b   :  { %5152 = vmatmul.mubr.f32.vlgmr.msra.gmra.mrb[6].mxu1 %v5151_v39 }
 0xb5c   :  { %15241 = vmatpush1.bf16.msra.mxu1 %v16740_v19  ;;  %5302 = vmatprep.mubr.f32.mxu1 %v18731_v18 }
 0xb5d   :  { %15243 = vmatprep.subr.bf16.mxu1 %v18758_v60 }
 0xb60   :  { %15245 = vmatpush1.bf16.msra.mxu1 %v18759_v37 }
 0xb61   :  { %15247 = vmatprep.subr.bf16.mxu1 %v16870_v5 }
 0xb64   :  { %15249 = vmatpush1.bf16.msra.mxu1 %v16894_v15 }
 0xb65   :  { %15251 = vmatprep.subr.bf16.mxu1 %v16954_v23 }
 0xb68   :  { %15253 = vmatpush1.bf16.msra.mxu1 %v16964_v10 }
 0xb69   :  { %15255 = vmatprep.subr.bf16.mxu1 %v16961_v3 }
 0xb6b   :  { %5304 = vmatmul.mubr.f32.vlgmr.msra.gmra.mrb[6].mxu1 %v5147_v8 }
 0xb6c   :  { %15257 = vmatpush1.bf16.msra.mxu1 %v16981_v30  ;;  %5406 = vmatprep.mubr.f32.mxu1 %v18731_v18 }
 0xb6d   :  { %15259 = vmatprep.subr.bf16.mxu1 %v16998_v34 }
 0xb70   :  { %15261 = vmatpush1.bf16.msra.mxu1 %v17009_v14 }
 0xb71   :  { %15263 = vmatprep.subr.bf16.mxu1 %v17016_v58 }
 0xb74   :  { %15265 = vmatpush1.bf16.msra.mxu1 %v17024_v7 }
 0xb75   :  { %15267 = vmatprep.subr.bf16.mxu1 %v17030_v12 }
 0xb78   :  { %15269 = vmatpush1.bf16.msra.mxu1 %v17037_v40 }
 0xb79   :  { %15271 = vmatprep.subr.bf16.mxu1 %v16487_v17 }
 0xb7b   :  { %5409 = vmatmul.mubr.f32.vlgmr.msra.gmra.mrb[6].mxu1 %v5148_v36 }
 0xb7c   :  { %15273 = vmatpush1.bf16.msra.mxu1 %v16511_v24  ;;  %5495 = vmatprep.mubr.f32.mxu1 %v18731_v18 }
 0xb7d   :  { %15275 = vmatprep.subr.bf16.mxu1 %v16517_v25 }
 0xb80   :  { %15277 = vmatpush1.bf16.msra.mxu1 %v16541_v31 }
 0xb81   :  { %15279 = vmatprep.subr.bf16.mxu1 %v16562_v38 }
 0xb84   :  { %15281 = vmatpush1.bf16.msra.mxu1 %v16577_v44 }
 0xb85   :  { %15283 = vmatprep.subr.bf16.mxu1 %v16583_v45 }
 0xb88   :  { %15285 = vmatpush1.bf16.msra.mxu1 %v16589_v48 }
 0xb89   :  { %15287 = vmatprep.subr.bf16.mxu1 %v16970_v28 }
 0xb8b   :  { %5499 = vmatmul.mubr.f32.vlgmr.msra.gmra.mrb[6].mxu1 %v5149_v32 }
 0xb8c   :  { %15289 = vmatpush1.bf16.msra.mxu1 %v16976_v26  ;;  %5617 = vmatprep.mubr.f32.mxu1 %v18731_v18 }
 0xb8d   :  { %15291 = vmatprep.subr.bf16.mxu1 %v16987_v29 }
 0xb90   :  { %15293 = vmatpush1.bf16.msra.mxu1 %v16993_v9 }
 0xb91   :  { %15295 = vmatprep.subr.bf16.mxu1 %v17099_v61 }
 0xb94   :  { %15297 = vmatpush1.bf16.msra.mxu1 %v17109_v46 }
 0xb95   :  { %15299 = vmatprep.subr.bf16.mxu1 %v17117_v2 }
 0xb98   :  { %15301 = vmatpush1.bf16.msra.mxu1 %v17127_v50 }
 0xb99   :  { %15303 = vmatprep.subr.bf16.mxu1 %v16487_v17 }
 0xb9b   :  { %5619 = vmatmul.mubr.f32.vlgmr.msra.gmra.mrb[6].mxu1 %v5147_v8 }
 0xb9c   :  { %15305 = vmatpush1.bf16.msra.mxu1 %v16511_v24  ;;  %5705 = vmatprep.mubr.f32.mxu1 %v18731_v18 }
 0xb9d   :  { %15307 = vmatprep.subr.bf16.mxu1 %v16517_v25 }
 0xba0   :  { %15309 = vmatpush1.bf16.msra.mxu1 %v16541_v31 }
 0xba1   :  { %15311 = vmatprep.subr.bf16.mxu1 %v16562_v38 }
 0xba4   :  { %15313 = vmatpush1.bf16.msra.mxu1 %v16577_v44 }
 0xba5   :  { %15315 = vmatprep.subr.bf16.mxu1 %v16583_v45 }
 0xba8   :  { %15317 = vmatpush1.bf16.msra.mxu1 %v16589_v48 }
 0xbab   :  { %5707 = vmatmul.mubr.f32.vlgmr.msra.gmra.mrb[6].mxu1 %v5147_v8 }
 0xc7e   :  { %v5708_v1 = vpop.f32.mrb[6].mxu1 }
 0xc7f   :  { %v5715_v43 = vrot.slane %v5708_v1, 4  ;;  %v5710_v33 = vpop.f32.mrb[7].mxu1 }
 0xc80   :  { %v5716_v35 = vrot.slane %v5710_v33, 4  ;;  %v5762_v33 = vrot.slane %v17569_v56, 6 }
 0xc81   :  { %v5719_v63 = vadd.f32 %v17170_v52, %v5715_v43 }
 0xc82   :  { %v5720_v55 = vadd.f32 %v5716_v35, %v3651_v20 }
 0xc83   :  { %v13440_v54 = vmul.f32 -1.442695, %v5719_v63 }
 0xc84   :  { %v13441_v47 = vmul.f32 -1.442695, %v5720_v55 }
 0xc85   :  { %16178 = vpow2.f32 %v13440_v54 }
 0xc86   :  { %16180 = vpow2.f32 %v13441_v47 }
 0xc8f   :  { %v16179_v41 = vpop.eup %16178 }
 0xc90   :  { %v16181_v53 = vpop.eup %16180  ;;  %v5727_v49 = vadd.f32 1.0, %v16179_v41 }
 0xc91   :  { %v5728_v0 = vadd.f32 1.0, %v16181_v53 }
 0xc92   :  { %16182 = vrcp.f32 %v5727_v49 }
 0xc93   :  { %16184 = vrcp.f32 %v5728_v0 }
 0xc94   :  { %16186 = vtanh.f32 %v5720_v55 }
 0xc95   :  { %16188 = vtanh.f32 %v5719_v63 }
 0xc9c   :  { %v16183_v8 = vpop.eup %16182 }
 0xc9d   :  { %v16185_v36 = vpop.eup %16184  ;;  %5741 = vrot.lane.b32.xlu1 %v16183_v8, %s16319_s24 }
 0xc9e   :  { %5736 = vrot.lane.b32.xlu0 %v16185_v36, %s16320_s26  ;;  %v16187_v32 = vpop.eup %16186 }
 0xc9f   :  { %v16189_v20 = vpop.eup %16188 }
 0xca1   :  { %5750 = vrot.lane.b32.xlu1 %v16187_v32, %s16319_s24 }
 0xca2   :  { %5746 = vrot.lane.b32.xlu0 %v16189_v20, %s16318_s4 }
 0xca5   :  { %5757 = vrot.lane.b32.xlu1 %v16185_v36, %s16318_s4 }
 0xca6   :  { %5754 = vrot.lane.b32.xlu0 %v16183_v8, %s16320_s26 }
 0xd0f   :  { %v5742_v51 = vpop.permute.xlu1 %5741 }
 0xd10   :  { %v5737_v39 = vpop.permute.xlu0 %5736  ;;  %v5744_v1 = vsel %vm212_vm7, %v5742_v51, %v16185_v36 }
 0xd11   :  { %v5739_v63 = vsel %vm212_vm7, %v16183_v8, %v5737_v39  ;;  %v5764_v54 = vmul.f32 %v5762_v33, %v5744_v1 }
 0xd13   :  { %v5751_v43 = vpop.permute.xlu1 %5750 }
 0xd14   :  { %v5747_v35 = vpop.permute.xlu0 %5746 }
 0xd15   :  { %v5753_v55 = vsel %vm212_vm7, %v5747_v35, %v5751_v43 }
 0xd16   :  { %v5765_v47 = vmul.f32 %v5753_v55, %v5739_v63 }
 0xd17   :  { %v5758_v53 = vpop.permute.xlu1 %5757 }
 0xd18   :  { %v17634_v41 = vadd.f32 %v5765_v47, %v5764_v54  ;;  %v5755_v49 = vpop.permute.xlu0 %5754 }
 0xd19   :  { %v5760_v32 = vsel %vm212_vm7, %v5755_v49, %v5758_v53 }
 0xd1a   :  { %16190 = vtanh.f32 %v17634_v41 }
 0xd24   :  { %v16191_v0 = vpop.eup %16190 }
 0xd25   :  { %v17638_v36 = vmul.f32 %v16191_v0, %v5760_v32 }
 0xd27   :  { %v5770_v56 = vrot.slane %v17638_v36, 4 }
 0xd29   :  { %v5771_v20 = vsel %vm830_vm8, %v5770_v56, 0 }
 0xd2a   :  { %v5854_v8 = vand.u32 4294901760, %v5771_v20 }
 0xd2c   :  { %v5855_v51 = vsub.f32 %v5771_v20, %v5854_v8 }
 0xd2e   :  { %v5856_v39 = vand.u32 4294901760, %v5855_v51 }
 0xd30   :  { %v5857_v1 = vsub.f32 %v5855_v51, %v5856_v39 }
 0xd32   :  { %v5858_v43 = vand.u32 4294901760, %v5857_v1 }
 0xd34   :  { %5859 = vmatmul.mubr.f32.vlgmr.msra.gmra.mrb[10].mxu0 %v5858_v43 }
 0xd35   :  { %15337 = vmatpush1.bf16.msra.mxu0 %v16740_v19  ;;  %6009 = vmatprep.mubr.f32.mxu0 %v18731_v18  ;;  %v6551_v19 = vld [vmem:[%s18646_s5 + $0x8] sm:$0xff] }
 0xd36   :  { %15339 = vmatprep.subr.bf16.mxu0 %v18758_v60 }
 0xd39   :  { %15341 = vmatpush1.bf16.msra.mxu0 %v18759_v37 }
 0xd3a   :  { %15343 = vmatprep.subr.bf16.mxu0 %v16870_v5 }
 0xd3d   :  { %15345 = vmatpush1.bf16.msra.mxu0 %v16894_v15 }
 0xd3e   :  { %15347 = vmatprep.subr.bf16.mxu0 %v16954_v23  ;;  %v6567_v23 = vsel %vm212_vm7, %v6551_v19, 0 }
 0xd41   :  { %15349 = vmatpush1.bf16.msra.mxu0 %v16964_v10 }
 0xd42   :  { %15351 = vmatprep.subr.bf16.mxu0 %v16961_v3 }
 0xd44   :  { %6011 = vmatmul.mubr.f32.vlgmr.msra.gmra.mrb[10].mxu0 %v5854_v8 }
 0xd45   :  { %15353 = vmatpush1.bf16.msra.mxu0 %v16981_v30  ;;  %6113 = vmatprep.mubr.f32.mxu0 %v18731_v18 }
 0xd46   :  { %15355 = vmatprep.subr.bf16.mxu0 %v16998_v34 }
 0xd49   :  { %15357 = vmatpush1.bf16.msra.mxu0 %v17009_v14 }
 0xd4a   :  { %15359 = vmatprep.subr.bf16.mxu0 %v17016_v58 }
 0xd4d   :  { %15361 = vmatpush1.bf16.msra.mxu0 %v17024_v7 }
 0xd4e   :  { %15363 = vmatprep.subr.bf16.mxu0 %v17030_v12 }
 0xd51   :  { %15365 = vmatpush1.bf16.msra.mxu0 %v17037_v40 }
 0xd52   :  { %15367 = vmatprep.subr.bf16.mxu0 %v16487_v17 }
 0xd54   :  { %6116 = vmatmul.mubr.f32.vlgmr.msra.gmra.mrb[10].mxu0 %v5855_v51 }
 0xd55   :  { %15369 = vmatpush1.bf16.msra.mxu0 %v16511_v24  ;;  %6202 = vmatprep.mubr.f32.mxu0 %v18731_v18 }
 0xd56   :  { %15371 = vmatprep.subr.bf16.mxu0 %v16517_v25 }
 0xd59   :  { %15373 = vmatpush1.bf16.msra.mxu0 %v16541_v31 }
 0xd5a   :  { %15375 = vmatprep.subr.bf16.mxu0 %v16562_v38 }
 0xd5d   :  { %15377 = vmatpush1.bf16.msra.mxu0 %v16577_v44 }
 0xd5e   :  { %15379 = vmatprep.subr.bf16.mxu0 %v16583_v45 }
 0xd61   :  { %15381 = vmatpush1.bf16.msra.mxu0 %v16589_v48 }
 0xd62   :  { %15383 = vmatprep.subr.bf16.mxu0 %v16970_v28 }
 0xd64   :  { %6206 = vmatmul.mubr.f32.vlgmr.msra.gmra.mrb[10].mxu0 %v5856_v39 }
 0xd65   :  { %15385 = vmatpush1.bf16.msra.mxu0 %v16976_v26  ;;  %6324 = vmatprep.mubr.f32.mxu0 %v18731_v18 }
 0xd66   :  { %15387 = vmatprep.subr.bf16.mxu0 %v16987_v29  ;;  %v17716_v29 = vand.u32 4294901760, %v6567_v23 }
 0xd68   :  { %v17728_v12 = vsub.f32 %v6567_v23, %v17716_v29  ;;  %v7097_v23 = vld [vmem:[%s18649_s8] sm:$0xff] }
 0xd69   :  { %15389 = vmatpush1.bf16.msra.mxu0 %v16993_v9 }
 0xd6a   :  { %15391 = vmatprep.subr.bf16.mxu0 %v17099_v61  ;;  %v6650_v60 = vand.u32 4294901760, %v17728_v12 }
 0xd6c   :  { %v6651_v54 = vsub.f32 %v17728_v12, %v6650_v60 }
 0xd6d   :  { %15393 = vmatpush1.bf16.msra.mxu0 %v17109_v46 }
 0xd6e   :  { %15395 = vmatprep.subr.bf16.mxu0 %v17117_v2  ;;  %v6652_v32 = vand.u32 4294901760, %v6651_v54 }
 0xd71   :  { %15397 = vmatpush1.bf16.msra.mxu0 %v17127_v50 }
 0xd72   :  { %15399 = vmatprep.subr.bf16.mxu0 %v16487_v17  ;;  %v6552_v17 = vld [vmem:[%s18647_s6] sm:$0xff] }
 0xd74   :  { %6326 = vmatmul.mubr.f32.vlgmr.msra.gmra.mrb[10].mxu0 %v5854_v8 }
 0xd75   :  { %15401 = vmatpush1.bf16.msra.mxu0 %v16511_v24  ;;  %6412 = vmatprep.mubr.f32.mxu0 %v18731_v18  ;;  %v6553_v24 = vld [vmem:[%s18647_s6 + $0x8] sm:$0xff] }
 0xd76   :  { %15403 = vmatprep.subr.bf16.mxu0 %v16517_v25  ;;  %v6554_v25 = vld [vmem:[%s18647_s6 + $0x10] sm:$0xff] }
 0xd79   :  { %15405 = vmatpush1.bf16.msra.mxu0 %v16541_v31  ;;  %v6570_v31 = vand.u32 4294901760, %v6552_v17 }
 0xd7a   :  { %15407 = vmatprep.subr.bf16.mxu0 %v16562_v38  ;;  %v6573_v38 = vand.u32 4294901760, %v6553_v24 }
 0xd7b   :  { %v17710_v10 = vsub.f32 %v6552_v17, %v6570_v31 }
 0xd7c   :  { %v17706_v30 = vpack.c.bf16 %v6573_v38, %v6570_v31  ;;  %v17712_v28 = vsub.f32 %v6553_v24, %v6573_v38 }
 0xd7d   :  { %15409 = vmatpush1.bf16.msra.mxu0 %v16577_v44  ;;  %v6555_v44 = vld [vmem:[%s18647_s6 + $0x18] sm:$0xff]  ;;  %v6661_v58 = vand.u32 4294901760, %v17710_v10 }
 0xd7e   :  { %15411 = vmatprep.subr.bf16.mxu0 %v16583_v45  ;;  %v6576_v45 = vand.u32 4294901760, %v6554_v25  ;;  %v6579_v5 = vand.u32 4294901760, %v6555_v44  ;;  %15415 = vmatprep.subr.bf16.mxu1 %v17706_v30  ;;  %v6668_v7 = vand.u32 4294901760, %v17712_v28  ;;  %v15430_v20 = vpack.c.bf16 %v17712_v28, %v17710_v10 }
 0xd7f   :  { %15417 = vmatpush3.bf16.msra.mxu1 %v17706_v30  ;;  %v6662_v2 = vsub.f32 %v17710_v10, %v6661_v58  ;;  %v7098_v10 = vld [vmem:[%s18649_s8 + $0x8] sm:$0xff] }
 0xd80   :  { %v17714_v26 = vpack.c.bf16 %v6579_v5, %v6576_v45  ;;  %v17718_v9 = vsub.f32 %v6554_v25, %v6576_v45  ;;  %v17720_v34 = vsub.f32 %v6555_v44, %v6579_v5  ;;  %v6669_v50 = vsub.f32 %v17712_v28, %v6668_v7  ;;  %v7698_v28 = vld [vmem:[%s18651_s10] sm:$0xff] }
 0xd81   :  { %15413 = vmatpush1.bf16.msra.mxu0 %v16589_v48  ;;  %v6550_v48 = vld [vmem:[%s18646_s5] sm:$0xff]  ;;  %v6663_v63 = vand.u32 4294901760, %v6662_v2  ;;  %v15446_v22 = vpack.c.bf16 %v6668_v7, %v6661_v58  ;;  %v7701_v2 = vld [vmem:[%s18651_s10 + $0x18] sm:$0xff]  ;;  %s16326_s5 = smov [#allocation6]  }
 0xd82   :  { %v6564_v15 = vsel %vm212_vm7, %v6550_v48, 0  ;;  %v6675_v40 = vand.u32 4294901760, %v17718_v9  ;;  %v6682_v61 = vand.u32 4294901760, %v17720_v34  ;;  %15419 = vmatprep.subr.bf16.mxu1 %v17714_v26  ;;  %v6670_v55 = vand.u32 4294901760, %v6669_v50  ;;  %s13388_s6 = sshll.u32 %s16326_s5, 4  ;;  %s13389_s6 = int_to_ptr.vmem [resolvable:$true] %s13388_s6 }
 0xd83   :  { %v17708_v3 = vand.u32 4294901760, %v6564_v15  ;;  %15421 = vmatpush3.bf16.msra.mxu1 %v17714_v26  ;;  %v15434_v38 = vpack.c.bf16 %v17720_v34, %v17718_v9  ;;  %p16295_p6 = scmp.lt.s32.totalorder %s13389_s6, %s13389_s6 }
 0xd84   :  { %6414 = vmatmul.mubr.f32.vlgmr.msra.gmra.mrb[10].mxu0 %v5854_v8  ;;  %v6676_v37 = vsub.f32 %v17718_v9, %v6675_v40  ;;  %v6683_v33 = vsub.f32 %v17720_v34, %v6682_v61  ;;  %v15422_v0 = vpack.c.bf16 %v6670_v55, %v6663_v63  ;;  %v15450_v19 = vpack.c.bf16 %v6682_v61, %v6675_v40  ;;  %v7100_v40 = vld [vmem:[%s18649_s8 + $0x18] sm:$0xff]  ;;  %v7700_v61 = vld [vmem:[%s18651_s10 + $0x10] sm:$0xff]  ;;  %v7102_v63 = vld [vmem:[%s18649_s8 + $0x28] sm:$0xff] }
 0xd85   :  { %v6639_v14 = vsub.f32 %v6564_v15, %v17708_v3  ;;  %v7119_v9 = vand.u32 4294901760, %v7097_v23  ;;  %v7122_v34 = vand.u32 4294901760, %v7098_v10  ;;  %v7720_v50 = vand.u32 4294901760, %v7700_v61 }
 0xd86   :  { %v6677_v47 = vand.u32 4294901760, %v6676_v37  ;;  %v6684_v53 = vand.u32 4294901760, %v6683_v33  ;;  %15423 = vmatprep.subr.bf16.mxu1 %v15422_v0  ;;  %v7134_v54 = vand.u32 4294901760, %v7102_v63 }
 0xd87   :  { %v6640_v46 = vand.u32 4294901760, %v6639_v14  ;;  %v17799_v58 = vpack.c.bf16 %v7122_v34, %v7119_v9 }
 0xd88   :  { %v15426_v56 = vpack.c.bf16 %v6684_v53, %v6677_v47  ;;  %v7703_v47 = vld [vmem:[%s18651_s10 + $0x28] sm:$0xff] }
 0xd89   :  { %v6641_v35 = vsub.f32 %v6639_v14, %v6640_v46  ;;  %15463 = vmatprep.subr.bf16.mxu0 %v17799_v58 }
 0xd8a   :  { %15465 = vmatpush3.bf16.msra.mxu0 %v17799_v58 }
 0xd8b   :  { %v6642_v49 = vand.u32 4294901760, %v6641_v35  ;;  %v7101_v35 = vld [vmem:[%s18649_s8 + $0x20] sm:$0xff] }
 0xd8c   :  { %v7131_v55 = vand.u32 4294901760, %v7101_v35 }
 0xd8d   :  { %13868 = vmatprep.mubr.f32.mxu1 %v6642_v49  ;;  %v7729_v49 = vand.u32 4294901760, %v7703_v47 }
 0xd8e   :  { %13869 = vmatmul.mubr.f32.vlgmr.msra.gmra.mrb[8].mxu1 %v6652_v32  ;;  %v17845_v32 = vsub.f32 %v7097_v23, %v7119_v9 }
 0xd8f   :  { %15425 = vmatpush3.bf16.msra.mxu1 %v15422_v0  ;;  %13879 = vmatprep.mubr.f32.mxu1 %v17708_v3  ;;  %v17843_v0 = vpack.c.bf16 %v7134_v54, %v7131_v55 }
 0xd90   :  { %15427 = vmatprep.subr.bf16.mxu1 %v15426_v56 }
 0xd93   :  { %15429 = vmatpush3.bf16.msra.mxu1 %v15426_v56  ;;  %v17847_v56 = vsub.f32 %v7098_v10, %v7122_v34 }
 0xd94   :  { %15431 = vmatprep.subr.bf16.mxu1 %v15430_v20 }
 0xd96   :  { %13880 = vmatmul.mubr.f32.vlgmr.msra.gmra.mrb[8].mxu1 %v17716_v29 }
 0xd97   :  { %15433 = vmatpush3.bf16.msra.mxu1 %v15430_v20  ;;  %13890 = vmatprep.mubr.f32.mxu1 %v6639_v14 }
 0xd98   :  { %15435 = vmatprep.subr.bf16.mxu1 %v15434_v38 }
 0xd9b   :  { %15437 = vmatpush3.bf16.msra.mxu1 %v15434_v38  ;;  %v18704_v38 = vand.u32 4294901760, %v17845_v32 }
 0xd9c   :  { %15439 = vmatprep.subr.bf16.mxu1 %v17706_v30 }
 0xd9e   :  { %13891 = vmatmul.mubr.f32.vlgmr.msra.gmra.mrb[8].mxu1 %v17728_v12  ;;  %v7099_v12 = vld [vmem:[%s18649_s8 + $0x10] sm:$0xff] }
 0xd9f   :  { %15441 = vmatpush3.bf16.msra.mxu1 %v17706_v30  ;;  %13901 = vmatprep.mubr.f32.mxu1 %v6640_v46  ;;  %v7125_v46 = vand.u32 4294901760, %v7099_v12 }
 0xda0   :  { %15443 = vmatprep.subr.bf16.mxu1 %v17714_v26 }
 0xda1   :  { %v17908_v34 = vsub.f32 %v7099_v12, %v7125_v46 }
 0xda3   :  { %15445 = vmatpush3.bf16.msra.mxu1 %v17714_v26 }
 0xda4   :  { %15447 = vmatprep.subr.bf16.mxu1 %v15446_v22 }
 0xda6   :  { %13902 = vmatmul.mubr.f32.vlgmr.msra.gmra.mrb[8].mxu1 %v6650_v60  ;;  %v7723_v60 = vand.u32 4294901760, %v7701_v2 }
 0xda7   :  { %15449 = vmatpush3.bf16.msra.mxu1 %v15446_v22  ;;  %13912 = vmatprep.mubr.f32.mxu1 %v17708_v3 }
 0xda8   :  { %15451 = vmatprep.subr.bf16.mxu1 %v15450_v19  ;;  %v17822_v33 = vpack.c.bf16 %v7723_v60, %v7720_v50 }
 0xdab   :  { %15453 = vmatpush3.bf16.msra.mxu1 %v15450_v19 }
 0xdac   :  { %15455 = vmatprep.subr.bf16.mxu1 %v17706_v30 }
 0xdae   :  { %13913 = vmatmul.mubr.f32.vlgmr.msra.gmra.mrb[8].mxu1 %v17716_v29 }
 0xdaf   :  { %15457 = vmatpush3.bf16.msra.mxu1 %v17706_v30  ;;  %13923 = vmatprep.mubr.f32.mxu1 %v17708_v3  ;;  %v7699_v30 = vld [vmem:[%s18651_s10 + $0x8] sm:$0xff]  ;;  %v7714_v3 = vand.u32 4294901760, %v7698_v28 }
 0xdb0   :  { %15459 = vmatprep.subr.bf16.mxu1 %v17714_v26  ;;  %v7717_v14 = vand.u32 4294901760, %v7699_v30 }
 0xdb2   :  { %v17801_v7 = vpack.c.bf16 %v7717_v14, %v7714_v3 }
 0xdb3   :  { %15461 = vmatpush3.bf16.msra.mxu1 %v17714_v26  ;;  %v7128_v26 = vand.u32 4294901760, %v7100_v40 }
 0xdb4   :  { %15559 = vmatprep.subr.bf16.mxu1 %v17801_v7 }
 0xdb5   :  { %v17820_v37 = vpack.c.bf16 %v7128_v26, %v7125_v46 }
 0xdb6   :  { %13924 = vmatmul.mubr.f32.vlgmr.msra.gmra.mrb[8].mxu1 %v17716_v29  ;;  %v17833_v29 = vld [vmem:[%s18651_s10 + $0x20] sm:$0xff] }
 0xdb7   :  { %15561 = vmatpush3.bf16.msra.mxu1 %v17801_v7  ;;  %15467 = vmatprep.subr.bf16.mxu0 %v17820_v37  ;;  %v7726_v53 = vand.u32 4294901760, %v17833_v29 }
 0xdb8   :  { %15563 = vmatprep.subr.bf16.mxu1 %v17822_v33  ;;  %15469 = vmatpush3.bf16.msra.mxu0 %v17820_v37 }
 0xdb9   :  { %v17849_v20 = vpack.c.bf16 %v7729_v49, %v7726_v53  ;;  %15471 = vmatprep.subr.bf16.mxu0 %v17843_v0 }
 0xdbb   :  { %15565 = vmatpush3.bf16.msra.mxu1 %v17822_v33 }
 0xdbc   :  { %15567 = vmatprep.subr.bf16.mxu1 %v17849_v20  ;;  %15473 = vmatpush3.bf16.msra.mxu0 %v17843_v0 }
 0xdbf   :  { %15569 = vmatpush3.bf16.msra.mxu1 %v17849_v20 }
 0xe57   :  { %v6415_v8 = vpop.f32.mrb[10].mxu0 }
 0xe58   :  { %v6422_v51 = vrot.slane %v6415_v8, 2  ;;  %v6417_v39 = vpop.f32.mrb[11].mxu0  ;;  %v17854_v8 = vld [vmem:[%s18649_s8 + $0x30] sm:$0xff] }
 0xe59   :  { %v6423_v1 = vrot.slane %v6417_v39, 2  ;;  %v17864_v39 = vld [vmem:[%s18651_s10 + $0x30] sm:$0xff] }
 0xe5a   :  { %v6426_v43 = vadd.f32 %v17170_v52, %v6422_v51  ;;  %v17859_v51 = vld [vmem:[%s18649_s8 + $0x38] sm:$0xff] }
 0xe5b   :  { %v6427_v17 = vadd.f32 %v6423_v1, %v4354_v42  ;;  %v17866_v1 = vsub.f32 %v7698_v28, %v7714_v3  ;;  %v17912_v3 = vsub.f32 %v7700_v61, %v7720_v50  ;;  %v7241_v50 = vsub.f32 %v7101_v35, %v7131_v55 }
 0xe5c   :  { %v13442_v24 = vmul.f32 -1.442695, %v6426_v43  ;;  %v7836_v35 = vsub.f32 %v17833_v29, %v7726_v53  ;;  %v7843_v55 = vsub.f32 %v7703_v47, %v7729_v49 }
 0xe5d   :  { %v13443_v25 = vmul.f32 -1.442695, %v6427_v17 }
 0xe5e   :  { %16192 = vpow2.f32 %v13442_v24  ;;  %v7140_v24 = vand.u32 4294901760, %v17859_v51 }
 0xe5f   :  { %16194 = vpow2.f32 %v13443_v25  ;;  %v17876_v25 = vld [vmem:[%s18651_s10 + $0x38] sm:$0xff] }
 0xe68   :  { %v16193_v31 = vpop.eup %16192 }
 0xe69   :  { %v16195_v44 = vpop.eup %16194  ;;  %v6434_v45 = vadd.f32 1.0, %v16193_v31  ;;  %v18707_v31 = vand.u32 4294901760, %v17864_v39 }
 0xe6a   :  { %v6435_v48 = vadd.f32 1.0, %v16195_v44  ;;  %v18706_v44 = vand.u32 4294901760, %v17876_v25 }
 0xe6b   :  { %16196 = vrcp.f32 %v6434_v45  ;;  %v18699_v45 = vand.u32 4294901760, %v17847_v56 }
 0xe6c   :  { %16198 = vrcp.f32 %v6435_v48  ;;  %v18703_v48 = vand.u32 4294901760, %v17866_v1 }
 0xe6d   :  { %16200 = vtanh.f32 %v6427_v17  ;;  %v7137_v17 = vand.u32 4294901760, %v17854_v8  ;;  %v7222_v23 = vsub.f32 %v17847_v56, %v18699_v45  ;;  %v17915_v45 = vsub.f32 %v7701_v2, %v7723_v60 }
 0xe6e   :  { %16202 = vtanh.f32 %v6426_v43  ;;  %v17868_v43 = vsub.f32 %v7699_v30, %v7717_v14  ;;  %v7810_v10 = vsub.f32 %v17866_v1, %v18703_v48  ;;  %v17910_v30 = vsub.f32 %v7100_v40, %v7128_v26 }
 0xe6f   :  { %v17887_v19 = vpack.c.bf16 %v7140_v24, %v7137_v17  ;;  %v7223_v14 = vand.u32 4294901760, %v7222_v23  ;;  %v18705_v40 = vand.u32 4294901760, %v17912_v3  ;;  %v7830_v26 = vand.u32 4294901760, %v17915_v45 }
 0xe70   :  { %v18700_v22 = vand.u32 4294901760, %v17868_v43  ;;  %v7811_v21 = vand.u32 4294901760, %v7810_v10  ;;  %v18701_v12 = vand.u32 4294901760, %v17910_v30  ;;  %v7248_v23 = vsub.f32 %v7102_v63, %v7134_v54 }
 0xe71   :  { %18760 = vst [vmem:[#allocation9_spill] sm:$0xff] %v17887_v19  ;;  %15475 = vmatprep.subr.bf16.mxu0 %v17887_v19  ;;  %v7837_v48 = vand.u32 4294901760, %v7836_v35  ;;  %v7255_v54 = vsub.f32 %v17854_v8, %v7137_v17 }
 0xe72   :  { %v7817_v28 = vsub.f32 %v17868_v43, %v18700_v22  ;;  %15477 = vmatpush3.bf16.msra.mxu0 %v17887_v19  ;;  %v18702_v22 = vand.u32 4294901760, %v17908_v34  ;;  %v7236_v60 = vsub.f32 %v17910_v30, %v18701_v12 }
 0xe73   :  { %v7838_v29 = vsub.f32 %v7836_v35, %v7837_v48  ;;  %v7256_v49 = vand.u32 4294901760, %v7255_v54 }
 0xe74   :  { %v7818_v6 = vand.u32 4294901760, %v7817_v28  ;;  %v7229_v2 = vsub.f32 %v17908_v34, %v18702_v22  ;;  %v7237_v28 = vand.u32 4294901760, %v7236_v60  ;;  %v18762_v60 = vand.u32 4294901760, %v17864_v39 }
 0xe75   :  { %v17762_v52 = vpop.eup %16196 }
 0xe76   :  { %v17764_v42 = vpop.eup %16198  ;;  %6448 = vrot.lane.b32.xlu1 %v17762_v52, %s16319_s24  ;;  %v17924_v61 = vpack.c.bf16 %v7818_v6, %v7811_v21  ;;  %v7831_v21 = vsub.f32 %v17915_v45, %v7830_v26  ;;  %v7242_v6 = vand.u32 4294901760, %v7241_v50  ;;  %v7230_v10 = vand.u32 4294901760, %v7229_v2 }
 0xe77   :  { %6443 = vrot.lane.b32.xlu0 %v17764_v42, %s16320_s26  ;;  %v16201_v5 = vpop.eup %16200 }
 0xe78   :  { %v16203_v15 = vpop.eup %16202  ;;  %v7832_v12 = vand.u32 4294901760, %v7831_v21  ;;  %v7243_v22 = vsub.f32 %v7241_v50, %v7242_v6  ;;  %v7839_v21 = vand.u32 4294901760, %v7838_v29 }
 0xe7a   :  { %6457 = vrot.lane.b32.xlu1 %v16201_v5, %s16319_s24  ;;  %v7215_v5 = vsub.f32 %v17845_v32, %v18704_v38  ;;  %v7844_v38 = vand.u32 4294901760, %v7843_v55  ;;  %v7244_v18 = vand.u32 4294901760, %v7243_v22 }
 0xe7b   :  { %6453 = vrot.lane.b32.xlu0 %v16203_v15, %s16318_s4  ;;  %v17896_v15 = vpack.c.bf16 %v18706_v44, %v18707_v31  ;;  %v7262_v44 = vsub.f32 %v17859_v51, %v7140_v24  ;;  %v7257_v51 = vsub.f32 %v7255_v54, %v7256_v49 }
 0xe7c   :  { %v7216_v9 = vand.u32 4294901760, %v7215_v5  ;;  %v7824_v5 = vsub.f32 %v17912_v3, %v18705_v40  ;;  %v17940_v40 = vpack.c.bf16 %v7237_v28, %v7230_v10  ;;  %v7845_v47 = vsub.f32 %v7843_v55, %v7844_v38 }
 0xe7d   :  { %18761 = vst [vmem:[#allocation10_spill] sm:$0xff] %v17896_v15  ;;  %15571 = vmatprep.subr.bf16.mxu1 %v17896_v15  ;;  %v7263_v2 = vand.u32 4294901760, %v7262_v44  ;;  %v18763_v28 = vand.u32 4294901760, %v17876_v25 }
 0xe7e   :  { %6464 = vrot.lane.b32.xlu1 %v17764_v42, %s16318_s4  ;;  %15573 = vmatpush3.bf16.msra.mxu1 %v17896_v15  ;;  %v17922_v46 = vpack.c.bf16 %v7223_v14, %v7216_v9  ;;  %v7825_v9 = vand.u32 4294901760, %v7824_v5  ;;  %v7249_v14 = vand.u32 4294901760, %v7248_v23  ;;  %v7850_v5 = vsub.f32 %v17864_v39, %v18762_v60 }
 0xe7f   :  { %6461 = vrot.lane.b32.xlu0 %v17762_v52, %s16320_s26  ;;  %15575 = vmatprep.subr.bf16.mxu1 %v17924_v61  ;;  %v7846_v10 = vand.u32 4294901760, %v7845_v47  ;;  %v7857_v8 = vsub.f32 %v17876_v25, %v18763_v28  ;;  %v7264_v24 = vsub.f32 %v7262_v44, %v7263_v2  ;;  %v17966_v25 = vpack.c.bf16 %v17868_v43, %v17866_v1 }
 0xe80   :  { %15479 = vmatprep.subr.bf16.mxu0 %v17922_v46  ;;  %v7250_v63 = vsub.f32 %v7248_v23, %v7249_v14  ;;  %v17944_v31 = vpack.c.bf16 %v7832_v12, %v7825_v9  ;;  %v7851_v22 = vand.u32 4294901760, %v7850_v5  ;;  %v17980_v60 = vpack.c.bf16 %v7262_v44, %v7255_v54 }
 0xe81   :  { %v17954_v12 = vpack.c.bf16 %v7846_v10, %v7839_v21  ;;  %v7858_v9 = vand.u32 4294901760, %v7857_v8  ;;  %v7265_v4 = vand.u32 4294901760, %v7264_v24  ;;  %v17982_v21 = vpack.c.bf16 %v7857_v8, %v7850_v5 }
 0xe82   :  { %v7251_v53 = vand.u32 4294901760, %v7250_v63  ;;  %v7258_v63 = vand.u32 4294901760, %v7257_v51  ;;  %v7852_v13 = vsub.f32 %v7850_v5, %v7851_v22  ;;  %v18764_v10 = vand.u32 4294901760, %v17845_v32 }
 0xe83   :  { %v7859_v15 = vsub.f32 %v7857_v8, %v7858_v9  ;;  %v18765_v28 = vand.u32 4294901760, %v17847_v56  ;;  %v18766_v24 = vand.u32 4294901760, %v17866_v1  ;;  %v18010_v54 = vpack.c.bf16 %v7263_v2, %v7256_v49 }
 0xe84   :  { %v17952_v17 = vpack.c.bf16 %v7251_v53, %v7244_v18  ;;  %v17956_v19 = vpack.c.bf16 %v7265_v4, %v7258_v63  ;;  %v7853_v39 = vand.u32 4294901760, %v7852_v13  ;;  %v17962_v18 = vpack.c.bf16 %v17847_v56, %v17845_v32 }
 0xe85   :  { %v7860_v29 = vand.u32 4294901760, %v7859_v15  ;;  %v17970_v53 = vpack.c.bf16 %v17910_v30, %v17908_v34  ;;  %v17974_v4 = vpack.c.bf16 %v17915_v45, %v17912_v3  ;;  %v17976_v13 = vpack.c.bf16 %v7248_v23, %v7241_v50 }
 0xe86   :  { %v17978_v15 = vpack.c.bf16 %v7843_v55, %v7836_v35  ;;  %v17988_v51 = vpack.c.bf16 %v18765_v28, %v18764_v10  ;;  %v18767_v63 = vand.u32 4294901760, %v17868_v43  ;;  %v18768_v50 = vand.u32 4294901760, %v17908_v34 }
 0xe87   :  { %v17958_v47 = vpack.c.bf16 %v7860_v29, %v7853_v39  ;;  %v18769_v23 = vand.u32 4294901760, %v17910_v30  ;;  %v18770_v35 = vand.u32 4294901760, %v17912_v3  ;;  %v18006_v32 = vpack.c.bf16 %v7249_v14, %v7242_v6 }
 0xe88   :  { %v17994_v45 = vpack.c.bf16 %v18767_v63, %v18766_v24  ;;  %v18008_v56 = vpack.c.bf16 %v7844_v38, %v7837_v48  ;;  %v18012_v1 = vpack.c.bf16 %v7858_v9, %v7851_v22  ;;  %v6469_v8 = vrot.slane %v17634_v41, 6 }
 0xe89   :  { %v18000_v44 = vpack.c.bf16 %v18769_v23, %v18768_v50  ;;  %v18004_v55 = vpack.c.bf16 %v7830_v26, %v18770_v35  ;;  %v6480_v14 = vrot.slane %v17638_v36, 2  ;;  %v6486_v22 = vrot.slane %v17497_v62, 2 }
 0xe8a   :  { %v6491_v24 = vrot.slane %v17344_v16, 2  ;;  %v6497_v50 = vrot.slane %v17193_v57, 2  ;;  %v6494_v23 = vrot.slane %v17269_v59, 6  ;;  %v18771_v35 = vrot.slane %v17419_v11, 6 }
 0xe8b   :  { %v6488_v10 = vsel %vm212_vm7, %v17419_v11, %v6486_v22 }
 0xee8   :  { %v6449_v43 = vpop.permute.xlu1 %6448 }
 0xee9   :  { %v6444_v5 = vpop.permute.xlu0 %6443  ;;  %v6451_v34 = vsel %vm212_vm7, %v6449_v43, %v17764_v42  ;;  %v6483_v42 = vrot.slane %v17573_v27, 6  ;;  %v6490_v43 = vsel %vm212_vm7, %v17497_v62, %v18771_v35 }
 0xeea   :  { %v6446_v3 = vsel %vm212_vm7, %v17762_v52, %v6444_v5  ;;  %v6471_v38 = vmul.f32 %v6469_v8, %v6451_v34  ;;  %v6482_v52 = vsel %vm212_vm7, %v17269_v59, %v6480_v14  ;;  %v6507_v34 = vrot.slane %v6488_v10, 3 }
 0xeeb   :  { %v6485_v28 = vsel %vm212_vm7, %v17344_v16, %v6483_v42  ;;  %v6501_v5 = vrot.slane %v6482_v52, 1  ;;  %v6496_v16 = vsel %vm212_vm7, %v17638_v36, %v6494_v23  ;;  %v6510_v11 = vrot.slane %v6490_v43, 4 }
 0xeec   :  { %v6458_v30 = vpop.permute.xlu1 %6457  ;;  %v6504_v8 = vrot.slane %v6485_v28, 2 }
 0xeed   :  { %v6454_v39 = vpop.permute.xlu0 %6453 }
 0xeee   :  { %v6460_v26 = vsel %vm212_vm7, %v6454_v39, %v6458_v30  ;;  %v6493_v30 = vsel %vm212_vm7, %v17573_v27, %v6491_v24 }
 0xeef   :  { %v6472_v48 = vmul.f32 %v6460_v26, %v6446_v3  ;;  %v6531_v3 = vrot.slane %v6482_v52, 2  ;;  %v6513_v14 = vrot.slane %v6493_v30, 5  ;;  %v6539_v42 = vrot.slane %v6493_v30, 6 }
 0xef0   :  { %v6465_v49 = vpop.permute.xlu1 %6464 }
 0xef1   :  { %v6473_v6 = vadd.f32 %v6472_v48, %v6471_v38  ;;  %v6462_v2 = vpop.permute.xlu0 %6461  ;;  %v6533_v38 = vrot.slane %v6485_v28, 3 }
 0xef2   :  { %v6467_v41 = vsel %vm212_vm7, %v6462_v2, %v6465_v49  ;;  %v6516_v2 = vrot.slane %v6496_v16, 6 }
 0xef3   :  { %16204 = vtanh.f32 %v6473_v6  ;;  %v6535_v6 = vrot.slane %v6488_v10, 4 }
 0xefd   :  { %v16205_v9 = vpop.eup %16204 }
 0xefe   :  { %v6475_v29 = vmul.f32 %v16205_v9, %v6467_v41 }
 0xf00   :  { %v6477_v63 = vrot.slane %v6475_v29, 6  ;;  %v6499_v62 = vsel %vm212_vm7, %v6475_v29, %v6497_v50  ;;  %v6541_v29 = vrot.slane %v6496_v16, 7 }
 0xf01   :  { %v6519_v9 = vrot.slane %v6499_v62, 7 }
 0xf02   :  { %v6479_v39 = vsel %vm212_vm7, %v17193_v57, %v6477_v63  ;;  %v6537_v57 = vrot.slane %v6490_v43, 5 }
 0xf03   :  { %v6521_v59 = vsel %vm171_vm0, %v6479_v39, %v6501_v5  ;;  %v6529_v26 = vrot.slane %v6479_v39, 1 }
 0xf04   :  { %v6522_v48 = vsel %vm173_vm1, %v6521_v59, %v6504_v8 }
 0xf05   :  { %v6523_v27 = vsel %vm175_vm2, %v6522_v48, %v6507_v34  ;;  %v6543_v49 = vsel %vm171_vm0, %v6529_v26, %v6531_v3 }
 0xf06   :  { %v6524_v36 = vsel %vm177_vm3, %v6523_v27, %v6510_v11  ;;  %v6544_v22 = vsel %vm173_vm1, %v6543_v49, %v6533_v38 }
 0xf07   :  { %v6525_v41 = vsel %vm179_vm4, %v6524_v36, %v6513_v14  ;;  %v6545_v52 = vsel %vm175_vm2, %v6544_v22, %v6535_v6 }
 0xf08   :  { %v6526_v10 = vsel %vm181_vm5, %v6525_v41, %v6516_v2  ;;  %v6546_v28 = vsel %vm177_vm3, %v6545_v52, %v6537_v57 }
 0xf09   :  { %v18055_v24 = vsel %vm183_vm6, %v6526_v10, %v6519_v9  ;;  %v6547_v63 = vsel %vm179_vm4, %v6546_v28, %v6539_v42 }
 0xf0a   :  { %v6548_v50 = vsel %vm181_vm5, %v6547_v63, %v6541_v29  ;;  %v7113_v23 = vsel %vm830_vm8, %v18055_v24, 0  ;;  %v13445_v63 = vld [vmem:[%s18650_s9] ss:$0 sm:$0xff]  ;;  %s16290_s9 = scalar_lea.vmem %s13389_s6, 32 }
 0xf0b   :  { %v18062_v35 = vsel %vm183_vm6, %v6548_v50, %v6499_v62  ;;  %v18064_v43 = vand.u32 4294901760, %v7113_v23  ;;  %v13446_v50 = vld [vmem:[%s18652_s11] ss:$0 sm:$0xff]  ;;  %p16291_p5 = scmp.ne.s32.totalorder %s13389_s6, %s16290_s9  ;;  %p16296_p7 = scmp.lt.s32.totalorder %s16290_s9, %s16290_s9 }
 0xf0c   :  { %v7116_v5 = vsel %vm830_vm8, %v18062_v35, 0 }
 0xf0d   :  { %v18068_v34 = vand.u32 4294901760, %v7116_v5  ;;  %v7192_v30 = vsub.f32 %v7113_v23, %v18064_v43  ;;  %p16297_p8 = por %p16296_p7, %p16295_p6 }
 0xf0f   :  { %v7202_v8 = vsub.f32 %v7116_v5, %v18068_v34  ;;  %v7193_v39 = vand.u32 4294901760, %v7192_v30  ;;  %p16298_p9 = pnand %p16297_p8, %p16291_p5 }
 0xf11   :  { %v7194_v16 = vsub.f32 %v7192_v30, %v7193_v39  ;;  %v18072_v3 = vand.u32 4294901760, %v7202_v8 }
 0xf13   :  { %v7195_v59 = vand.u32 4294901760, %v7194_v16  ;;  %v7204_v26 = vsub.f32 %v7202_v8, %v18072_v3 }
 0xf15   :  { %13942 = vmatprep.mubr.f32.mxu0 %v7195_v59  ;;  %14056 = vmatprep.mubr.f32.mxu1 %v7195_v59  ;;  %v7205_v11 = vand.u32 4294901760, %v7204_v26 }
 0xf17   :  { %13943 = vmatmul.mubr.f32.vlgmr.msra.gmra.mrb[12].mxu0 %v7205_v11  ;;  %14057 = vmatmul.mubr.f32.vlgmr.msra.gmra.mrb[10].mxu1 %v7205_v11 }
 0xf18   :  { %15481 = vmatpush3.bf16.msra.mxu0 %v17922_v46  ;;  %15577 = vmatpush3.bf16.msra.mxu1 %v17924_v61  ;;  %v13925_v46 = vpop.f32.mrb[8].mxu1 }
 0xf19   :  { %13961 = vmatprep.mubr.f32.mxu0 %v18064_v43  ;;  %14075 = vmatprep.mubr.f32.mxu1 %v18064_v43 }
 0xf1a   :  { %15483 = vmatprep.subr.bf16.mxu0 %v17940_v40  ;;  %15579 = vmatprep.subr.bf16.mxu1 %v17944_v31 }
 0xf1c   :  { %15485 = vmatpush3.bf16.msra.mxu0 %v17940_v40  ;;  %15581 = vmatpush3.bf16.msra.mxu1 %v17944_v31  ;;  %v18772_v31 = vld [vmem:[#allocation9_spill] sm:$0xff]  ;;  %v13444_v40 = vld [vmem:[%s18648_s7] ss:$0 sm:$0xff] }
 0xf1d   :  { %15487 = vmatprep.subr.bf16.mxu0 %v17952_v17  ;;  %15583 = vmatprep.subr.bf16.mxu1 %v17954_v12  ;;  %v15838_v61 = vadd.f32 %v13925_v46, %v13444_v40 }
 0xf1f   :  { %v8846_v29 = vsel %vm212_vm7, %v15838_v61, 0 }
 0xf20   :  { %15489 = vmatpush3.bf16.msra.mxu0 %v17952_v17  ;;  %15585 = vmatpush3.bf16.msra.mxu1 %v17954_v12  ;;  %v7087_v17 = vpop.f32.mrb[9].mxu1  ;;  %v18216_v10 = vand.u32 4294901760, %v8846_v29 }
 0xf21   :  { %15491 = vmatprep.subr.bf16.mxu0 %v17956_v19  ;;  %15587 = vmatprep.subr.bf16.mxu1 %v17958_v47 }
 0xf22   :  { %v18219_v28 = vsub.f32 %v8846_v29, %v18216_v10 }
 0xf24   :  { %15493 = vmatpush3.bf16.msra.mxu0 %v17956_v19  ;;  %15589 = vmatpush3.bf16.msra.mxu1 %v17958_v47  ;;  %v18773_v19 = vld [vmem:[#allocation10_spill] sm:$0xff] }
 0xf25   :  { %15495 = vmatprep.subr.bf16.mxu0 %v17962_v18  ;;  %15591 = vmatprep.subr.bf16.mxu1 %v17966_v25 }
 0xf27   :  { %13962 = vmatmul.mubr.f32.vlgmr.msra.gmra.mrb[12].mxu0 %v18068_v34  ;;  %14076 = vmatmul.mubr.f32.vlgmr.msra.gmra.mrb[10].mxu1 %v18068_v34 }
 0xf28   :  { %15497 = vmatpush3.bf16.msra.mxu0 %v17962_v18  ;;  %13980 = vmatprep.mubr.f32.mxu0 %v7192_v30  ;;  %v8296_v18 = vld [vmem:[%s18653_s12 + $0x8] sm:$0xff] }
 0xf29   :  { %15593 = vmatpush3.bf16.msra.mxu1 %v17966_v25  ;;  %14094 = vmatprep.mubr.f32.mxu1 %v7192_v30 }
 0xf2a   :  { %15499 = vmatprep.subr.bf16.mxu0 %v17970_v53  ;;  %15595 = vmatprep.subr.bf16.mxu1 %v17974_v4 }
 0xf2c   :  { %15501 = vmatpush3.bf16.msra.mxu0 %v17970_v53  ;;  %v8316_v53 = vand.u32 4294901760, %v8296_v18 }
 0xf2d   :  { %15597 = vmatpush3.bf16.msra.mxu1 %v17974_v4  ;;  %15503 = vmatprep.subr.bf16.mxu0 %v17976_v13 }
 0xf2e   :  { %15599 = vmatprep.subr.bf16.mxu1 %v17978_v15 }
 0xf30   :  { %15505 = vmatpush3.bf16.msra.mxu0 %v17976_v13 }
 0xf31   :  { %15601 = vmatpush3.bf16.msra.mxu1 %v17978_v15  ;;  %15507 = vmatprep.subr.bf16.mxu0 %v17980_v60  ;;  %v8410_v15 = vsub.f32 %v8296_v18, %v8316_v53 }
 0xf32   :  { %15603 = vmatprep.subr.bf16.mxu1 %v17982_v21 }
 0xf34   :  { %15509 = vmatpush3.bf16.msra.mxu0 %v17980_v60  ;;  %v8297_v60 = vld [vmem:[%s18653_s12 + $0x10] sm:$0xff] }
 0xf35   :  { %15605 = vmatpush3.bf16.msra.mxu1 %v17982_v21  ;;  %15511 = vmatprep.subr.bf16.mxu0 %v17799_v58  ;;  %v8298_v21 = vld [vmem:[%s18653_s12 + $0x18] sm:$0xff] }
 0xf36   :  { %15607 = vmatprep.subr.bf16.mxu1 %v17801_v7 }
 0xf37   :  { %13981 = vmatmul.mubr.f32.vlgmr.msra.gmra.mrb[12].mxu0 %v7202_v8 }
 0xf38   :  { %14095 = vmatmul.mubr.f32.vlgmr.msra.gmra.mrb[10].mxu1 %v7202_v8  ;;  %15513 = vmatpush3.bf16.msra.mxu0 %v17799_v58 }
 0xf39   :  { %13999 = vmatprep.mubr.f32.mxu0 %v7193_v39  ;;  %15609 = vmatpush3.bf16.msra.mxu1 %v17801_v7 }
 0xf3a   :  { %14113 = vmatprep.mubr.f32.mxu1 %v7193_v39  ;;  %15515 = vmatprep.subr.bf16.mxu0 %v17820_v37 }
 0xf3b   :  { %15611 = vmatprep.subr.bf16.mxu1 %v17822_v33 }
 0xf3c   :  { %15517 = vmatpush3.bf16.msra.mxu0 %v17820_v37 }
 0xf3d   :  { %15613 = vmatpush3.bf16.msra.mxu1 %v17822_v33  ;;  %15519 = vmatprep.subr.bf16.mxu0 %v17843_v0 }
 0xf3e   :  { %15615 = vmatprep.subr.bf16.mxu1 %v17849_v20 }
 0xf40   :  { %15521 = vmatpush3.bf16.msra.mxu0 %v17843_v0 }
 0xf41   :  { %15617 = vmatpush3.bf16.msra.mxu1 %v17849_v20  ;;  %15523 = vmatprep.subr.bf16.mxu0 %v18772_v31 }
 0xf42   :  { %15619 = vmatprep.subr.bf16.mxu1 %v18773_v19 }
 0xf44   :  { %15525 = vmatpush3.bf16.msra.mxu0 %v18772_v31 }
 0xf45   :  { %15621 = vmatpush3.bf16.msra.mxu1 %v18773_v19  ;;  %15527 = vmatprep.subr.bf16.mxu0 %v17988_v51 }
 0xf46   :  { %15623 = vmatprep.subr.bf16.mxu1 %v17994_v45 }
 0xf47   :  { %14000 = vmatmul.mubr.f32.vlgmr.msra.gmra.mrb[12].mxu0 %v18072_v3 }
 0xf48   :  { %14114 = vmatmul.mubr.f32.vlgmr.msra.gmra.mrb[10].mxu1 %v18072_v3  ;;  %15529 = vmatpush3.bf16.msra.mxu0 %v17988_v51  ;;  %v8319_v51 = vand.u32 4294901760, %v8297_v60 }
 0xf49   :  { %14018 = vmatprep.mubr.f32.mxu0 %v18064_v43  ;;  %15625 = vmatpush3.bf16.msra.mxu1 %v17994_v45  ;;  %v8322_v45 = vand.u32 4294901760, %v8298_v21 }
 0xf4a   :  { %14132 = vmatprep.mubr.f32.mxu1 %v18064_v43  ;;  %15531 = vmatprep.subr.bf16.mxu0 %v18000_v44 }
 0xf4b   :  { %15627 = vmatprep.subr.bf16.mxu1 %v18004_v55  ;;  %v8424_v38 = vsub.f32 %v8298_v21, %v8322_v45 }
 0xf4c   :  { %15533 = vmatpush3.bf16.msra.mxu0 %v18000_v44 }
 0xf4d   :  { %15629 = vmatpush3.bf16.msra.mxu1 %v18004_v55  ;;  %15535 = vmatprep.subr.bf16.mxu0 %v18006_v32  ;;  %v8411_v55 = vand.u32 4294901760, %v8410_v15  ;;  %v8425_v14 = vand.u32 4294901760, %v8424_v38 }
 0xf4e   :  { %15631 = vmatprep.subr.bf16.mxu1 %v18008_v56 }
 0xf4f   :  { %v8426_v57 = vsub.f32 %v8424_v38, %v8425_v14 }
 0xf50   :  { %15537 = vmatpush3.bf16.msra.mxu0 %v18006_v32  ;;  %v18200_v32 = vpack.c.bf16 %v8322_v45, %v8319_v51 }
 0xf51   :  { %15633 = vmatpush3.bf16.msra.mxu1 %v18008_v56  ;;  %15539 = vmatprep.subr.bf16.mxu0 %v18010_v54  ;;  %v8427_v36 = vand.u32 4294901760, %v8426_v57 }
 0xf52   :  { %15635 = vmatprep.subr.bf16.mxu1 %v18012_v1 }
 0xf54   :  { %15541 = vmatpush3.bf16.msra.mxu0 %v18010_v54  ;;  %v8412_v54 = vsub.f32 %v8410_v15, %v8411_v55 }
 0xf55   :  { %15637 = vmatpush3.bf16.msra.mxu1 %v18012_v1  ;;  %15543 = vmatprep.subr.bf16.mxu0 %v17799_v58  ;;  %v8417_v1 = vsub.f32 %v8297_v60, %v8319_v51 }
 0xf56   :  { %15639 = vmatprep.subr.bf16.mxu1 %v17801_v7  ;;  %v8413_v48 = vand.u32 4294901760, %v8412_v54 }
 0xf57   :  { %14019 = vmatmul.mubr.f32.vlgmr.msra.gmra.mrb[12].mxu0 %v18068_v34  ;;  %v8418_v6 = vand.u32 4294901760, %v8417_v1  ;;  %v18209_v9 = vpack.c.bf16 %v8424_v38, %v8417_v1 }
 0xf58   :  { %14133 = vmatmul.mubr.f32.vlgmr.msra.gmra.mrb[10].mxu1 %v18068_v34  ;;  %15545 = vmatpush3.bf16.msra.mxu0 %v17799_v58  ;;  %v15839_v58 = vadd.f32 %v13444_v40, %v7087_v17 }
 0xf59   :  { %14037 = vmatprep.mubr.f32.mxu0 %v18064_v43  ;;  %15641 = vmatpush3.bf16.msra.mxu1 %v17801_v7  ;;  %v8419_v49 = vsub.f32 %v8417_v1, %v8418_v6  ;;  %v18213_v52 = vpack.c.bf16 %v8425_v14, %v8418_v6 }
 0xf5a   :  { %14151 = vmatprep.mubr.f32.mxu1 %v18064_v43  ;;  %15547 = vmatprep.subr.bf16.mxu0 %v17820_v37  ;;  %v8843_v7 = vsel %vm212_vm7, %v15839_v58, 0  ;;  %v18228_v43 = vand.u32 4294901760, %v18219_v28 }
 0xf5b   :  { %15643 = vmatprep.subr.bf16.mxu1 %v17822_v33  ;;  %v18163_v12 = vand.u32 4294901760, %v8843_v7  ;;  %v8420_v2 = vand.u32 4294901760, %v8419_v49 }
 0xf5c   :  { %15549 = vmatpush3.bf16.msra.mxu0 %v17820_v37  ;;  %v8930_v11 = vsub.f32 %v18219_v28, %v18228_v43 }
 0xf5d   :  { %15645 = vmatpush3.bf16.msra.mxu1 %v17822_v33  ;;  %15551 = vmatprep.subr.bf16.mxu0 %v17843_v0  ;;  %v18169_v47 = vsub.f32 %v8843_v7, %v18163_v12  ;;  %v15666_v22 = vpack.c.bf16 %v8427_v36, %v8420_v2 }
 0xf5e   :  { %15647 = vmatprep.subr.bf16.mxu1 %v17849_v20 }
 0xf5f   :  { %v18173_v37 = vand.u32 4294901760, %v18169_v47 }
 0xf60   :  { %15553 = vmatpush3.bf16.msra.mxu0 %v17843_v0 }
 0xf61   :  { %15649 = vmatpush3.bf16.msra.mxu1 %v17849_v20  ;;  %15555 = vmatprep.subr.bf16.mxu0 %v18772_v31  ;;  %v8920_v33 = vsub.f32 %v18169_v47, %v18173_v37  ;;  %v8295_v20 = vld [vmem:[%s18653_s12] sm:$0xff] }
 0xf62   :  { %15651 = vmatprep.subr.bf16.mxu1 %v18773_v19  ;;  %v8313_v25 = vand.u32 4294901760, %v8295_v20 }
 0xf63   :  { %v18180_v0 = vand.u32 4294901760, %v8920_v33 }
 0xf64   :  { %15557 = vmatpush3.bf16.msra.mxu0 %v18772_v31  ;;  %v18190_v4 = vpack.c.bf16 %v8316_v53, %v8313_v25  ;;  %v8403_v13 = vsub.f32 %v8295_v20, %v8313_v25 }
 0xf65   :  { %15653 = vmatpush3.bf16.msra.mxu1 %v18773_v19  ;;  %v18235_v19 = vand.u32 4294901760, %v8930_v11 }
 0xf66   :  { %15655 = vmatprep.subr.bf16.mxu0 %v18190_v4  ;;  %v8404_v44 = vand.u32 4294901760, %v8403_v13  ;;  %v18207_v42 = vpack.c.bf16 %v8410_v15, %v8403_v13 }
 0xf67   :  { %14038 = vmatmul.mubr.f32.vlgmr.msra.gmra.mrb[12].mxu0 %v18068_v34 }
 0xf68   :  { %14152 = vmatmul.mubr.f32.vlgmr.msra.gmra.mrb[10].mxu1 %v18068_v34  ;;  %15657 = vmatpush3.bf16.msra.mxu0 %v18190_v4  ;;  %v8405_v56 = vsub.f32 %v8403_v13, %v8404_v44  ;;  %v18211_v41 = vpack.c.bf16 %v8411_v55, %v8404_v44  ;;  %v18252_v44 = vand.u32 4294901760, %v18055_v24 }
 0xf69   :  { %14222 = vmatprep.mubr.f32.mxu1 %v18180_v0  ;;  %15659 = vmatprep.subr.bf16.mxu0 %v18200_v32 }
 0xf6a   :  { %v8406_v62 = vand.u32 4294901760, %v8405_v56  ;;  %v18260_v55 = vsub.f32 %v18055_v24, %v18252_v44 }
 0xf6c   :  { %15661 = vmatpush3.bf16.msra.mxu0 %v18200_v32  ;;  %v18204_v27 = vpack.c.bf16 %v8413_v48, %v8406_v62  ;;  %v18266_v56 = vand.u32 4294901760, %v18260_v55 }
 0xf6e   :  { %15663 = vmatprep.subr.bf16.mxu0 %v18204_v27  ;;  %v9459_v24 = vsub.f32 %v18260_v55, %v18266_v56 }
 0xf70   :  { %v18278_v54 = vand.u32 4294901760, %v9459_v24 }
0x103a   :  { %v14039_v23 = vpop.f32.mrb[12].mxu0 }
0x103b   :  { %v18230_v5 = vadd.f32 %v14039_v23, %v13445_v63  ;;  %v14153_v34 = vpop.f32.mrb[10].mxu1  ;;  %v7688_v30 = vpop.f32.mrb[13].mxu0 }
0x103c   :  { %v15842_v8 = vadd.f32 %v14153_v34, %v13446_v50  ;;  %v15841_v39 = vadd.f32 %v13445_v63, %v7688_v30  ;;  %v8283_v16 = vpop.f32.mrb[11].mxu1 }
0x103d   :  { %v15843_v3 = vadd.f32 %v13446_v50, %v8283_v16 }
0x103e   :  { %16206 = vtanh.f32 %v15842_v8  ;;  %v8849_v59 = vsel %vm212_vm7, %v15841_v39, 0 }
0x103f   :  { %v8852_v26 = vand.u32 4294901760, %v8849_v59  ;;  %16208 = vtanh.f32 %v15843_v3 }
0x1041   :  { %v8939_v31 = vsub.f32 %v8849_v59, %v8852_v26  ;;  %14220 = vmatprep.subr.mxu1 %v8852_v26 }
0x1042   :  { %14221 = vmatpush3.xpose.msra.mxu1 %v8852_v26 }
0x1043   :  { %v8940_v40 = vand.u32 4294901760, %v8939_v31 }
0x1045   :  { %14223 = vmatmul.mubr.f32.vlgmr.msra.gmra.mrb[12].mxu1 %v18235_v19  ;;  %v8941_v46 = vsub.f32 %v8939_v31, %v8940_v40 }
0x1046   :  { %14227 = vmatprep.mubr.f32.mxu1 %v18163_v12 }
0x1047   :  { %v8942_v61 = vand.u32 4294901760, %v8941_v46 }
0x1048   :  { %v16207_v17 = vpop.eup %16206 }
0x1049   :  { %v16209_v58 = vpop.eup %16208  ;;  %v8310_v7 = vsel %vm212_vm7, %v16207_v17, 0  ;;  %14225 = vmatprep.subr.mxu1 %v8942_v61 }
0x104a   :  { %v18240_v33 = vand.u32 4294901760, %v8310_v7  ;;  %14226 = vmatpush3.xpose.msra.mxu1 %v8942_v61  ;;  %v8307_v20 = vsel %vm212_vm7, %v16209_v58, 0  ;;  %v10506_v61 = vsel %vm212_vm7, %v18230_v5, 0 }
0x104b   :  { %14230 = vmatprep.subr.mxu1 %v8939_v31  ;;  %v8381_v18 = vand.u32 4294901760, %v8307_v20  ;;  %v10509_v17 = vand.u32 4294901760, %v10506_v61 }
0x104c   :  { %v8392_v25 = vsub.f32 %v8310_v7, %v18240_v33 }
0x104d   :  { %14228 = vmatmul.mubr.f32.vlgmr.msra.gmra.mrb[12].mxu1 %v18216_v10  ;;  %v8382_v53 = vsub.f32 %v8307_v20, %v8381_v18  ;;  %v10596_v58 = vsub.f32 %v10506_v61, %v10509_v17 }
0x104e   :  { %14231 = vmatpush3.xpose.msra.mxu1 %v8939_v31  ;;  %14232 = vmatprep.mubr.f32.mxu1 %v18169_v47  ;;  %v8393_v13 = vand.u32 4294901760, %v8392_v25 }
0x104f   :  { %14235 = vmatprep.subr.mxu1 %v8852_v26  ;;  %v8383_v15 = vand.u32 4294901760, %v8382_v53  ;;  %v10597_v7 = vand.u32 4294901760, %v10596_v58 }
0x1050   :  { %v8394_v60 = vsub.f32 %v8392_v25, %v8393_v13 }
0x1051   :  { %v8384_v21 = vsub.f32 %v8382_v53, %v8383_v15 }
0x1052   :  { %v8395_v45 = vand.u32 4294901760, %v8394_v60 }
0x1053   :  { %v8385_v51 = vand.u32 4294901760, %v8384_v21 }
0x1055   :  { %14162 = vmatprep.mubr.f32.mxu0 %v8385_v51  ;;  %14233 = vmatmul.mubr.f32.vlgmr.msra.gmra.mrb[12].mxu1 %v18219_v28 }
0x1056   :  { %14163 = vmatmul.mubr.f32.vlgmr.msra.gmra.mrb[14].mxu0 %v8395_v45  ;;  %14236 = vmatpush3.xpose.msra.mxu1 %v8852_v26 }
0x1057   :  { %15665 = vmatpush3.bf16.msra.mxu0 %v18204_v27  ;;  %14173 = vmatprep.mubr.f32.mxu0 %v8381_v18 }
0x1058   :  { %14237 = vmatprep.mubr.f32.mxu1 %v18173_v37  ;;  %14240 = vmatprep.subr.mxu1 %v8940_v40 }
0x1059   :  { %15667 = vmatprep.subr.bf16.mxu0 %v15666_v22 }
0x105b   :  { %15669 = vmatpush3.bf16.msra.mxu0 %v15666_v22 }
0x105c   :  { %15671 = vmatprep.subr.bf16.mxu0 %v18207_v42 }
0x105d   :  { %14238 = vmatmul.mubr.f32.vlgmr.msra.gmra.mrb[12].mxu1 %v18228_v43 }
0x105e   :  { %14174 = vmatmul.mubr.f32.vlgmr.msra.gmra.mrb[14].mxu0 %v18240_v33  ;;  %14241 = vmatpush3.xpose.msra.mxu1 %v8940_v40 }
0x105f   :  { %15673 = vmatpush3.bf16.msra.mxu0 %v18207_v42  ;;  %14184 = vmatprep.mubr.f32.mxu0 %v8382_v53 }
0x1060   :  { %14242 = vmatprep.mubr.f32.mxu1 %v18163_v12  ;;  %14245 = vmatprep.subr.mxu1 %v8852_v26 }
0x1061   :  { %15675 = vmatprep.subr.bf16.mxu0 %v18209_v9 }
0x1063   :  { %15677 = vmatpush3.bf16.msra.mxu0 %v18209_v9 }
0x1064   :  { %15679 = vmatprep.subr.bf16.mxu0 %v18190_v4 }
0x1065   :  { %14243 = vmatmul.mubr.f32.vlgmr.msra.gmra.mrb[12].mxu1 %v18216_v10 }
0x1066   :  { %14185 = vmatmul.mubr.f32.vlgmr.msra.gmra.mrb[14].mxu0 %v8392_v25  ;;  %14246 = vmatpush3.xpose.msra.mxu1 %v8852_v26 }
0x1067   :  { %15681 = vmatpush3.bf16.msra.mxu0 %v18190_v4  ;;  %14195 = vmatprep.mubr.f32.mxu0 %v8383_v15 }
0x1068   :  { %14247 = vmatprep.mubr.f32.mxu1 %v18163_v12  ;;  %14250 = vmatprep.subr.mxu1 %v18252_v44 }
0x1069   :  { %15683 = vmatprep.subr.bf16.mxu0 %v18200_v32 }
0x106b   :  { %15685 = vmatpush3.bf16.msra.mxu0 %v18200_v32 }
0x106c   :  { %15687 = vmatprep.subr.bf16.mxu0 %v18211_v41 }
0x106d   :  { %14248 = vmatmul.mubr.f32.vlgmr.msra.gmra.mrb[12].mxu1 %v18216_v10 }
0x106e   :  { %14196 = vmatmul.mubr.f32.vlgmr.msra.gmra.mrb[14].mxu0 %v8393_v13  ;;  %14251 = vmatpush3.msra.mxu1 %v18252_v44 }
0x106f   :  { %15689 = vmatpush3.bf16.msra.mxu0 %v18211_v41  ;;  %14206 = vmatprep.mubr.f32.mxu0 %v8381_v18 }
0x1070   :  { %14255 = vmatprep.subr.mxu1 %v18278_v54  ;;  %15691 = vmatprep.subr.bf16.mxu0 %v18213_v52 }
0x1073   :  { %15693 = vmatpush3.bf16.msra.mxu0 %v18213_v52 }
0x1074   :  { %15695 = vmatprep.subr.bf16.mxu0 %v18190_v4 }
0x1076   :  { %14207 = vmatmul.mubr.f32.vlgmr.msra.gmra.mrb[14].mxu0 %v18240_v33 }
0x1077   :  { %15697 = vmatpush3.bf16.msra.mxu0 %v18190_v4  ;;  %14217 = vmatprep.mubr.f32.mxu0 %v8381_v18 }
0x1078   :  { %15699 = vmatprep.subr.bf16.mxu0 %v18200_v32 }
0x107b   :  { %15701 = vmatpush3.bf16.msra.mxu0 %v18200_v32 }
0x107c   :  { %14280 = vmatprep.subr.mxu0 %v18252_v44 }
0x107e   :  { %14218 = vmatmul.mubr.f32.vlgmr.msra.gmra.mrb[14].mxu0 %v18240_v33  ;;  %v10598_v33 = vsub.f32 %v10596_v58, %v10597_v7 }
0x107f   :  { %14281 = vmatpush3.msra.mxu0 %v18252_v44 }
0x1080   :  { %14285 = vmatprep.subr.mxu0 %v18278_v54  ;;  %v10599_v20 = vand.u32 4294901760, %v10598_v33 }
0x1140   :  { %v14249_v1 = vpop.f32.mrb[12].mxu1 }
0x1141   :  { %v9330_v38 = vpop.f32.mrb[13].mxu1  ;;  %v9344_v62 = vsel %vm9340_vm9, %v14249_v1, -inf }
0x1142   :  { %9345 = vmax.xlane.f32.xlu1 %v9344_v62  ;;  %v9341_v4 = vsel %vm9340_vm9, %v9330_v38, -inf }
0x1143   :  { %9342 = vmax.xlane.f32.xlu0 %v9341_v4 }
0x1151   :  { %v18295_v48 = vpop.f32.mrb[14].mxu0 }
0x1152   :  { %v18297_v32 = vpop.f32.mrb[15].mxu0 }
0x11cf   :  { %v9346_v6 = vpop.xlane.xlu1 %9345 }
0x11d0   :  { %v9348_v14 = vsub.f32 %v14249_v1, %v9346_v6  ;;  %v9343_v27 = vpop.xlane.xlu0 %9342 }
0x11d1   :  { %v9347_v49 = vsub.f32 %v9330_v38, %v9343_v27 }
0x11d2   :  { %v9351_v57 = vmul.f32 1.442695, %v9348_v14 }
0x11d3   :  { %v9349_v2 = vmul.f32 1.442695, %v9347_v49 }
0x11d5   :  { %16210 = vpow2.f32 %v9349_v2 }
0x11d6   :  { %16212 = vpow2.f32 %v9351_v57 }
0x11df   :  { %v16211_v36 = vpop.eup %16210 }
0x11e0   :  { %v9353_v22 = vsel %vm9340_vm9, %v16211_v36, 0.0  ;;  %v16213_v42 = vpop.eup %16212 }
0x11e1   :  { %9354 = vadd.xlane.f32.xlu0 %v9353_v22  ;;  %v9356_v9 = vsel %vm9340_vm9, %v16213_v42, 0.0 }
0x11e5   :  { %9357 = vadd.xlane.f32.xlu0 %v9356_v9 }
0x126e   :  { %v9355_v41 = vpop.xlane.xlu0 %9354 }
0x126f   :  { %16214 = vrcp.f32 %v9355_v41 }
0x1272   :  { %v9358_v52 = vpop.xlane.xlu0 %9357 }
0x1273   :  { %16216 = vrcp.f32 %v9358_v52 }
0x1279   :  { %v16215_v29 = vpop.eup %16214 }
0x127a   :  { %v9360_v63 = vmul.f32 %v16215_v29, %v16211_v36 }
0x127c   :  { %v9364_v50 = vsel %vm9340_vm9, %v9360_v63, 0 }
0x127d   :  { %v16217_v23 = vpop.eup %16216  ;;  %v9435_v34 = vand.u32 4294901760, %v9364_v50 }
0x127e   :  { %v9362_v30 = vmul.f32 %v16217_v23, %v16213_v42 }
0x127f   :  { %v9436_v8 = vsub.f32 %v9364_v50, %v9435_v34 }
0x1280   :  { %v9367_v39 = vsel %vm9340_vm9, %v9362_v30, 0 }
0x1281   :  { %v9437_v16 = vand.u32 4294901760, %v9436_v8  ;;  %v9445_v3 = vand.u32 4294901760, %v9367_v39 }
0x1283   :  { %v9438_v59 = vsub.f32 %v9436_v8, %v9437_v16  ;;  %v9446_v26 = vsub.f32 %v9367_v39, %v9445_v3 }
0x1285   :  { %v9439_v11 = vand.u32 4294901760, %v9438_v59  ;;  %v9447_v31 = vand.u32 4294901760, %v9446_v26 }
0x1287   :  { %14252 = vmatprep.mubr.f32.mxu1 %v9439_v11  ;;  %v9448_v40 = vsub.f32 %v9446_v26, %v9447_v31 }
0x1289   :  { %v9449_v46 = vand.u32 4294901760, %v9448_v40 }
0x128b   :  { %14253 = vmatmul.mubr.f32.vlgmr.msra.gmra.mrb[14].mxu1 %v9449_v46 }
0x128c   :  { %14256 = vmatpush3.msra.mxu1 %v18278_v54  ;;  %14257 = vmatprep.mubr.f32.mxu1 %v9435_v34 }
0x128d   :  { %14260 = vmatprep.subr.mxu1 %v18260_v55 }
0x1293   :  { %14258 = vmatmul.mubr.f32.vlgmr.msra.gmra.mrb[14].mxu1 %v9445_v3 }
0x1294   :  { %14261 = vmatpush3.msra.mxu1 %v18260_v55  ;;  %14262 = vmatprep.mubr.f32.mxu1 %v9436_v8 }
0x1295   :  { %14265 = vmatprep.subr.mxu1 %v18252_v44 }
0x129b   :  { %14263 = vmatmul.mubr.f32.vlgmr.msra.gmra.mrb[14].mxu1 %v9446_v26 }
0x129c   :  { %14266 = vmatpush3.msra.mxu1 %v18252_v44  ;;  %14267 = vmatprep.mubr.f32.mxu1 %v9437_v16 }
0x129d   :  { %14270 = vmatprep.subr.mxu1 %v18266_v56 }
0x12a3   :  { %14268 = vmatmul.mubr.f32.vlgmr.msra.gmra.mrb[14].mxu1 %v9447_v31 }
0x12a4   :  { %14271 = vmatpush3.msra.mxu1 %v18266_v56  ;;  %14272 = vmatprep.mubr.f32.mxu1 %v9435_v34 }
0x12a5   :  { %14275 = vmatprep.subr.mxu1 %v18252_v44 }
0x12ab   :  { %14273 = vmatmul.mubr.f32.vlgmr.msra.gmra.mrb[14].mxu1 %v9445_v3 }
0x12ac   :  { %14276 = vmatpush3.msra.mxu1 %v18252_v44  ;;  %14277 = vmatprep.mubr.f32.mxu1 %v9435_v34 }
0x12ad   :  { %14310 = vmatprep.subr.mxu1 %v10509_v17 }
0x12b3   :  { %14278 = vmatmul.mubr.f32.vlgmr.msra.gmra.mrb[14].mxu1 %v9445_v3 }
0x12b4   :  { %14311 = vmatpush3.xpose.msra.mxu1 %v10509_v17  ;;  %14312 = vmatprep.mubr.f32.mxu1 %v18180_v0  ;;  %v18322_v0 = vand.u32 4294901760, %v18062_v35 }
0x12b5   :  { %14315 = vmatprep.subr.mxu1 %v10599_v20 }
0x12b6   :  { %v18328_v5 = vsub.f32 %v18062_v35, %v18322_v0  ;;  %v13447_v35 = vld [vmem:[%s18654_s13] ss:$0 sm:$0xff] }
0x12b7   :  { %14313 = vmatmul.mubr.f32.vlgmr.msra.gmra.mrb[16].mxu1 %v18235_v19  ;;  %v15845_v25 = vadd.f32 %v13447_v35, %v18297_v32 }
0x12b8   :  { %14316 = vmatpush3.xpose.msra.mxu1 %v10599_v20  ;;  %14317 = vmatprep.mubr.f32.mxu1 %v18163_v12 }
0x12b9   :  { %14320 = vmatprep.subr.mxu1 %v10596_v58  ;;  %v9859_v13 = vsel %vm9858_vm10, %v15845_v25, -inf }
0x12ba   :  { %v9860_v15 = vrot.slane %v9859_v13, 4 }
0x12bc   :  { %v9861_v21 = vmax.f32 %v9859_v13, %v9860_v15 }
0x12be   :  { %v9862_v45 = vrot.slane %v9861_v21, 2 }
0x12bf   :  { %14318 = vmatmul.mubr.f32.vlgmr.msra.gmra.mrb[16].mxu1 %v18216_v10 }
0x12c0   :  { %14321 = vmatpush3.xpose.msra.mxu1 %v10596_v58  ;;  %14322 = vmatprep.mubr.f32.mxu1 %v18169_v47  ;;  %v18332_v47 = vand.u32 4294901760, %v18328_v5  ;;  %v9863_v1 = vmax.f32 %v9861_v21, %v9862_v45 }
0x12c1   :  { %14325 = vmatprep.subr.mxu1 %v10509_v17 }
0x12c2   :  { %v9864_v62 = vrot.slane %v9863_v1, 1 }
0x12c7   :  { %14323 = vmatmul.mubr.f32.vlgmr.msra.gmra.mrb[16].mxu1 %v18219_v28 }
0x12c8   :  { %14326 = vmatpush3.xpose.msra.mxu1 %v10509_v17  ;;  %14327 = vmatprep.mubr.f32.mxu1 %v18173_v37  ;;  %v11115_v37 = vsub.f32 %v18328_v5, %v18332_v47 }
0x12c9   :  { %14330 = vmatprep.subr.mxu1 %v10597_v7 }
0x12ca   :  { %v18339_v28 = vand.u32 4294901760, %v11115_v37 }
0x12cf   :  { %14328 = vmatmul.mubr.f32.vlgmr.msra.gmra.mrb[16].mxu1 %v18228_v43  ;;  %v15844_v43 = vadd.f32 %v18295_v48, %v13447_v35  ;;  %v9865_v48 = vmax.f32 %v9863_v1, %v9864_v62 }
0x12d0   :  { %14331 = vmatpush3.xpose.msra.mxu1 %v10597_v7  ;;  %14332 = vmatprep.mubr.f32.mxu1 %v18163_v12 }
0x12d1   :  { %14335 = vmatprep.subr.mxu1 %v10509_v17  ;;  %v11514_v19 = vsel %vm9858_vm10, %v15844_v43, -inf  ;;  %v9866_v14 = vsub.f32 %v15845_v25, %v9865_v48 }
0x12d3   :  { %v9867_v27 = vmul.f32 1.442695, %v9866_v14 }
0x12d7   :  { %14333 = vmatmul.mubr.f32.vlgmr.msra.gmra.mrb[16].mxu1 %v18216_v10 }
0x12d8   :  { %14336 = vmatpush3.xpose.msra.mxu1 %v10509_v17  ;;  %14337 = vmatprep.mubr.f32.mxu1 %v18163_v12 }
0x12d9   :  { %14370 = vmatprep.subr.mxu1 %v18322_v0 }
0x12df   :  { %14338 = vmatmul.mubr.f32.vlgmr.msra.gmra.mrb[16].mxu1 %v18216_v10  ;;  %v11515_v10 = vrot.slane %v11514_v19, 4 }
0x12e0   :  { %14371 = vmatpush3.msra.mxu1 %v18322_v0 }
0x12e1   :  { %14375 = vmatprep.subr.mxu1 %v18339_v28  ;;  %v11516_v53 = vmax.f32 %v11514_v19, %v11515_v10 }
0x12e3   :  { %v11517_v60 = vrot.slane %v11516_v53, 2 }
0x12e5   :  { %v11518_v51 = vmax.f32 %v11516_v53, %v11517_v60 }
0x12e7   :  { %v11519_v24 = vrot.slane %v11518_v51, 1 }
0x12e9   :  { %v11520_v38 = vmax.f32 %v11518_v51, %v11519_v24 }
0x12eb   :  { %v11521_v4 = vsub.f32 %v15844_v43, %v11520_v38 }
0x12ed   :  { %v11522_v6 = vmul.f32 1.442695, %v11521_v4 }
0x12ef   :  { %16218 = vpow2.f32 %v11522_v6 }
0x12f0   :  { %16220 = vpow2.f32 %v9867_v27 }
0x12f9   :  { %v16219_v2 = vpop.eup %16218 }
0x12fa   :  { %v11524_v22 = vsel %vm9858_vm10, %v16219_v2, 0.0  ;;  %v16221_v9 = vpop.eup %16220 }
0x12fb   :  { %v11525_v42 = vrot.slane %v11524_v22, 4  ;;  %v9869_v52 = vsel %vm9858_vm10, %v16221_v9, 0.0 }
0x12fc   :  { %v9870_v29 = vrot.slane %v9869_v52, 4 }
0x12fd   :  { %v11526_v41 = vadd.f32 %v11525_v42, %v11524_v22 }
0x12fe   :  { %v9871_v50 = vadd.f32 %v9870_v29, %v9869_v52 }
0x12ff   :  { %v11527_v63 = vrot.slane %v11526_v41, 2 }
0x1300   :  { %v9872_v34 = vrot.slane %v9871_v50, 2 }
0x1301   :  { %v11528_v23 = vadd.f32 %v11527_v63, %v11526_v41 }
0x1302   :  { %v9873_v8 = vadd.f32 %v9872_v34, %v9871_v50 }
0x1303   :  { %v11529_v30 = vrot.slane %v11528_v23, 1 }
0x1304   :  { %v9874_v16 = vrot.slane %v9873_v8, 1 }
0x1305   :  { %v11530_v39 = vadd.f32 %v11529_v30, %v11528_v23 }
0x1306   :  { %v9875_v3 = vadd.f32 %v9874_v16, %v9873_v8 }
0x1307   :  { %16222 = vrcp.f32 %v11530_v39 }
0x1308   :  { %16224 = vrcp.f32 %v9875_v3 }
0x1311   :  { %v16223_v59 = vpop.eup %16222 }
0x1312   :  { %v11532_v26 = vmul.f32 %v16223_v59, %v16219_v2  ;;  %v16225_v11 = vpop.eup %16224 }
0x1313   :  { %v9877_v31 = vmul.f32 %v16225_v11, %v16221_v9 }
0x1386   :  { %v18347_v12 = vpop.f32.mrb[14].mxu1 }
0x1387   :  { %v18350_v18 = vpop.f32.mrb[15].mxu1 }
0x13b2   :  { %v14339_v32 = vpop.f32.mrb[16].mxu1 }
0x13b3   :  { %v10987_v49 = vpop.f32.mrb[17].mxu1  ;;  %v11000_v57 = vsel %vm9340_vm9, %v14339_v32, -inf }
0x13b4   :  { %11001 = vmax.xlane.f32.xlu0 %v11000_v57  ;;  %v10997_v36 = vsel %vm9340_vm9, %v10987_v49, -inf }
0x13b5   :  { %10998 = vmax.xlane.f32.xlu1 %v10997_v36 }
0x13e1   :  { %11533 = vxpose.xlu0.b32.start.end [1/1] (short) (narrow) %v11532_v26, 16 }
0x13e8   :  { %9878 = vxpose.xlu1.b32.start.end [1/1] (short) (narrow) %v9877_v31, 16 }
0x1441   :  { %v11002_v40 = vpop.xlane.xlu0 %11001 }
0x1442   :  { %v11004_v46 = vsub.f32 %v14339_v32, %v11002_v40  ;;  %v10999_v61 = vpop.xlane.xlu1 %10998 }
0x1443   :  { %v11003_v17 = vsub.f32 %v10987_v49, %v10999_v61 }
0x1444   :  { %v11007_v58 = vmul.f32 1.442695, %v11004_v46 }
0x1445   :  { %v11005_v7 = vmul.f32 1.442695, %v11003_v17 }
0x1446   :  { %16226 = vpow2.f32 %v11007_v58 }
0x1447   :  { %16228 = vpow2.f32 %v11005_v7 }
0x1450   :  { %v18358_v33 = vpop.eup %16226 }
0x1451   :  { %v18360_v20 = vpop.eup %16228  ;;  %v11012_v37 = vsel %vm9340_vm9, %v18358_v33, 0.0 }
0x1452   :  { %11013 = vadd.xlane.f32.xlu1 %v11012_v37  ;;  %v11009_v35 = vsel %vm9340_vm9, %v18360_v20, 0.0 }
0x1453   :  { %11010 = vadd.xlane.f32.xlu0 %v11009_v35 }
0x1461   :  { %v11549_v43 = vpop.trf.xlu0 }
0x1462   :  { %v11566_v19 = vsel %vm9340_vm9, %v11549_v43, 0 }
0x1463   :  { %v11637_v10 = vand.u32 4294901760, %v11566_v19 }
0x1465   :  { %v11638_v25 = vsub.f32 %v11566_v19, %v11637_v10  ;;  %v11550_v53 = vpop.trf.xlu0 }
0x1466   :  { %v11569_v13 = vsel %vm9340_vm9, %v11550_v53, 0 }
0x1467   :  { %v11639_v15 = vand.u32 4294901760, %v11638_v25  ;;  %v11647_v60 = vand.u32 4294901760, %v11569_v13 }
0x1468   :  { %v9894_v21 = vpop.trf.xlu1 }
0x1469   :  { %v11648_v51 = vsub.f32 %v11569_v13, %v11647_v60  ;;  %v9911_v45 = vsel %vm9340_vm9, %v9894_v21, 0  ;;  %v11640_v24 = vsub.f32 %v11638_v25, %v11639_v15 }
0x146a   :  { %v9982_v1 = vand.u32 4294901760, %v9911_v45 }
0x146b   :  { %v11649_v38 = vand.u32 4294901760, %v11648_v51  ;;  %v11641_v62 = vand.u32 4294901760, %v11640_v24 }
0x146c   :  { %v9983_v4 = vsub.f32 %v9911_v45, %v9982_v1  ;;  %v9895_v48 = vpop.trf.xlu1 }
0x146d   :  { %v11650_v6 = vsub.f32 %v11648_v51, %v11649_v38  ;;  %v9914_v14 = vsel %vm9340_vm9, %v9895_v48, 0  ;;  %14372 = vmatprep.mubr.f32.mxu1 %v11641_v62 }
0x146e   :  { %v9984_v27 = vand.u32 4294901760, %v9983_v4  ;;  %v9992_v32 = vand.u32 4294901760, %v9914_v14 }
0x146f   :  { %v11651_v49 = vand.u32 4294901760, %v11650_v6 }
0x1470   :  { %v9993_v57 = vsub.f32 %v9914_v14, %v9992_v32  ;;  %v9985_v2 = vsub.f32 %v9983_v4, %v9984_v27 }
0x1471   :  { %14373 = vmatmul.mubr.f32.vlgmr.msra.gmra.mrb[18].mxu1 %v11651_v49 }
0x1472   :  { %v9994_v36 = vand.u32 4294901760, %v9993_v57  ;;  %14376 = vmatpush3.msra.mxu1 %v18339_v28  ;;  %v9986_v22 = vand.u32 4294901760, %v9985_v2  ;;  %14377 = vmatprep.mubr.f32.mxu1 %v11637_v10 }
0x1473   :  { %14380 = vmatprep.subr.mxu1 %v18328_v5 }
0x1474   :  { %v9995_v42 = vsub.f32 %v9993_v57, %v9994_v36  ;;  %14282 = vmatprep.mubr.f32.mxu0 %v9986_v22 }
0x1476   :  { %v9996_v9 = vand.u32 4294901760, %v9995_v42 }
0x1478   :  { %14283 = vmatmul.mubr.f32.vlgmr.msra.gmra.mrb[16].mxu0 %v9996_v9 }
0x1479   :  { %14286 = vmatpush3.msra.mxu0 %v18278_v54  ;;  %14287 = vmatprep.mubr.f32.mxu0 %v9982_v1 }
0x147a   :  { %14290 = vmatprep.subr.mxu0 %v18260_v55  ;;  %14378 = vmatmul.mubr.f32.vlgmr.msra.gmra.mrb[18].mxu1 %v11647_v60 }
0x147b   :  { %14381 = vmatpush3.msra.mxu1 %v18328_v5  ;;  %14382 = vmatprep.mubr.f32.mxu1 %v11638_v25 }
0x147c   :  { %14385 = vmatprep.subr.mxu1 %v18322_v0 }
0x1480   :  { %14288 = vmatmul.mubr.f32.vlgmr.msra.gmra.mrb[16].mxu0 %v9992_v32 }
0x1481   :  { %14291 = vmatpush3.msra.mxu0 %v18260_v55  ;;  %14292 = vmatprep.mubr.f32.mxu0 %v9983_v4 }
0x1482   :  { %14295 = vmatprep.subr.mxu0 %v18252_v44  ;;  %14383 = vmatmul.mubr.f32.vlgmr.msra.gmra.mrb[18].mxu1 %v11648_v51 }
0x1483   :  { %14386 = vmatpush3.msra.mxu1 %v18322_v0  ;;  %14387 = vmatprep.mubr.f32.mxu1 %v11639_v15 }
0x1484   :  { %14390 = vmatprep.subr.mxu1 %v18332_v47 }
0x1488   :  { %14293 = vmatmul.mubr.f32.vlgmr.msra.gmra.mrb[16].mxu0 %v9993_v57 }
0x1489   :  { %14296 = vmatpush3.msra.mxu0 %v18252_v44  ;;  %14297 = vmatprep.mubr.f32.mxu0 %v9984_v27 }
0x148a   :  { %14300 = vmatprep.subr.mxu0 %v18266_v56  ;;  %14388 = vmatmul.mubr.f32.vlgmr.msra.gmra.mrb[18].mxu1 %v11649_v38 }
0x148b   :  { %14391 = vmatpush3.msra.mxu1 %v18332_v47  ;;  %14392 = vmatprep.mubr.f32.mxu1 %v11637_v10 }
0x148c   :  { %14395 = vmatprep.subr.mxu1 %v18322_v0 }
0x1490   :  { %14298 = vmatmul.mubr.f32.vlgmr.msra.gmra.mrb[16].mxu0 %v9994_v36 }
0x1491   :  { %14301 = vmatpush3.msra.mxu0 %v18266_v56  ;;  %14302 = vmatprep.mubr.f32.mxu0 %v9982_v1 }
0x1492   :  { %14305 = vmatprep.subr.mxu0 %v18252_v44  ;;  %14393 = vmatmul.mubr.f32.vlgmr.msra.gmra.mrb[18].mxu1 %v11647_v60 }
0x1493   :  { %14396 = vmatpush3.msra.mxu1 %v18322_v0  ;;  %14397 = vmatprep.mubr.f32.mxu1 %v11637_v10 }
0x1498   :  { %14303 = vmatmul.mubr.f32.vlgmr.msra.gmra.mrb[16].mxu0 %v9992_v32 }
0x1499   :  { %14306 = vmatpush3.msra.mxu0 %v18252_v44  ;;  %14307 = vmatprep.mubr.f32.mxu0 %v9982_v1  ;;  %v13448_v1 = vld [vmem:[%s18656_s15] ss:$0 sm:$0xff]  ;;  %s16321_s15 = smov 127  }
0x149a   :  { %14340 = vmatprep.subr.mxu0 %v18322_v0  ;;  %14398 = vmatmul.mubr.f32.vlgmr.msra.gmra.mrb[18].mxu1 %v11647_v60 }
0x14a0   :  { %14308 = vmatmul.mubr.f32.vlgmr.msra.gmra.mrb[16].mxu0 %v9992_v32 }
0x14a1   :  { %14341 = vmatpush3.msra.mxu0 %v18322_v0 }
0x14a2   :  { %14345 = vmatprep.subr.mxu0 %v18339_v28 }
0x14df   :  { %v11014_v55 = vpop.xlane.xlu1 %11013 }
0x14e0   :  { %16230 = vrcp.f32 %v11014_v55  ;;  %v11011_v56 = vpop.xlane.xlu0 %11010 }
0x14e1   :  { %16232 = vrcp.f32 %v11011_v56 }
0x14ea   :  { %v16231_v54 = vpop.eup %16230 }
0x14eb   :  { %v16233_v41 = vpop.eup %16232  ;;  %v11018_v52 = vmul.f32 %v16231_v54, %v18358_v33  ;;  %v18776_v33 = vld [vmem:[#allocation12_spill] sm:$0xff] }
0x14ec   :  { %v11016_v29 = vmul.f32 %v16233_v41, %v18360_v20 }
0x14ed   :  { %v11023_v44 = vsel %vm9340_vm9, %v11018_v52, 0 }
0x14ee   :  { %v11020_v63 = vsel %vm9340_vm9, %v11016_v29, 0  ;;  %v11101_v50 = vand.u32 4294901760, %v11023_v44 }
0x14ef   :  { %v11091_v23 = vand.u32 4294901760, %v11020_v63 }
0x14f0   :  { %v11102_v34 = vsub.f32 %v11023_v44, %v11101_v50 }
0x14f1   :  { %v11092_v30 = vsub.f32 %v11020_v63, %v11091_v23 }
0x14f2   :  { %v11103_v8 = vand.u32 4294901760, %v11102_v34 }
0x14f3   :  { %v11093_v39 = vand.u32 4294901760, %v11092_v30 }
0x14f4   :  { %v11104_v16 = vsub.f32 %v11102_v34, %v11103_v8 }
0x14f5   :  { %v11094_v3 = vsub.f32 %v11092_v30, %v11093_v39 }
0x14f6   :  { %v11105_v26 = vand.u32 4294901760, %v11104_v16 }
0x14f7   :  { %v11095_v59 = vand.u32 4294901760, %v11094_v3 }
0x14f9   :  { %14342 = vmatprep.mubr.f32.mxu0 %v11095_v59 }
0x14fa   :  { %14343 = vmatmul.mubr.f32.vlgmr.msra.gmra.mrb[18].mxu0 %v11105_v26 }
0x14fb   :  { %14346 = vmatpush3.msra.mxu0 %v18339_v28  ;;  %14347 = vmatprep.mubr.f32.mxu0 %v11091_v23  ;;  %v18774_v28 = vld [vmem:[#allocation11_spill] sm:$0xff] }
0x14fc   :  { %14350 = vmatprep.subr.mxu0 %v18328_v5  ;;  %v18775_v11 = vsub.s32 1, %v18774_v28 }
0x1502   :  { %14348 = vmatmul.mubr.f32.vlgmr.msra.gmra.mrb[18].mxu0 %v11101_v50 }
0x1503   :  { %14351 = vmatpush3.msra.mxu0 %v18328_v5  ;;  %14352 = vmatprep.mubr.f32.mxu0 %v11092_v30  ;;  %v8840_v5 = vld [vmem:[%s18655_s14] sm:$0x3] }
0x1504   :  { %14355 = vmatprep.subr.mxu0 %v18322_v0  ;;  %v10440_v31 = vrot.slane %v8840_v5, %v18775_v11  ;;  %v10408_v20 = vrot.slane %v8840_v5, %v18776_v33 }
0x1506   :  { %v10410_v43 = vmul.f32 %v18347_v12, %v10408_v20  ;;  %v10409_v10 = vmul.f32 %v10408_v20, %v18350_v18 }
0x1508   :  { %v10414_v53 = vsel %vm830_vm8, %v10410_v43, 0.0  ;;  %v10411_v13 = vsel %vm830_vm8, %v10409_v10, 0.0 }
0x150a   :  { %14353 = vmatmul.mubr.f32.vlgmr.msra.gmra.mrb[18].mxu0 %v11102_v34 }
0x150b   :  { %14356 = vmatpush3.msra.mxu0 %v18322_v0  ;;  %14357 = vmatprep.mubr.f32.mxu0 %v11093_v39 }
0x150c   :  { %14360 = vmatprep.subr.mxu0 %v18332_v47 }
0x1512   :  { %14358 = vmatmul.mubr.f32.vlgmr.msra.gmra.mrb[18].mxu0 %v11103_v8 }
0x1513   :  { %14361 = vmatpush3.msra.mxu0 %v18332_v47  ;;  %14362 = vmatprep.mubr.f32.mxu0 %v11091_v23 }
0x1514   :  { %14365 = vmatprep.subr.mxu0 %v18322_v0 }
0x151a   :  { %14363 = vmatmul.mubr.f32.vlgmr.msra.gmra.mrb[18].mxu0 %v11101_v50 }
0x151b   :  { %14366 = vmatpush3.msra.mxu0 %v18322_v0  ;;  %14367 = vmatprep.mubr.f32.mxu0 %v11091_v23 }
0x1522   :  { %14368 = vmatmul.mubr.f32.vlgmr.msra.gmra.mrb[18].mxu0 %v11101_v50  ;;  %v16322_v50 = vmov 0  }
0x1523   :  { %16092 = vset.pattern.permute.xlu0 %v16322_v50  ;;  %16093 = vset.pattern.permute.xlu1 %v16322_v50 }
0x156d   :  { %v18409_v40 = vpop.f32.mrb[18].mxu1 }
0x156e   :  { %v12083_v46 = vmul.f32 %v18409_v40, %v10440_v31  ;;  %v18412_v47 = vpop.f32.mrb[19].mxu1 }
0x156f   :  { %v12082_v61 = vmul.f32 %v18412_v47, %v10440_v31 }
0x1570   :  { %v12087_v19 = vsel %vm830_vm8, %v12083_v46, 0.0 }
0x1571   :  { %v12084_v25 = vsel %vm830_vm8, %v12082_v61, 0.0 }
0x1573   :  { %v18415_v17 = vpop.f32.mrb[16].mxu0 }
0x1574   :  { %v10442_v0 = vmul.f32 %v18415_v17, %v10440_v31  ;;  %v18418_v58 = vpop.f32.mrb[17].mxu0 }
0x1575   :  { %v10441_v7 = vmul.f32 %v10440_v31, %v18418_v58 }
0x1576   :  { %v10446_v37 = vsel %vm830_vm8, %v10442_v0, 0.0 }
0x1577   :  { %10447 = vadd.xlane.f32.xlu0 %v10446_v37  ;;  %v10443_v35 = vsel %vm830_vm8, %v10441_v7, 0.0 }
0x1578   :  { %10444 = vadd.xlane.f32.xlu1 %v10443_v35 }
0x157b   :  { %12088 = vadd.xlane.f32.xlu0 %v12087_v19 }
0x157c   :  { %12085 = vadd.xlane.f32.xlu1 %v12084_v25 }
0x157f   :  { %10415 = vadd.xlane.f32.xlu0 %v10414_v53 }
0x1580   :  { %10412 = vadd.xlane.f32.xlu1 %v10411_v13 }
0x15f5   :  { %v18430_v15 = vpop.f32.mrb[18].mxu0 }
0x15f6   :  { %v12061_v60 = vmul.f32 %v18430_v15, %v10408_v20  ;;  %v18433_v21 = vpop.f32.mrb[19].mxu0 }
0x15f7   :  { %v12060_v51 = vmul.f32 %v18433_v21, %v10408_v20 }
0x15f8   :  { %v12065_v45 = vsel %vm830_vm8, %v12061_v60, 0.0 }
0x15f9   :  { %12066 = vadd.xlane.f32.xlu0 %v12065_v45  ;;  %v12062_v24 = vsel %vm830_vm8, %v12060_v51, 0.0 }
0x15fa   :  { %12063 = vadd.xlane.f32.xlu1 %v12062_v24 }
0x1604   :  { %v10448_v38 = vpop.xlane.xlu0 %10447 }
0x1605   :  { %v10450_v62 = vadd.f32 %v13448_v1, %v10448_v38  ;;  %v10445_v4 = vpop.xlane.xlu1 %10444 }
0x1606   :  { %v10449_v48 = vadd.f32 %v13448_v1, %v10445_v4 }
0x1607   :  { %v13452_v6 = vmul.f32 -1.442695, %v10450_v62 }
0x1608   :  { %v13451_v14 = vmul.f32 -1.442695, %v10449_v48  ;;  %v12089_v27 = vpop.xlane.xlu0 %12088 }
0x1609   :  { %16234 = vpow2.f32 %v13452_v6  ;;  %v12091_v32 = vadd.f32 %v13448_v1, %v12089_v27  ;;  %v12086_v49 = vpop.xlane.xlu1 %12085 }
0x160a   :  { %16236 = vpow2.f32 %v13451_v14  ;;  %v12090_v57 = vadd.f32 %v13448_v1, %v12086_v49  ;;  %v12146_v49 = vld [vmem:[%s18657_s16] sm:$0xff] }
0x160b   :  { %v13456_v2 = vmul.f32 -1.442695, %v12091_v32 }
0x160c   :  { %v13455_v36 = vmul.f32 -1.442695, %v12090_v57  ;;  %v10416_v34 = vpop.xlane.xlu0 %10415  ;;  %v12147_v57 = vld [vmem:[%s18657_s16 + $0x8] sm:$0xff] }
0x160d   :  { %16238 = vpow2.f32 %v13456_v2  ;;  %v10413_v30 = vpop.xlane.xlu1 %10412  ;;  %v10424_v8 = vadd.f32 %v13448_v1, %v10416_v34  ;;  %v12174_v2 = vand.u32 4294901760, %v12146_v49 }
0x160e   :  { %16240 = vpow2.f32 %v13455_v36  ;;  %v10423_v39 = vadd.f32 %v13448_v1, %v10413_v30  ;;  %v12177_v36 = vand.u32 4294901760, %v12147_v57 }
0x160f   :  { %v13450_v16 = vmul.f32 -1.442695, %v10424_v8  ;;  %v12152_v8 = vld [vmem:[%s18657_s16 + $0x30] sm:$0xff] }
0x1610   :  { %v13449_v3 = vmul.f32 -1.442695, %v10423_v39  ;;  %v12153_v39 = vld [vmem:[%s18657_s16 + $0x38] sm:$0xff] }
0x1613   :  { %v16235_v22 = vpop.eup %16234 }
0x1614   :  { %v16237_v42 = vpop.eup %16236  ;;  %v10458_v9 = vadd.f32 1.0, %v16235_v22  ;;  %v18447_v22 = vpack.c.bf16 %v12177_v36, %v12174_v2 }
0x1615   :  { %v10457_v55 = vadd.f32 1.0, %v16237_v42  ;;  %v12148_v42 = vld [vmem:[%s18657_s16 + $0x10] sm:$0xff] }
0x1616   :  { %16242 = vrcp.f32 %v10458_v9  ;;  %v12149_v9 = vld [vmem:[%s18657_s16 + $0x18] sm:$0xff]  ;;  %15703 = vmatprep.subr.bf16.mxu0 %v18447_v22 }
0x1617   :  { %v16239_v56 = vpop.eup %16238  ;;  %16244 = vrcp.f32 %v10457_v55  ;;  %v12180_v55 = vand.u32 4294901760, %v12148_v42  ;;  %15705 = vmatpush3.bf16.msra.mxu0 %v18447_v22 }
0x1618   :  { %v16241_v54 = vpop.eup %16240  ;;  %v12099_v52 = vadd.f32 1.0, %v16239_v56  ;;  %v12183_v56 = vand.u32 4294901760, %v12149_v9 }
0x1619   :  { %v12098_v41 = vadd.f32 1.0, %v16241_v54 }
0x161a   :  { %v18457_v54 = vpack.c.bf16 %v12183_v56, %v12180_v55 }
0x161b   :  { %16246 = vrcp.f32 %v12098_v41  ;;  %v12150_v41 = vld [vmem:[%s18657_s16 + $0x20] sm:$0xff] }
0x161c   :  { %16248 = vrcp.f32 %v12099_v52  ;;  %v12151_v52 = vld [vmem:[%s18657_s16 + $0x28] sm:$0xff]  ;;  %15707 = vmatprep.subr.bf16.mxu0 %v18457_v54 }
0x161d   :  { %16250 = vpow2.f32 %v13450_v16  ;;  %15709 = vmatpush3.bf16.msra.mxu0 %v18457_v54 }
0x161e   :  { %16252 = vpow2.f32 %v13449_v3  ;;  %v12192_v3 = vand.u32 4294901760, %v12152_v8 }
0x1620   :  { %v16243_v29 = vpop.eup %16242 }
0x1621   :  { %v16245_v44 = vpop.eup %16244  ;;  %10467 = vrot.lane.b32.xlu0 %v16243_v29, %s16321_s15 }
0x1622   :  { %10465 = vrot.lane.b32.xlu1 %v16245_v44, %s16321_s15  ;;  %v12186_v44 = vand.u32 4294901760, %v12150_v41 }
0x1625   :  { %v16247_v63 = vpop.eup %16246 }
0x1626   :  { %12106 = vrot.lane.b32.xlu1 %v16247_v63, %s16321_s15  ;;  %v16249_v23 = vpop.eup %16248  ;;  %v12189_v63 = vand.u32 4294901760, %v12151_v52 }
0x1627   :  { %v16251_v59 = vpop.eup %16250 }
0x1628   :  { %v16253_v26 = vpop.eup %16252  ;;  %v10432_v5 = vadd.f32 1.0, %v16251_v59  ;;  %v18467_v34 = vpack.c.bf16 %v12189_v63, %v12186_v44  ;;  %v12195_v59 = vand.u32 4294901760, %v12153_v39 }
0x1629   :  { %v10431_v28 = vadd.f32 1.0, %v16253_v26  ;;  %v12288_v26 = vsub.f32 %v12146_v49, %v12174_v2 }
0x162a   :  { %12108 = vrot.lane.b32.xlu1 %v16249_v23, %s16321_s15  ;;  %16254 = vrcp.f32 %v10432_v5  ;;  %15711 = vmatprep.subr.bf16.mxu0 %v18467_v34  ;;  %v12295_v5 = vsub.f32 %v12147_v57, %v12177_v36 }
0x162b   :  { %16256 = vrcp.f32 %v10431_v28  ;;  %15713 = vmatpush3.bf16.msra.mxu0 %v18467_v34  ;;  %v18477_v28 = vpack.c.bf16 %v12195_v59, %v12192_v3 }
0x162d   :  { %15715 = vmatprep.subr.bf16.mxu0 %v18477_v28 }
0x162f   :  { %15717 = vmatpush3.bf16.msra.mxu0 %v18477_v28 }
0x1634   :  { %v16255_v20 = vpop.eup %16254 }
0x1635   :  { %v16257_v35 = vpop.eup %16256 }
0x1686   :  { %v12067_v11 = vpop.xlane.xlu0 %12066 }
0x1687   :  { %v12069_v31 = vadd.f32 %v13448_v1, %v12067_v11  ;;  %v12064_v46 = vpop.xlane.xlu1 %12063  ;;  %v12289_v11 = vand.u32 4294901760, %v12288_v26 }
0x1688   :  { %v12068_v61 = vadd.f32 %v13448_v1, %v12064_v46 }
0x1689   :  { %v13454_v0 = vmul.f32 -1.442695, %v12069_v31  ;;  %v12296_v31 = vand.u32 4294901760, %v12295_v5 }
0x168a   :  { %v13453_v7 = vmul.f32 -1.442695, %v12068_v61  ;;  %v12290_v61 = vsub.f32 %v12288_v26, %v12289_v11 }
0x168b   :  { %16258 = vpow2.f32 %v13454_v0  ;;  %v12302_v0 = vsub.f32 %v12148_v42, %v12180_v55 }
0x168c   :  { %16260 = vpow2.f32 %v13453_v7  ;;  %v12309_v7 = vsub.f32 %v12149_v9, %v12183_v56 }
0x1693   :  { %v10468_v37 = vpop.permute.xlu0 %10467 }
0x1694   :  { %v10472_v43 = vadd.f32 %v16255_v20, %v10468_v37  ;;  %v10466_v19 = vpop.permute.xlu1 %10465  ;;  %v12297_v37 = vsub.f32 %v12295_v5, %v12296_v31 }
0x1695   :  { %v16259_v10 = vpop.eup %16258  ;;  %v10471_v25 = vadd.f32 %v16257_v35, %v10466_v19  ;;  %v12310_v19 = vand.u32 4294901760, %v12309_v7 }
0x1696   :  { %v16261_v53 = vpop.eup %16260  ;;  %v12077_v13 = vadd.f32 1.0, %v16259_v10  ;;  %16262 = vrcp.f32 %v10472_v43  ;;  %v12303_v43 = vand.u32 4294901760, %v12302_v0  ;;  %v12298_v10 = vand.u32 4294901760, %v12297_v37 }
0x1697   :  { %v12076_v60 = vadd.f32 1.0, %v16261_v53  ;;  %16264 = vrcp.f32 %v10471_v25  ;;  %v12311_v53 = vsub.f32 %v12309_v7, %v12310_v19 }
0x1698   :  { %16266 = vrcp.f32 %v12077_v13  ;;  %v12107_v51 = vpop.permute.xlu1 %12106  ;;  %v12304_v25 = vsub.f32 %v12302_v0, %v12303_v43  ;;  %v12316_v13 = vsub.f32 %v12150_v41, %v12186_v44  ;;  %v18486_v41 = vpack.c.bf16 %v12295_v5, %v12288_v26 }
0x1699   :  { %16268 = vrcp.f32 %v12076_v60  ;;  %v12323_v60 = vsub.f32 %v12151_v52, %v12189_v63  ;;  %v18488_v52 = vpack.c.bf16 %v12309_v7, %v12302_v0  ;;  %v18494_v63 = vpack.c.bf16 %v12296_v31, %v12289_v11 }
0x169c   :  { %v12109_v38 = vpop.permute.xlu1 %12108 }
0x16a0   :  { %v16263_v45 = vpop.eup %16262 }
0x16a1   :  { %v16265_v24 = vpop.eup %16264  ;;  %v10476_v4 = vmul.f32 %v16263_v45, %v16255_v20  ;;  %v12844_v20 = vld [vmem:[#allocation2] sm:$0x1]  ;;  %v12305_v45 = vand.u32 4294901760, %v12304_v25 }
0x16a2   :  { %v16267_v1 = vpop.eup %16266  ;;  %v10474_v62 = vmul.f32 %v16265_v24, %v16257_v35  ;;  %v12291_v35 = vand.u32 4294901760, %v12290_v61  ;;  %v12312_v24 = vand.u32 4294901760, %v12311_v53 }
0x16a3   :  { %v16269_v48 = vpop.eup %16268  ;;  %v12113_v6 = vadd.f32 %v16267_v1, %v12109_v38  ;;  %v10490_v32 = vsub.f32 1.0, %v10476_v4  ;;  %v12324_v38 = vand.u32 4294901760, %v12323_v60 }
0x16a4   :  { %v12112_v14 = vadd.f32 %v16269_v48, %v12107_v51  ;;  %10479 = vperm.xlu0 %16092, %v10474_v62   ;;  %v10489_v27 = vsub.f32 1.0, %v10474_v62  ;;  %v18481_v51 = vpack.c.bf16 %v12298_v10, %v12291_v35  ;;  %v18484_v62 = vpack.c.bf16 %v12312_v24, %v12305_v45 }
0x16a5   :  { %16270 = vrcp.f32 %v12113_v6  ;;  %v12330_v6 = vsub.f32 %v12152_v8, %v12192_v3 }
0x16a6   :  { %16272 = vrcp.f32 %v12112_v14  ;;  %10493 = vperm.xlu1 %16093, %v10489_v27   ;;  %15719 = vmatprep.subr.bf16.mxu0 %v18481_v51  ;;  %v12337_v14 = vsub.f32 %v12153_v39, %v12195_v59 }
0x16a7   :  { %v12331_v49 = vand.u32 4294901760, %v12330_v6 }
0x16a8   :  { %10498 = vperm.xlu0 %16092, %v10490_v32   ;;  %v12338_v57 = vand.u32 4294901760, %v12337_v14  ;;  %v18492_v44 = vpack.c.bf16 %v12337_v14, %v12330_v6 }
0x16a9   :  { %v12332_v36 = vsub.f32 %v12330_v6, %v12331_v49 }
0x16aa   :  { %10484 = vperm.xlu1 %16093, %v10476_v4   ;;  %v12339_v42 = vsub.f32 %v12337_v14, %v12338_v57 }
0x16ab   :  { %v12333_v9 = vand.u32 4294901760, %v12332_v36 }
0x16ac   :  { %v12340_v55 = vand.u32 4294901760, %v12339_v42 }
0x16ae   :  { %v15730_v56 = vpack.c.bf16 %v12340_v55, %v12333_v9 }
0x16af   :  { %v16271_v29 = vpop.eup %16270 }
0x16b0   :  { %v16273_v50 = vpop.eup %16272  ;;  %v12117_v30 = vmul.f32 %v16271_v29, %v16267_v1  ;;  %v12317_v1 = vand.u32 4294901760, %v12316_v13  ;;  %v18490_v29 = vpack.c.bf16 %v12323_v60, %v12316_v13 }
0x16b1   :  { %v12115_v23 = vmul.f32 %v16273_v50, %v16269_v48  ;;  %v12325_v48 = vsub.f32 %v12323_v60, %v12324_v38  ;;  %v18496_v50 = vpack.c.bf16 %v12310_v19, %v12303_v43 }
0x16b2   :  { %v12131_v46 = vsub.f32 1.0, %v12117_v30  ;;  %v12318_v4 = vsub.f32 %v12316_v13, %v12317_v1 }
0x16b3   :  { %12120 = vperm.xlu1 %16093, %v12115_v23   ;;  %v12130_v16 = vsub.f32 1.0, %v12115_v23  ;;  %v12326_v32 = vand.u32 4294901760, %v12325_v48  ;;  %v18498_v23 = vpack.c.bf16 %v12324_v38, %v12317_v1 }
0x16b4   :  { %v12319_v27 = vand.u32 4294901760, %v12318_v4 }
0x16b5   :  { %12134 = vperm.xlu0 %16092, %v12130_v16  }
0x16b6   :  { %v15726_v2 = vpack.c.bf16 %v12326_v32, %v12319_v27 }
0x16b7   :  { %12125 = vperm.xlu1 %16093, %v12117_v30   ;;  %v18500_v30 = vpack.c.bf16 %v12338_v57, %v12331_v49 }
0x16b9   :  { %12139 = vperm.xlu0 %16092, %v12131_v46  }
0x16bb   :  { %12847 = vperm.xlu1 %16093, %v12844_v20  }
0x1723   :  { %v10480_v8 = vpop.permute.xlu0 %10479 }
0x1724   :  { %v10487_v16 = vmul.f32 %v10480_v8, %v18350_v18 }
0x1725   :  { %v10494_v39 = vpop.permute.xlu1 %10493 }
0x1726   :  { %v10501_v3 = vmul.f32 %v10494_v39, %v18418_v58 }
0x1727   :  { %v10499_v59 = vpop.permute.xlu0 %10498 }
0x1728   :  { %v10503_v26 = vadd.f32 %v10501_v3, %v10487_v16  ;;  %v10502_v11 = vmul.f32 %v18415_v17, %v10499_v59 }
0x1729   :  { %v10485_v5 = vpop.permute.xlu1 %10484 }
0x172a   :  { %v12162_v46 = vsel %vm830_vm8, %v10503_v26, 0  ;;  %v10488_v31 = vmul.f32 %v18347_v12, %v10485_v5 }
0x172b   :  { %v18507_v61 = vand.u32 4294901760, %v12162_v46 }
0x172c   :  { %v10504_v0 = vadd.f32 %v10502_v11, %v10488_v31 }
0x172d   :  { %v18510_v7 = vsub.f32 %v12162_v46, %v18507_v61 }
0x172e   :  { %v12165_v20 = vsel %vm830_vm8, %v10504_v0, 0 }
0x172f   :  { %v18513_v18 = vand.u32 4294901760, %v12165_v20  ;;  %v12248_v58 = vand.u32 4294901760, %v18510_v7 }
0x1731   :  { %v18517_v37 = vsub.f32 %v12165_v20, %v18513_v18  ;;  %v12249_v35 = vsub.f32 %v18510_v7, %v12248_v58 }
0x1732   :  { %v12121_v17 = vpop.permute.xlu1 %12120 }
0x1733   :  { %v12250_v43 = vand.u32 4294901760, %v12249_v35  ;;  %v12258_v12 = vand.u32 4294901760, %v18517_v37  ;;  %v12128_v10 = vmul.f32 %v12121_v17, %v18433_v21 }
0x1734   :  { %v12135_v19 = vpop.permute.xlu0 %12134 }
0x1735   :  { %v12142_v25 = vmul.f32 %v12135_v19, %v18412_v47  ;;  %14416 = vmatprep.mubr.f32.mxu0 %v12250_v43  ;;  %v12259_v53 = vsub.f32 %v18517_v37, %v12258_v12 }
0x1736   :  { %v12126_v13 = vpop.permute.xlu1 %12125 }
0x1737   :  { %v12144_v60 = vadd.f32 %v12142_v25, %v12128_v10  ;;  %v12260_v45 = vand.u32 4294901760, %v12259_v53  ;;  %v12129_v38 = vmul.f32 %v18430_v15, %v12126_v13 }
0x1738   :  { %v12140_v24 = vpop.permute.xlu0 %12139 }
0x1739   :  { %v12168_v1 = vsel %vm830_vm8, %v12144_v60, 0  ;;  %v12143_v4 = vmul.f32 %v18409_v40, %v12140_v24  ;;  %14417 = vmatmul.mubr.f32.vlgmr.msra.gmra.mrb[20].mxu0 %v12260_v45 }
0x173a   :  { %v18527_v48 = vand.u32 4294901760, %v12168_v1  ;;  %15721 = vmatpush3.bf16.msra.mxu0 %v18481_v51 }
0x173b   :  { %v12145_v21 = vadd.f32 %v12143_v4, %v12129_v38  ;;  %15723 = vmatprep.subr.bf16.mxu0 %v18484_v62 }
0x173c   :  { %v12267_v47 = vsub.f32 %v12168_v1, %v18527_v48 }
0x173d   :  { %v12171_v6 = vsel %vm830_vm8, %v12145_v21, 0 }
0x173e   :  { %v18533_v14 = vand.u32 4294901760, %v12171_v6  ;;  %15725 = vmatpush3.bf16.msra.mxu0 %v18484_v62  ;;  %v12268_v27 = vand.u32 4294901760, %v12267_v47 }
0x173f   :  { %15727 = vmatprep.subr.bf16.mxu0 %v15726_v2 }
0x1740   :  { %v12277_v40 = vsub.f32 %v12171_v6, %v18533_v14  ;;  %v12269_v15 = vsub.f32 %v12267_v47, %v12268_v27  ;;  %v12848_v6 = vpop.permute.xlu1 %12847 }
0x1742   :  { %v12270_v32 = vand.u32 4294901760, %v12269_v15  ;;  %15729 = vmatpush3.bf16.msra.mxu0 %v15726_v2  ;;  %v12278_v49 = vand.u32 4294901760, %v12277_v40 }
0x1743   :  { %15731 = vmatprep.subr.bf16.mxu0 %v15730_v56 }
0x1744   :  { %14419 = vmatprep.mubr.f32.mxu0 %v12270_v32  ;;  %v12279_v51 = vsub.f32 %v12277_v40, %v12278_v49 }
0x1746   :  { %v12280_v57 = vand.u32 4294901760, %v12279_v51  ;;  %15733 = vmatpush3.bf16.msra.mxu0 %v15730_v56 }
0x1747   :  { %15735 = vmatprep.subr.bf16.mxu0 %v18486_v41 }
0x1748   :  { %14420 = vmatmul.mubr.f32.gmra.mrb[22].mxu0 %v12280_v57 }
0x1749   :  { %14438 = vmatprep.mubr.f32.mxu0 %v18507_v61 }
0x174c   :  { %14439 = vmatmul.mubr.f32.vlgmr.msra.gmra.mrb[20].mxu0 %v18513_v18 }
0x174d   :  { %15737 = vmatpush3.bf16.msra.mxu0 %v18486_v41  ;;  %14441 = vmatprep.mubr.f32.mxu0 %v18527_v48 }
0x174e   :  { %15739 = vmatprep.subr.bf16.mxu0 %v18488_v52 }
0x1750   :  { %14442 = vmatmul.mubr.f32.gmra.mrb[22].mxu0 %v18533_v14 }
0x1751   :  { %15741 = vmatpush3.bf16.msra.mxu0 %v18488_v52  ;;  %14460 = vmatprep.mubr.f32.mxu0 %v18510_v7 }
0x1752   :  { %15743 = vmatprep.subr.bf16.mxu0 %v18490_v29 }
0x1755   :  { %15745 = vmatpush3.bf16.msra.mxu0 %v18490_v29 }
0x1756   :  { %15747 = vmatprep.subr.bf16.mxu0 %v18492_v44 }
0x1759   :  { %15749 = vmatpush3.bf16.msra.mxu0 %v18492_v44 }
0x175a   :  { %15751 = vmatprep.subr.bf16.mxu0 %v18447_v22 }
0x175c   :  { %14461 = vmatmul.mubr.f32.vlgmr.msra.gmra.mrb[20].mxu0 %v18517_v37 }
0x175d   :  { %14463 = vmatprep.mubr.f32.mxu0 %v12267_v47  ;;  %15753 = vmatpush3.bf16.msra.mxu0 %v18447_v22 }
0x175e   :  { %15755 = vmatprep.subr.bf16.mxu0 %v18457_v54 }
0x1760   :  { %14464 = vmatmul.mubr.f32.gmra.mrb[22].mxu0 %v12277_v40 }
0x1761   :  { %15757 = vmatpush3.bf16.msra.mxu0 %v18457_v54  ;;  %14482 = vmatprep.mubr.f32.mxu0 %v12248_v58 }
0x1762   :  { %15759 = vmatprep.subr.bf16.mxu0 %v18467_v34 }
0x1765   :  { %15761 = vmatpush3.bf16.msra.mxu0 %v18467_v34 }
0x1766   :  { %15763 = vmatprep.subr.bf16.mxu0 %v18477_v28 }
0x1769   :  { %15765 = vmatpush3.bf16.msra.mxu0 %v18477_v28 }
0x176a   :  { %15767 = vmatprep.subr.bf16.mxu0 %v18494_v63 }
0x176c   :  { %14483 = vmatmul.mubr.f32.vlgmr.msra.gmra.mrb[20].mxu0 %v12258_v12 }
0x176d   :  { %14485 = vmatprep.mubr.f32.mxu0 %v12268_v27  ;;  %15769 = vmatpush3.bf16.msra.mxu0 %v18494_v63 }
0x176e   :  { %15771 = vmatprep.subr.bf16.mxu0 %v18496_v50 }
0x1770   :  { %14486 = vmatmul.mubr.f32.gmra.mrb[22].mxu0 %v12278_v49 }
0x1771   :  { %15773 = vmatpush3.bf16.msra.mxu0 %v18496_v50  ;;  %14504 = vmatprep.mubr.f32.mxu0 %v18507_v61 }
0x1772   :  { %15775 = vmatprep.subr.bf16.mxu0 %v18498_v23 }
0x1775   :  { %15777 = vmatpush3.bf16.msra.mxu0 %v18498_v23 }
0x1776   :  { %15779 = vmatprep.subr.bf16.mxu0 %v18500_v30 }
0x1779   :  { %15781 = vmatpush3.bf16.msra.mxu0 %v18500_v30 }
0x177a   :  { %15783 = vmatprep.subr.bf16.mxu0 %v18447_v22 }
0x177c   :  { %14505 = vmatmul.mubr.f32.vlgmr.msra.gmra.mrb[20].mxu0 %v18513_v18 }
0x177d   :  { %14507 = vmatprep.mubr.f32.mxu0 %v18527_v48  ;;  %15785 = vmatpush3.bf16.msra.mxu0 %v18447_v22  ;;  %v16323_v22 = vmov 0.0|0.0  }
0x177e   :  { %15787 = vmatprep.subr.bf16.mxu0 %v18457_v54  ;;  %15798 = vmatprep.subr.bf16.mxu1 %v16323_v22 }
0x1780   :  { %14508 = vmatmul.mubr.f32.gmra.mrb[22].mxu0 %v18533_v14 }
0x1781   :  { %15789 = vmatpush3.bf16.msra.mxu0 %v18457_v54  ;;  %14526 = vmatprep.mubr.f32.mxu0 %v18507_v61  ;;  %v18777_v54 = vmov 0.0  }
0x1782   :  { %15791 = vmatprep.subr.bf16.mxu0 %v18467_v34  ;;  %14540 = vmatprep.mubr.msk.f32.mxu1 %vm16324_vm11, %v18777_v54 }
0x1785   :  { %15793 = vmatpush3.bf16.msra.mxu0 %v18467_v34  ;;  %v13457_v34 = vld [vmem:[%s18658_s17] ss:$0 sm:$0xff]  ;;  %s16325_s17 = smov 112  }
0x1786   :  { %15795 = vmatprep.subr.bf16.mxu0 %v18477_v28 }
0x1789   :  { %15797 = vmatpush3.bf16.msra.mxu0 %v18477_v28  ;;  %v12843_v28 = vld [vmem:[%s18778_s21] sm:$0x1] }
0x178a   :  { %v12855_v55 = vsel %vm212_vm7, %v12843_v28, 0 }
0x178b   :  { %v18595_v30 = vand.u32 4294901760, %v12855_v55 }
0x178c   :  { %14527 = vmatmul.mubr.f32.vlgmr.msra.gmra.mrb[20].mxu0 %v18513_v18 }
0x178d   :  { %14529 = vmatprep.mubr.f32.mxu0 %v18527_v48  ;;  %v12939_v61 = vsub.f32 %v12855_v55, %v18595_v30 }
0x178f   :  { %v12940_v10 = vand.u32 4294901760, %v12939_v61 }
0x1790   :  { %14530 = vmatmul.mubr.f32.gmra.mrb[22].mxu0 %v18533_v14  ;;  %v12853_v14 = vrot.slane %v12848_v6, %v18776_v33 }
0x1791   :  { %v12941_v4 = vsub.f32 %v12939_v61, %v12940_v10 }
0x1793   :  { %v12942_v47 = vand.u32 4294901760, %v12941_v4 }
0x185f   :  { %v14528_v62 = vpop.f32.mrb[20].mxu0 }
0x1860   :  { %v15846_v2 = vadd.f32 %v14528_v62, %v13457_v34  ;;  %v12817_v36 = vpop.f32.mrb[21].mxu0 }
0x1861   :  { %v15847_v42 = vadd.f32 %v13457_v34, %v12817_v36 }
0x1862   :  { %v12840_v9 = vmax.f32 %v15846_v2, 0.0 }
0x1863   :  { %v12839_v56 = vmax.f32 %v15847_v42, 0.0  ;;  %v14531_v41 = vpop.f32.mrb[22].mxu0 }
0x1864   :  { %v12861_v52 = vsel %vm212_vm7, %v12840_v9, 0  ;;  %v15848_v29 = vadd.f32 %v14531_v41, %v13457_v34  ;;  %v12829_v44 = vpop.f32.mrb[23].mxu0 }
0x1865   :  { %v12873_v63 = vand.u32 4294901760, %v12861_v52  ;;  %v12858_v50 = vsel %vm212_vm7, %v12839_v56, 0  ;;  %v15849_v23 = vadd.f32 %v13457_v34, %v12829_v44 }
0x1866   :  { %v12870_v8 = vand.u32 4294901760, %v12858_v50  ;;  %v12842_v39 = vmax.f32 %v15848_v29, 0.0 }
0x1867   :  { %v12957_v16 = vsub.f32 %v12861_v52, %v12873_v63  ;;  %v12841_v3 = vmax.f32 %v15849_v23, 0.0 }
0x1868   :  { %v15799_v59 = vpack.c.bf16 %v12873_v63, %v12870_v8  ;;  %v12950_v26 = vsub.f32 %v12858_v50, %v12870_v8  ;;  %v12867_v5 = vsel %vm212_vm7, %v12842_v39, 0 }
0x1869   :  { %v12958_v46 = vand.u32 4294901760, %v12957_v16  ;;  %v12879_v11 = vand.u32 4294901760, %v12867_v5  ;;  %v12864_v31 = vsel %vm212_vm7, %v12841_v3, 0 }
0x186a   :  { %v12951_v0 = vand.u32 4294901760, %v12950_v26  ;;  %v12876_v7 = vand.u32 4294901760, %v12864_v31  ;;  %15800 = vmatpush3.bf16.xpose.msra.mxu1 %v15799_v59  ;;  %v15811_v20 = vpack.c.bf16 %v12957_v16, %v12950_v26 }
0x186b   :  { %v12959_v18 = vsub.f32 %v12957_v16, %v12958_v46  ;;  %v12971_v58 = vsub.f32 %v12867_v5, %v12879_v11  ;;  %15801 = vmatprep.subr.bf16.mxu1 %v16323_v22 }
0x186c   :  { %v12952_v37 = vsub.f32 %v12950_v26, %v12951_v0  ;;  %v15802_v35 = vpack.c.bf16 %v12879_v11, %v12876_v7  ;;  %v12964_v17 = vsub.f32 %v12864_v31, %v12876_v7  ;;  %v15823_v43 = vpack.c.bf16 %v12958_v46, %v12951_v0 }
0x186d   :  { %v12960_v12 = vand.u32 4294901760, %v12959_v18  ;;  %v12972_v19 = vand.u32 4294901760, %v12971_v58 }
0x186e   :  { %v12953_v25 = vand.u32 4294901760, %v12952_v37  ;;  %v12965_v53 = vand.u32 4294901760, %v12964_v17  ;;  %v15814_v13 = vpack.c.bf16 %v12971_v58, %v12964_v17 }
0x186f   :  { %v12973_v60 = vsub.f32 %v12971_v58, %v12972_v19 }
0x1870   :  { %v12966_v45 = vsub.f32 %v12964_v17, %v12965_v53  ;;  %v15805_v24 = vpack.c.bf16 %v12960_v12, %v12953_v25  ;;  %v15826_v1 = vpack.c.bf16 %v12972_v19, %v12965_v53 }
0x1871   :  { %v12974_v38 = vand.u32 4294901760, %v12973_v60 }
0x1872   :  { %v12967_v48 = vand.u32 4294901760, %v12966_v45  ;;  %15803 = vmatpush3.bf16.xpose.msra.mxu1 %v15802_v35 }
0x1873   :  { %15804 = vmatprep.subr.bf16.mxu1 %v16323_v22 }
0x1874   :  { %v15808_v21 = vpack.c.bf16 %v12974_v38, %v12967_v48 }
0x1879   :  { %14541 = vmatmul.mubr.f32.vlgmr.msra.gmra.mrb[20].mxu1 %v12942_v47 }
0x187a   :  { %15806 = vmatpush3.bf16.xpose.msra.mxu1 %v15805_v24  ;;  %14551 = vmatprep.mubr.msk.f32.mxu1 %vm16324_vm11, %v18777_v54 }
0x187b   :  { %15807 = vmatprep.subr.bf16.mxu1 %v16323_v22 }
0x1882   :  { %15809 = vmatpush3.bf16.xpose.msra.mxu1 %v15808_v21 }
0x1883   :  { %15810 = vmatprep.subr.bf16.mxu1 %v16323_v22 }
0x1889   :  { %14552 = vmatmul.mubr.f32.vlgmr.msra.gmra.mrb[20].mxu1 %v18595_v30 }
0x188a   :  { %15812 = vmatpush3.bf16.xpose.msra.mxu1 %v15811_v20  ;;  %14562 = vmatprep.mubr.msk.f32.mxu1 %vm16324_vm11, %v18777_v54 }
0x188b   :  { %15813 = vmatprep.subr.bf16.mxu1 %v16323_v22 }
0x1892   :  { %15815 = vmatpush3.bf16.xpose.msra.mxu1 %v15814_v13 }
0x1893   :  { %15816 = vmatprep.subr.bf16.mxu1 %v16323_v22 }
0x1899   :  { %14563 = vmatmul.mubr.f32.vlgmr.msra.gmra.mrb[20].mxu1 %v12939_v61 }
0x189a   :  { %15818 = vmatpush3.bf16.xpose.msra.mxu1 %v15799_v59  ;;  %14573 = vmatprep.mubr.msk.f32.mxu1 %vm16324_vm11, %v18777_v54 }
0x189b   :  { %15819 = vmatprep.subr.bf16.mxu1 %v16323_v22 }
0x18a2   :  { %15821 = vmatpush3.bf16.xpose.msra.mxu1 %v15802_v35 }
0x18a3   :  { %15822 = vmatprep.subr.bf16.mxu1 %v16323_v22 }
0x18a9   :  { %14574 = vmatmul.mubr.f32.vlgmr.msra.gmra.mrb[20].mxu1 %v12940_v10 }
0x18aa   :  { %15824 = vmatpush3.bf16.xpose.msra.mxu1 %v15823_v43  ;;  %14584 = vmatprep.mubr.msk.f32.mxu1 %vm16324_vm11, %v18777_v54 }
0x18ab   :  { %15825 = vmatprep.subr.bf16.mxu1 %v16323_v22 }
0x18b2   :  { %15827 = vmatpush3.bf16.xpose.msra.mxu1 %v15826_v1 }
0x18b3   :  { %15828 = vmatprep.subr.bf16.mxu1 %v16323_v22 }
0x18b9   :  { %14585 = vmatmul.mubr.f32.vlgmr.msra.gmra.mrb[20].mxu1 %v18595_v30 }
0x18ba   :  { %15830 = vmatpush3.bf16.xpose.msra.mxu1 %v15799_v59  ;;  %14595 = vmatprep.mubr.msk.f32.mxu1 %vm16324_vm11, %v18777_v54 }
0x18bb   :  { %15831 = vmatprep.subr.bf16.mxu1 %v16323_v22 }
0x18c2   :  { %15833 = vmatpush3.bf16.xpose.msra.mxu1 %v15802_v35 }
0x18c9   :  { %14596 = vmatmul.mubr.f32.vlgmr.msra.gmra.mrb[20].mxu1 %v18595_v30 }
0x199c   :  { %v13350_v27 = vpop.f32.mrb[20].mxu1 }
0x199d   :  { %v15850_v40 = vadd.f32 %v13350_v27, %v12853_v14  ;;  %v14597_v15 = vpop.f32.mrb[21].mxu1 }
0x199f   :  { %v13355_v32 = vrot.slane %v15850_v40, 7 }
0x19a1   :  { %13356 = vrot.lane.b32.xlu0 %v13355_v32, %s16325_s17 }
0x1a13   :  { %v13357_v49 = vpop.permute.xlu0 %13356 }
0x1a14   :  { %v13359_v51 = vsel %vm171_vm0, %v15850_v40, %v13357_v49 }
0x1a15   :  { %v13361_v57 = vsel %vm13360_vm12, %v13359_v51, -inf }
0x1a16   :  { %v13362_v54 = vrot.slane %v13361_v57, 4 }
0x1a18   :  { %v13363_v22 = vmax.f32 %v13361_v57, %v13362_v54 }
0x1a1a   :  { %v13364_v34 = vrot.slane %v13363_v22, 2 }
0x1a1c   :  { %v13365_v62 = vmax.f32 %v13363_v22, %v13364_v34 }
0x1a1e   :  { %v13366_v28 = vrot.slane %v13365_v62, 1 }
0x1a20   :  { %v13367_v2 = vmax.f32 %v13365_v62, %v13366_v28 }
0x1a22   :  { %v13368_v36 = vsub.f32 %v13359_v51, %v13367_v2 }
0x1a24   :  { %v13369_v33 = vmul.f32 1.442695, %v13368_v36 }
0x1a26   :  { %16274 = vpow2.f32 %v13369_v33 }
0x1a30   :  { %v16275_v42 = vpop.eup %16274 }
0x1a31   :  { %v13371_v9 = vsel %vm13360_vm12, %v16275_v42, 0.0 }
0x1a32   :  { %v13372_v55 = vrot.slane %v13371_v9, 4 }
0x1a34   :  { %v13373_v56 = vadd.f32 %v13372_v55, %v13371_v9 }
0x1a36   :  { %v13374_v41 = vrot.slane %v13373_v56, 2 }
0x1a38   :  { %v13375_v52 = vadd.f32 %v13374_v41, %v13373_v56 }
0x1a3a   :  { %v13376_v29 = vrot.slane %v13375_v52, 1 }
0x1a3c   :  { %v13377_v44 = vadd.f32 %v13376_v29, %v13375_v52 }
0x1a3e   :  { %16276 = vlog2.f32 %v13377_v44 }
0x1a48   :  { %v16277_v63 = vpop.eup %16276 }
0x1a49   :  { %v13379_v50 = vmul.f32 0.6931472, %v16277_v63 }
0x1a4b   :  { %v13380_v23 = vsub.f32 %v13368_v36, %v13379_v50 }
0x1a4d   :  { %13381 = vst.msk [vmem:[#allocation6] sm:$0x3] %vm13360_vm12, %v13380_v23 }
0x1a4e   :  { %16301 = shalt.err (!%p16298_p9)
}
0x1a4f   :  { %s18779_s18 = sld [smem:[#allocation19_spill]] }
0x1a55   :  { %s16302_s14 = scalar_lea.hbm %s18779_s18, 32 }
0x1a56   :  { %p16303_p10 = scmp.ne.s32.totalorder %s18779_s18, %s16302_s14  ;;  %p16306_p11 = scmp.lt.u32.totalorder %s16302_s14, %s18779_s18 }
0x1a58   :  { %p16308_p12 = pnand %p16306_p11, %p16303_p10 }
0x1a5a   :  { %16311 = shalt.err (!%p16308_p12)
}
0x1a5b   :  { %13391 = dma.vmem_to_hbm [thread:$0]  %s13389_s6, 32, %s18779_s18, [#allocation4]  }
0x1a5c   :  { %16314 = dma.done.wait [#allocation4], 32  }
0x1a5d   :  { %16315 = vsyncadd [#allocation4], 4294967264 }
0x1a5e   :  { %13395 = vsyncpa [#allocation4], 1 }
0x1a5f   :  { %13396 = vsyncpa [#allocation5], 1 }

</bundles_post_ra>
